<compile_context>
chip_gen: v6e
topology: v6e:2x2x1
jax: 0.10.0
libtpu: 0.0.40
codegen_flags: <defaults>
</compile_context>

<pallas_src>
import functools

import jax
import jax.numpy as jnp
from jax.experimental import pallas as pl
from jax.experimental.pallas import tpu as pltpu

MAXK = 63            # largest mixed-conv kernel (1, 63)
PAD = MAXK // 2      # 31 — unified 'same' padding (smaller kernels are zero-embedded)


# --------------------------- fused batched kernel ---------------------------
def _b76_kernel(x_ref, tbd_ref, sh1_ref, lbd_ref, wrow_ref, gsum_ref, shc_ref,
                pmat_ref, bsum_ref, brep_ref, rrep_ref, wmask_ref, csum_ref, bfc_ref,
                slab_ref, logit_ref):
    f32 = jnp.float32
    bf16 = jnp.bfloat16

    # ---- stage A: mixBlockRes = x + BN1(mixed depthwise conv(x)).
    #      One bf16 block-diag Toeplitz matmul on rows (b, h) x cols (c, w);
    #      residual added separately in f32 (identity not rounded to bf16).
    xb = x_ref[...]                                                   # (B_blk*H, C*W) f32
    conv = jnp.dot(xb.astype(bf16), tbd_ref[...], preferred_element_type=f32)
    h1 = xb + conv + sh1_ref[...]

    # ---- stages B+C folded (Conv(1,2)s2 + BN2 + grouped Conv(nChan,1) + BN3).
    #      Lbd (block-diag over b) contracts h and carries BN3*Wc3; Wrow carries the
    #      per-(o, c, parity) conv2*BN2 taps; Gsum collapses (c, parity) column groups
    #      onto the stride-2 time axis.  All MXU / VPU, no relayouts.
    z = jnp.dot(lbd_ref[...], h1.astype(bf16), preferred_element_type=f32)   # (B_blk*2m, C*W)
    y3 = jnp.dot((z * wrow_ref[...]).astype(bf16), gsum_ref[...],
                 preferred_element_type=f32) + shc_ref[...]                   # (B_blk*2m, T2)
    y3 = jnp.maximum(y3, 0.0)                                                 # ReLU

    # ---- AvgPool2d((1, pool)) as one matmul. rows = (b, o), cols = tp.
    pooled = jnp.dot(y3, pmat_ref[...], preferred_element_type=f32)           # (B_blk*2m, Tp)

    # ---- F.normalize denominator per sample (sum over (o, tp) without any flatten).
    psq = jnp.sum(pooled * pooled, axis=1, keepdims=True)                     # (B_blk*2m, 1)
    ssq = jnp.dot(bsum_ref[...], psq, preferred_element_type=f32)             # (B_blk, 1)
    invn = jax.lax.rsqrt(jnp.maximum(ssq, 1e-24))                             # == 1/max(||f||,1e-12)
    invn_rows = jnp.dot(brep_ref[...], invn, preferred_element_type=f32)      # (B_blk*2m, 1)

    # ---- constrained linear head: logits[b,n] = sum_{o,tp} pooled[(b,o),tp]*Wfc[n,(o,tp)].
    #      Row (o)-dependent fc weights applied via replicate -> mask -> per-sample sum.
    prep = jnp.dot(pooled, rrep_ref[...], preferred_element_type=f32) * wmask_ref[...]
    logits = jnp.dot(jnp.dot(bsum_ref[...], prep, preferred_element_type=f32),
                     csum_ref[...], preferred_element_type=f32) + bfc_ref[...]

    # ---- outputs: one pooled slab [feature | normalized-feature] (wrapper reshapes to
    #      flatten order for free) + the logits.
    tp = pooled.shape[1]
    slab_ref[:, :tp] = pooled.astype(slab_ref.dtype)
    slab_ref[:, tp:] = (pooled * invn_rows).astype(slab_ref.dtype)
    logit_ref[...] = logits.astype(logit_ref.dtype)


def b76_forward(x, p, *, single_buffer_weights=True):
    B, C, H, W = x.shape
    CW = C * W
    T2, Tp = p["pmat"].shape
    nC = p["bfc"].shape[1]
    Bblk = p["bsum"].shape[0]
    RO = p["bsum"].shape[1]          # Bblk * 2m
    twom = RO // Bblk
    RB = Bblk * H
    Fdim = twom * Tp
    assert B % Bblk == 0 and W % 2 == 0

    # rows = (b, h), cols = (c, w): pure layout plumbing, done once by XLA in HBM.
    x2 = jnp.transpose(x, (0, 2, 1, 3)).reshape(B * H, CW)

    def wspec(shape):
        # constant-index weights are revisited every step -> single-buffer them.
        if single_buffer_weights:
            return pl.BlockSpec(shape, lambda i: (0, 0), pipeline_mode=pl.Buffered(1))
        return pl.BlockSpec(shape, lambda i: (0, 0))

    slab, logits = pl.pallas_call(
        _b76_kernel,
        out_shape=(jax.ShapeDtypeStruct((B * twom, 2 * Tp), x.dtype),
                   jax.ShapeDtypeStruct((B, nC), x.dtype)),
        grid=(B // Bblk,),
        in_specs=[
            pl.BlockSpec((RB, CW), lambda i: (i, 0)),   # x (B_blk samples per step)
            wspec((CW, CW)),                            # tbd: block-diag Toeplitz (bf16)
            wspec((1, CW)),                             # sh1
            wspec((RO, RB)),                            # lbd: block-diag h-contraction (bf16)
            wspec((RO, CW)),                            # wrow: per-(o,c,parity) taps
            wspec((CW, T2)),                            # gsum: stride-2 time collapse (bf16)
            wspec((RO, 1)),                             # shc
            wspec((T2, Tp)),                            # pmat: avg-pool
            wspec((Bblk, RO)),                          # bsum: per-sample row-sum
            wspec((RO, Bblk)),                          # brep: per-sample broadcast
            wspec((Tp, nC * Tp)),                       # rrep: column replication
            wspec((RO, nC * Tp)),                       # wmask: fc weights per (o, n, tp)
            wspec((nC * Tp, nC)),                       # csum: per-class tp-sum
            wspec((1, nC)),                             # bfc
        ],
        out_specs=(pl.BlockSpec((RO, 2 * Tp), lambda i: (i, 0)),
                   pl.BlockSpec((Bblk, nC), lambda i: (i, 0))),
        compiler_params=pltpu.CompilerParams(dimension_semantics=("parallel",)),
    )(x2, p["tbd"], p["sh1"], p["lbd"], p["wrow"], p["gsum"], p["shc"],
      p["pmat"], p["bsum"], p["brep"], p["rrep"], p["wmask"], p["csum"], p["bfc"])

    # free row-major reshapes (rows are (b, o), cols tp -> flatten order (o, tp)).
    feature = slab[:, :Tp].reshape(B, Fdim)
    norm = slab[:, Tp:].reshape(B, Fdim)
    return logits, feature, norm


# --------------------------- parameter folding (host side, once) ---------------------------
def fold_bn(gamma, beta, mean, var, conv_bias, eps=1e-5):
    scale = gamma / jnp.sqrt(var + eps)
    shift = beta + scale * (conv_bias - mean)
    return scale, shift


def prepare_params(wemb, mix_bias, bn1, Wc2, bc2, bn2, Wc3, bc3, bn3,
                   Wfc, bfc, nChan, nTime, pool, max_norm, batch_block):
    C = wemb.shape[0]
    twom = Wc3.shape[0]
    H, W = nChan, nTime
    T2 = W // 2
    Tp = T2 // pool
    nC = Wfc.shape[0]
    CW = C * W
    f32, bf16 = jnp.float32, jnp.bfloat16

    scale1, shift1 = fold_bn(*bn1, mix_bias)
    scale2, shift2 = fold_bn(*bn2, bc2)
    scale3, shift3 = fold_bn(*bn3, bc3)

    # stage A: per-channel banded Toeplitz ('same' padding), BN1 scale folded, block-diag over c.
    tt = jnp.arange(W)[:, None]                       # w_in
    ww = jnp.arange(W)[None, :]                       # w_out
    j = tt - ww + PAD
    valid = (j >= 0) & (j < MAXK)
    K = jnp.where(valid[None], wemb[:, jnp.clip(j, 0, MAXK - 1)], 0.0)        # (C, W, W)
    Tsc = scale1[:, None, None] * K
    tbd = (jnp.eye(C)[:, :, None, None] * Tsc[:, None, :, :]) \
        .transpose(0, 2, 1, 3).reshape(CW, CW)                                 # no identity folded
    sh1 = jnp.repeat(shift1, W).reshape(1, CW)

    # stages B+C folded:  y3 = (Lbd @ h1) * Wrow @ Gsum + shc  (exact; ReLU comes after BN3).
    Wc3r = Wc3.reshape(twom, H)                                                # Wc3[o,0,h,0]
    lblk = scale3[:, None] * Wc3r
    lbd = jnp.kron(jnp.eye(batch_block), lblk)                                 # (Bblk*2m, Bblk*H)

    w2s = scale2[:, None, None] * Wc2[:, :, 0, :]                              # (m, C, 2)
    q_of_o = jnp.arange(twom) // 2
    col_c = jnp.arange(CW) // W
    col_w = jnp.arange(CW) % W
    wrow1 = w2s[q_of_o[:, None], col_c[None, :], (col_w % 2)[None, :]]         # (2m, C*W)
    wrow = jnp.tile(wrow1, (batch_block, 1))

    gsum = ((col_w[:, None] // 2 == jnp.arange(T2)[None, :])
            & (col_w[:, None] < 2 * T2)).astype(f32)                           # (C*W, T2)

    shc1 = shift3 + scale3 * shift2[q_of_o] * jnp.sum(Wc3r, axis=1)
    shc = jnp.tile(shc1.reshape(twom, 1), (batch_block, 1))

    pmat = ((jnp.arange(T2)[:, None] // pool) == jnp.arange(Tp)[None, :]
            ).astype(f32) / pool                                               # (T2, Tp)

    # epilogue helpers (per-sample reductions / fc, no in-kernel relayouts).
    bsum = jnp.kron(jnp.eye(batch_block), jnp.ones((1, twom)))                 # (Bblk, Bblk*2m)
    brep = bsum.T                                                              # (Bblk*2m, Bblk)
    rrep = jnp.tile(jnp.eye(Tp), (1, nC))                                      # (Tp, nC*Tp)

    # LinearWithConstraint weight renorm (torch.renorm p=2 dim=0 maxnorm=c).
    rn = jnp.sqrt(jnp.sum(Wfc * Wfc, axis=1, keepdims=True))
    Wfc_r = Wfc * jnp.minimum(1.0, max_norm / jnp.maximum(rn, 1e-7))
    Wfc3 = Wfc_r.reshape(nC, twom, Tp)                                         # [n, o, tp]
    wmask1 = jnp.transpose(Wfc3, (1, 0, 2)).reshape(twom, nC * Tp)             # [o, (n,tp)]
    wmask = jnp.tile(wmask1, (batch_block, 1))
    csum = jnp.kron(jnp.eye(nC), jnp.ones((Tp, 1)))                            # ((n,tp), n)

    params = dict(
        tbd=tbd.astype(bf16), sh1=sh1.astype(f32),
        lbd=lbd.astype(bf16), wrow=wrow.astype(f32), gsum=gsum.astype(bf16),
        shc=shc.astype(f32), pmat=pmat.astype(f32),
        bsum=bsum.astype(f32), brep=brep.astype(f32), rrep=rrep.astype(f32),
        wmask=wmask.astype(f32), csum=csum.astype(f32),
        bfc=bfc.reshape(1, nC).astype(f32))
    return params, Wfc_r


# --------------------------- pure-JAX reference (eval-mode) ---------------------------
def reference_forward(x, wemb, mix_bias, bn1, Wc2, bc2, bn2, Wc3, bc3, bn3,
                      Wfc_r, bfc, pool, eps=1e-5):
    B, C, H, W = x.shape
    m = Wc2.shape[0]
    xpad = jnp.pad(x, ((0, 0), (0, 0), (0, 0), (PAD, PAD)))
    conv = jnp.zeros_like(x)
    for j in range(MAXK):
        conv = conv + xpad[:, :, :, j:j + W] * wemb[None, :, j, None, None]
    g, b, mu, v = bn1
    y = ((conv + mix_bias[None, :, None, None]) - mu[None, :, None, None]) \
        / jnp.sqrt(v[None, :, None, None] + eps) * g[None, :, None, None] + b[None, :, None, None]
    h1 = x + y

    T2 = W // 2
    h1r = h1[:, :, :, :T2 * 2].reshape(B, C, H, T2, 2)
    y2 = jnp.einsum('bchtp,qcp->bqht', h1r, Wc2[:, :, 0, :]) + bc2[None, :, None, None]
    g, b, mu, v = bn2
    y2 = (y2 - mu[None, :, None, None]) / jnp.sqrt(v[None, :, None, None] + eps) \
         * g[None, :, None, None] + b[None, :, None, None]

    W3r = Wc3.reshape(m, 2, H)
    y3 = jnp.einsum('bqht,qjh->bqjt', y2, W3r).reshape(B, 2 * m, T2) + bc3[None, :, None]
    g, b, mu, v = bn3
    y3 = (y3 - mu[None, :, None]) / jnp.sqrt(v[None, :, None] + eps) * g[None, :, None] \
         + b[None, :, None]
    y3 = jnp.maximum(y3, 0.0)
    Tp = T2 // pool
    pooled = y3[:, :, :Tp * pool].reshape(B, 2 * m, Tp, pool).mean(-1)
    feat = pooled.reshape(B, 2 * m * Tp)
    out = feat @ Wfc_r.T + bfc[None, :]
    nrm = feat / jnp.maximum(jnp.sqrt(jnp.sum(feat * feat, axis=1, keepdims=True)), 1e-12)
    return out, feat, nrm


if __name__ == "__main__":
    # Small shapes consistent with B76: inputSize = (nBands=9, nChan, nTime)
    B, nBands, nChan, nTime = 16, 9, 4, 40
    m, nClass, max_norm, pool = 8, 3, 0.5, 10
    B_blk = 8                                      # samples per grid step (grid = 2, even for v7x)
    T2, Tp = nTime // 2, (nTime // 2) // pool
    Fdim = 2 * m * Tp

    key = jax.random.PRNGKey(0)
    ks = jax.random.split(key, 24)
    kit = iter(range(24))
    nxt = lambda: ks[next(kit)]

    x = jax.random.normal(nxt(), (B, nBands, nChan, nTime), dtype=jnp.float32)

    # MixedConv2d: 3 depthwise groups of 3 channels, kernels (1,15)/(1,31)/(1,63),
    # zero-embedded into a unified (9, 63) tap bank ('same' padding of 31).
    wemb = jnp.zeros((nBands, MAXK), dtype=jnp.float32)
    for gi, klen in enumerate((15, 31, 63)):
        wg = 0.1 * jax.random.normal(nxt(), (3, klen), dtype=jnp.float32)
        off = PAD - klen // 2
        wemb = wemb.at[gi * 3:(gi + 1) * 3, off:off + klen].set(wg)
    mix_bias = 0.1 * jax.random.normal(nxt(), (nBands,), dtype=jnp.float32)

    def bn_params(key_, n):
        k1, k2, k3, k4 = jax.random.split(key_, 4)
        gamma = 1.0 + 0.1 * jax.random.normal(k1, (n,))
        beta = 0.1 * jax.random.normal(k2, (n,))
        mean = 0.1 * jax.random.normal(k3, (n,))
        var = jax.random.uniform(k4, (n,), minval=0.5, maxval=1.5)
        return gamma, beta, mean, var

    bn1 = bn_params(nxt(), nBands)
    Wc2 = 0.1 * jax.random.normal(nxt(), (m, nBands, 1, 2), dtype=jnp.float32)
    bc2 = 0.1 * jax.random.normal(nxt(), (m,), dtype=jnp.float32)
    bn2 = bn_params(nxt(), m)
    Wc3 = 0.1 * jax.random.normal(nxt(), (2 * m, 1, nChan, 1), dtype=jnp.float32)
    bc3 = 0.1 * jax.random.normal(nxt(), (2 * m,), dtype=jnp.float32)
    bn3 = bn_params(nxt(), 2 * m)
    Wfc = 0.1 * jax.random.normal(nxt(), (nClass, Fdim), dtype=jnp.float32)
    bfc = 0.1 * jax.random.normal(nxt(), (nClass,), dtype=jnp.float32)

    params, Wfc_r = prepare_params(wemb, mix_bias, bn1, Wc2, bc2, bn2, Wc3, bc3, bn3,
                                   Wfc, bfc, nChan, nTime, pool, max_norm, B_blk)

    # ------------------------- fused Pallas forward -------------------------
    fwd = jax.jit(functools.partial(b76_forward, single_buffer_weights=True))
    try:
        out, feature, proj_norm = fwd(x, params)
        jax.block_until_ready((out, feature, proj_norm))
    except Exception:
        # fallback if this JAX build rejects pl.Buffered(1) single-buffering
        fwd = jax.jit(functools.partial(b76_forward, single_buffer_weights=False))
        out, feature, proj_norm = fwd(x, params)
        jax.block_until_ready((out, feature, proj_norm))

    assert out.shape == (B, nClass)
    assert feature.shape == (B, Fdim)
    assert proj_norm.shape == (B, Fdim)

    # sanity check against a pure-JAX (XLA) reference of the same eval-mode forward
    out_r, feat_r, nrm_r = reference_forward(x, wemb, mix_bias, bn1, Wc2, bc2, bn2,
                                             Wc3, bc3, bn3, Wfc_r, bfc, pool)
    _maxdiff = lambda a, b: float(jnp.max(jnp.abs(a - b)))
    tol = 5e-2  # loose: absorbs bf16-operand MXU rounding, still catches real bugs
    assert _maxdiff(out, out_r) < tol, ("out", _maxdiff(out, out_r))
    assert _maxdiff(feature, feat_r) < tol, ("feature", _maxdiff(feature, feat_r))
    assert _maxdiff(proj_norm, nrm_r) < tol, ("norm", _maxdiff(proj_norm, nrm_r))

    # TODO(synk): training-mode BatchNorm batch statistics / Dropout / DropPath are not
    # modeled (eval-mode semantics only); isProj=True projection MLP not instantiated.
    print("KERNEL_OK")
</pallas_src>

<mosaic_0001>
module attributes {stable_mosaic.version = 11 : i64} {
  func.func @_b76_kernel(%arg0: i32, %arg1: memref<32x360xf32, #tpu.memory_space<vmem>>, %arg2: memref<360x360xbf16, #tpu.memory_space<vmem>>, %arg3: memref<1x360xf32, #tpu.memory_space<vmem>>, %arg4: memref<128x32xbf16, #tpu.memory_space<vmem>>, %arg5: memref<128x360xf32, #tpu.memory_space<vmem>>, %arg6: memref<360x20xbf16, #tpu.memory_space<vmem>>, %arg7: memref<128x1xf32, #tpu.memory_space<vmem>>, %arg8: memref<20x2xf32, #tpu.memory_space<vmem>>, %arg9: memref<8x128xf32, #tpu.memory_space<vmem>>, %arg10: memref<128x8xf32, #tpu.memory_space<vmem>>, %arg11: memref<2x6xf32, #tpu.memory_space<vmem>>, %arg12: memref<128x6xf32, #tpu.memory_space<vmem>>, %arg13: memref<6x3xf32, #tpu.memory_space<vmem>>, %arg14: memref<1x3xf32, #tpu.memory_space<vmem>>, %arg15: memref<128x4xf32, #tpu.memory_space<vmem>>, %arg16: memref<8x3xf32, #tpu.memory_space<vmem>>) attributes {dimension_semantics = [#tpu.dimension_semantics<parallel>], iteration_bounds = array<i64: 2>, scalar_prefetch = 0 : i64, scratch_operands = 0 : i64, tpu.core_type = #tpu.core_type<tc>, window_params = [{transform_indices = @transform_0, window_bounds = array<i64: 32, 360>}, {pipeline_mode = #tpu.pipeline_mode<synchronous>, transform_indices = @transform_1, window_bounds = array<i64: 360, 360>}, {pipeline_mode = #tpu.pipeline_mode<synchronous>, transform_indices = @transform_2, window_bounds = array<i64: 1, 360>}, {pipeline_mode = #tpu.pipeline_mode<synchronous>, transform_indices = @transform_3, window_bounds = array<i64: 128, 32>}, {pipeline_mode = #tpu.pipeline_mode<synchronous>, transform_indices = @transform_4, window_bounds = array<i64: 128, 360>}, {pipeline_mode = #tpu.pipeline_mode<synchronous>, transform_indices = @transform_5, window_bounds = array<i64: 360, 20>}, {pipeline_mode = #tpu.pipeline_mode<synchronous>, transform_indices = @transform_6, window_bounds = array<i64: 128, 1>}, {pipeline_mode = #tpu.pipeline_mode<synchronous>, transform_indices = @transform_7, window_bounds = array<i64: 20, 2>}, {pipeline_mode = #tpu.pipeline_mode<synchronous>, transform_indices = @transform_8, window_bounds = array<i64: 8, 128>}, {pipeline_mode = #tpu.pipeline_mode<synchronous>, transform_indices = @transform_9, window_bounds = array<i64: 128, 8>}, {pipeline_mode = #tpu.pipeline_mode<synchronous>, transform_indices = @transform_10, window_bounds = array<i64: 2, 6>}, {pipeline_mode = #tpu.pipeline_mode<synchronous>, transform_indices = @transform_11, window_bounds = array<i64: 128, 6>}, {pipeline_mode = #tpu.pipeline_mode<synchronous>, transform_indices = @transform_12, window_bounds = array<i64: 6, 3>}, {pipeline_mode = #tpu.pipeline_mode<synchronous>, transform_indices = @transform_13, window_bounds = array<i64: 1, 3>}, {transform_indices = @transform_14, window_bounds = array<i64: 128, 4>}, {transform_indices = @transform_15, window_bounds = array<i64: 8, 3>}]} {
    %c0 = arith.constant 0 : index
    %c0_0 = arith.constant 0 : index
    %0 = vector.load %arg1[%c0, %c0_0] : memref<32x360xf32, #tpu.memory_space<vmem>>, vector<32x360xf32>
    %1 = arith.truncf %0 : vector<32x360xf32> to vector<32x360xbf16>
    %c0_1 = arith.constant 0 : index
    %c0_2 = arith.constant 0 : index
    %2 = vector.load %arg2[%c0_1, %c0_2] : memref<360x360xbf16, #tpu.memory_space<vmem>>, vector<360x360xbf16>
    %cst = arith.constant dense<0.000000e+00> : vector<32x360xf32>
    %3 = tpu.matmul %1, %2, %cst {dimension_numbers = #tpu.dot_dimension_numbers<[1], [0], [0], [1], [0, 0, 1, 1], [], []>} : vector<32x360xbf16>, vector<360x360xbf16>, vector<32x360xf32> -> vector<32x360xf32>
    %4 = arith.addf %0, %3 : vector<32x360xf32>
    %c0_3 = arith.constant 0 : index
    %c0_4 = arith.constant 0 : index
    %5 = vector.load %arg3[%c0_3, %c0_4] : memref<1x360xf32, #tpu.memory_space<vmem>>, vector<1x360xf32>
    %6 = vector.broadcast %5 : vector<1x360xf32> to vector<32x360xf32>
    %7 = arith.addf %4, %6 : vector<32x360xf32>
    %c0_5 = arith.constant 0 : index
    %c0_6 = arith.constant 0 : index
    %8 = vector.load %arg4[%c0_5, %c0_6] : memref<128x32xbf16, #tpu.memory_space<vmem>>, vector<128x32xbf16>
    %9 = arith.truncf %7 : vector<32x360xf32> to vector<32x360xbf16>
    %cst_7 = arith.constant dense<0.000000e+00> : vector<128x360xf32>
    %10 = tpu.matmul %8, %9, %cst_7 {dimension_numbers = #tpu.dot_dimension_numbers<[1], [0], [0], [1], [0, 0, 1, 1], [], []>} : vector<128x32xbf16>, vector<32x360xbf16>, vector<128x360xf32> -> vector<128x360xf32>
    %c0_8 = arith.constant 0 : index
    %c0_9 = arith.constant 0 : index
    %11 = vector.load %arg5[%c0_8, %c0_9] : memref<128x360xf32, #tpu.memory_space<vmem>>, vector<128x360xf32>
    %12 = arith.mulf %10, %11 : vector<128x360xf32>
    %13 = arith.truncf %12 : vector<128x360xf32> to vector<128x360xbf16>
    %c0_10 = arith.constant 0 : index
    %c0_11 = arith.constant 0 : index
    %14 = vector.load %arg6[%c0_10, %c0_11] : memref<360x20xbf16, #tpu.memory_space<vmem>>, vector<360x20xbf16>
    %cst_12 = arith.constant dense<0.000000e+00> : vector<128x20xf32>
    %15 = tpu.matmul %13, %14, %cst_12 {dimension_numbers = #tpu.dot_dimension_numbers<[1], [0], [0], [1], [0, 0, 1, 1], [], []>} : vector<128x360xbf16>, vector<360x20xbf16>, vector<128x20xf32> -> vector<128x20xf32>
    %c0_13 = arith.constant 0 : index
    %c0_14 = arith.constant 0 : index
    %16 = vector.load %arg7[%c0_13, %c0_14] : memref<128x1xf32, #tpu.memory_space<vmem>>, vector<128x1xf32>
    %17 = vector.broadcast %16 : vector<128x1xf32> to vector<128x20xf32>
    %18 = arith.addf %15, %17 : vector<128x20xf32>
    %cst_15 = arith.constant 0.000000e+00 : f32
    %19 = vector.broadcast %cst_15 : f32 to vector<128x20xf32>
    %20 = arith.maximumf %18, %19 : vector<128x20xf32>
    %c0_16 = arith.constant 0 : index
    %c0_17 = arith.constant 0 : index
    %21 = vector.load %arg8[%c0_16, %c0_17] : memref<20x2xf32, #tpu.memory_space<vmem>>, vector<20x2xf32>
    %cst_18 = arith.constant dense<0.000000e+00> : vector<128x2xf32>
    %22 = tpu.matmul %20, %21, %cst_18 {dimension_numbers = #tpu.dot_dimension_numbers<[1], [0], [0], [1], [0, 0, 1, 1], [], []>} : vector<128x20xf32>, vector<20x2xf32>, vector<128x2xf32> -> vector<128x2xf32>
    %23 = arith.mulf %22, %22 : vector<128x2xf32>
    %cst_19 = arith.constant dense<0.000000e+00> : vector<128xf32>
    %24 = vector.multi_reduction <add>, %23, %cst_19 [1] : vector<128x2xf32> to vector<128xf32>
    %25 = vector.shape_cast %24 : vector<128xf32> to vector<128x1xf32>
    %c0_20 = arith.constant 0 : index
    %c0_21 = arith.constant 0 : index
    %26 = vector.load %arg9[%c0_20, %c0_21] : memref<8x128xf32, #tpu.memory_space<vmem>>, vector<8x128xf32>
    %cst_22 = arith.constant dense<0.000000e+00> : vector<8x1xf32>
    %27 = tpu.matmul %26, %25, %cst_22 {dimension_numbers = #tpu.dot_dimension_numbers<[1], [0], [0], [1], [0, 0, 1, 1], [], []>} : vector<8x128xf32>, vector<128x1xf32>, vector<8x1xf32> -> vector<8x1xf32>
    %cst_23 = arith.constant 1.000000e-24 : f32
    %28 = vector.broadcast %cst_23 : f32 to vector<8x1xf32>
    %29 = arith.maximumf %27, %28 : vector<8x1xf32>
    %30 = math.rsqrt %29 : vector<8x1xf32>
    %c0_24 = arith.constant 0 : index
    %c0_25 = arith.constant 0 : index
    %31 = vector.load %arg10[%c0_24, %c0_25] : memref<128x8xf32, #tpu.memory_space<vmem>>, vector<128x8xf32>
    %cst_26 = arith.constant dense<0.000000e+00> : vector<128x1xf32>
    %32 = tpu.matmul %31, %30, %cst_26 {dimension_numbers = #tpu.dot_dimension_numbers<[1], [0], [0], [1], [0, 0, 1, 1], [], []>} : vector<128x8xf32>, vector<8x1xf32>, vector<128x1xf32> -> vector<128x1xf32>
    %c0_27 = arith.constant 0 : index
    %c0_28 = arith.constant 0 : index
    %33 = vector.load %arg11[%c0_27, %c0_28] : memref<2x6xf32, #tpu.memory_space<vmem>>, vector<2x6xf32>
    %cst_29 = arith.constant dense<0.000000e+00> : vector<128x6xf32>
    %34 = tpu.matmul %22, %33, %cst_29 {dimension_numbers = #tpu.dot_dimension_numbers<[1], [0], [0], [1], [0, 0, 1, 1], [], []>} : vector<128x2xf32>, vector<2x6xf32>, vector<128x6xf32> -> vector<128x6xf32>
    %c0_30 = arith.constant 0 : index
    %c0_31 = arith.constant 0 : index
    %35 = vector.load %arg12[%c0_30, %c0_31] : memref<128x6xf32, #tpu.memory_space<vmem>>, vector<128x6xf32>
    %36 = arith.mulf %34, %35 : vector<128x6xf32>
    %c0_32 = arith.constant 0 : index
    %c0_33 = arith.constant 0 : index
    %37 = vector.load %arg9[%c0_32, %c0_33] : memref<8x128xf32, #tpu.memory_space<vmem>>, vector<8x128xf32>
    %cst_34 = arith.constant dense<0.000000e+00> : vector<8x6xf32>
    %38 = tpu.matmul %37, %36, %cst_34 {dimension_numbers = #tpu.dot_dimension_numbers<[1], [0], [0], [1], [0, 0, 1, 1], [], []>} : vector<8x128xf32>, vector<128x6xf32>, vector<8x6xf32> -> vector<8x6xf32>
    %c0_35 = arith.constant 0 : index
    %c0_36 = arith.constant 0 : index
    %39 = vector.load %arg13[%c0_35, %c0_36] : memref<6x3xf32, #tpu.memory_space<vmem>>, vector<6x3xf32>
    %cst_37 = arith.constant dense<0.000000e+00> : vector<8x3xf32>
    %40 = tpu.matmul %38, %39, %cst_37 {dimension_numbers = #tpu.dot_dimension_numbers<[1], [0], [0], [1], [0, 0, 1, 1], [], []>} : vector<8x6xf32>, vector<6x3xf32>, vector<8x3xf32> -> vector<8x3xf32>
    %c0_38 = arith.constant 0 : index
    %c0_39 = arith.constant 0 : index
    %41 = vector.load %arg14[%c0_38, %c0_39] : memref<1x3xf32, #tpu.memory_space<vmem>>, vector<1x3xf32>
    %42 = vector.broadcast %41 : vector<1x3xf32> to vector<8x3xf32>
    %43 = arith.addf %40, %42 : vector<8x3xf32>
    %c0_40 = arith.constant 0 : index
    %c0_41 = arith.constant 0 : index
    %44 = vector.load %arg15[%c0_40, %c0_41] : memref<128x4xf32, #tpu.memory_space<vmem>>, vector<128x2xf32>
    tpu.vector_store %arg15[%c0_40, %c0_41], %22 {strides = array<i32>} : memref<128x4xf32, #tpu.memory_space<vmem>>, vector<128x2xf32>,
    %45 = vector.broadcast %32 : vector<128x1xf32> to vector<128x2xf32>
    %46 = arith.mulf %22, %45 : vector<128x2xf32>
    %c0_42 = arith.constant 0 : index
    %c2 = arith.constant 2 : index
    %47 = vector.load %arg15[%c0_42, %c2] : memref<128x4xf32, #tpu.memory_space<vmem>>, vector<128x2xf32>
    tpu.vector_store %arg15[%c0_42, %c2], %46 {strides = array<i32>} : memref<128x4xf32, #tpu.memory_space<vmem>>, vector<128x2xf32>,
    %c0_43 = arith.constant 0 : index
    %c0_44 = arith.constant 0 : index
    %48 = vector.load %arg16[%c0_43, %c0_44] : memref<8x3xf32, #tpu.memory_space<vmem>>, vector<8x3xf32>
    tpu.vector_store %arg16[%c0_43, %c0_44], %43 {strides = array<i32>} : memref<8x3xf32, #tpu.memory_space<vmem>>, vector<8x3xf32>,
    return
  }
  func.func @transform_0(%arg0: i32) -> (i32, i32) {
    %c0_i32 = arith.constant 0 : i32
    %c0_i32_0 = arith.constant 0 : i32
    return %arg0, %c0_i32 : i32, i32
  }
  func.func @transform_1(%arg0: i32) -> (i32, i32) {
    %c0_i32 = arith.constant 0 : i32
    %c0_i32_0 = arith.constant 0 : i32
    %c0_i32_1 = arith.constant 0 : i32
    return %c0_i32, %c0_i32_0 : i32, i32
  }
  func.func @transform_2(%arg0: i32) -> (i32, i32) {
    %c0_i32 = arith.constant 0 : i32
    %c0_i32_0 = arith.constant 0 : i32
    %c0_i32_1 = arith.constant 0 : i32
    return %c0_i32, %c0_i32_0 : i32, i32
  }
  func.func @transform_3(%arg0: i32) -> (i32, i32) {
    %c0_i32 = arith.constant 0 : i32
    %c0_i32_0 = arith.constant 0 : i32
    %c0_i32_1 = arith.constant 0 : i32
    return %c0_i32, %c0_i32_0 : i32, i32
  }
  func.func @transform_4(%arg0: i32) -> (i32, i32) {
    %c0_i32 = arith.constant 0 : i32
    %c0_i32_0 = arith.constant 0 : i32
    %c0_i32_1 = arith.constant 0 : i32
    return %c0_i32, %c0_i32_0 : i32, i32
  }
  func.func @transform_5(%arg0: i32) -> (i32, i32) {
    %c0_i32 = arith.constant 0 : i32
    %c0_i32_0 = arith.constant 0 : i32
    %c0_i32_1 = arith.constant 0 : i32
    return %c0_i32, %c0_i32_0 : i32, i32
  }
  func.func @transform_6(%arg0: i32) -> (i32, i32) {
    %c0_i32 = arith.constant 0 : i32
    %c0_i32_0 = arith.constant 0 : i32
    %c0_i32_1 = arith.constant 0 : i32
    return %c0_i32, %c0_i32_0 : i32, i32
  }
  func.func @transform_7(%arg0: i32) -> (i32, i32) {
    %c0_i32 = arith.constant 0 : i32
    %c0_i32_0 = arith.constant 0 : i32
    %c0_i32_1 = arith.constant 0 : i32
    return %c0_i32, %c0_i32_0 : i32, i32
  }
  func.func @transform_8(%arg0: i32) -> (i32, i32) {
    %c0_i32 = arith.constant 0 : i32
    %c0_i32_0 = arith.constant 0 : i32
    %c0_i32_1 = arith.constant 0 : i32
    return %c0_i32, %c0_i32_0 : i32, i32
  }
  func.func @transform_9(%arg0: i32) -> (i32, i32) {
    %c0_i32 = arith.constant 0 : i32
    %c0_i32_0 = arith.constant 0 : i32
    %c0_i32_1 = arith.constant 0 : i32
    return %c0_i32, %c0_i32_0 : i32, i32
  }
  func.func @transform_10(%arg0: i32) -> (i32, i32) {
    %c0_i32 = arith.constant 0 : i32
    %c0_i32_0 = arith.constant 0 : i32
    %c0_i32_1 = arith.constant 0 : i32
    return %c0_i32, %c0_i32_0 : i32, i32
  }
  func.func @transform_11(%arg0: i32) -> (i32, i32) {
    %c0_i32 = arith.constant 0 : i32
    %c0_i32_0 = arith.constant 0 : i32
    %c0_i32_1 = arith.constant 0 : i32
    return %c0_i32, %c0_i32_0 : i32, i32
  }
  func.func @transform_12(%arg0: i32) -> (i32, i32) {
    %c0_i32 = arith.constant 0 : i32
    %c0_i32_0 = arith.constant 0 : i32
    %c0_i32_1 = arith.constant 0 : i32
    return %c0_i32, %c0_i32_0 : i32, i32
  }
  func.func @transform_13(%arg0: i32) -> (i32, i32) {
    %c0_i32 = arith.constant 0 : i32
    %c0_i32_0 = arith.constant 0 : i32
    %c0_i32_1 = arith.constant 0 : i32
    return %c0_i32, %c0_i32_0 : i32, i32
  }
  func.func @transform_14(%arg0: i32) -> (i32, i32) {
    %c0_i32 = arith.constant 0 : i32
    %c0_i32_0 = arith.constant 0 : i32
    return %arg0, %c0_i32 : i32, i32
  }
  func.func @transform_15(%arg0: i32) -> (i32, i32) {
    %c0_i32 = arith.constant 0 : i32
    %c0_i32_0 = arith.constant 0 : i32
    return %arg0, %c0_i32 : i32, i32
  }
}

module attributes {stable_mosaic.version = 11 : i64} {
  func.func @_b76_kernel(%arg0: i32, %arg1: memref<32x360xf32, #tpu.memory_space<vmem>>, %arg2: memref<360x360xbf16, #tpu.memory_space<vmem>>, %arg3: memref<1x360xf32, #tpu.memory_space<vmem>>, %arg4: memref<128x32xbf16, #tpu.memory_space<vmem>>, %arg5: memref<128x360xf32, #tpu.memory_space<vmem>>, %arg6: memref<360x20xbf16, #tpu.memory_space<vmem>>, %arg7: memref<128x1xf32, #tpu.memory_space<vmem>>, %arg8: memref<20x2xf32, #tpu.memory_space<vmem>>, %arg9: memref<8x128xf32, #tpu.memory_space<vmem>>, %arg10: memref<128x8xf32, #tpu.memory_space<vmem>>, %arg11: memref<2x6xf32, #tpu.memory_space<vmem>>, %arg12: memref<128x6xf32, #tpu.memory_space<vmem>>, %arg13: memref<6x3xf32, #tpu.memory_space<vmem>>, %arg14: memref<1x3xf32, #tpu.memory_space<vmem>>, %arg15: memref<128x4xf32, #tpu.memory_space<vmem>>, %arg16: memref<8x3xf32, #tpu.memory_space<vmem>>) attributes {dimension_semantics = [#tpu.dimension_semantics<parallel>], iteration_bounds = array<i64: 2>, scalar_prefetch = 0 : i64, scratch_operands = 0 : i64, tpu.core_type = #tpu.core_type<tc>, window_params = [{transform_indices = @transform_0, window_bounds = array<i64: 32, 360>}, {pipeline_mode = #tpu.pipeline_mode<synchronous>, transform_indices = @transform_1, window_bounds = array<i64: 360, 360>}, {pipeline_mode = #tpu.pipeline_mode<synchronous>, transform_indices = @transform_2, window_bounds = array<i64: 1, 360>}, {pipeline_mode = #tpu.pipeline_mode<synchronous>, transform_indices = @transform_3, window_bounds = array<i64: 128, 32>}, {pipeline_mode = #tpu.pipeline_mode<synchronous>, transform_indices = @transform_4, window_bounds = array<i64: 128, 360>}, {pipeline_mode = #tpu.pipeline_mode<synchronous>, transform_indices = @transform_5, window_bounds = array<i64: 360, 20>}, {pipeline_mode = #tpu.pipeline_mode<synchronous>, transform_indices = @transform_6, window_bounds = array<i64: 128, 1>}, {pipeline_mode = #tpu.pipeline_mode<synchronous>, transform_indices = @transform_7, window_bounds = array<i64: 20, 2>}, {pipeline_mode = #tpu.pipeline_mode<synchronous>, transform_indices = @transform_8, window_bounds = array<i64: 8, 128>}, {pipeline_mode = #tpu.pipeline_mode<synchronous>, transform_indices = @transform_9, window_bounds = array<i64: 128, 8>}, {pipeline_mode = #tpu.pipeline_mode<synchronous>, transform_indices = @transform_10, window_bounds = array<i64: 2, 6>}, {pipeline_mode = #tpu.pipeline_mode<synchronous>, transform_indices = @transform_11, window_bounds = array<i64: 128, 6>}, {pipeline_mode = #tpu.pipeline_mode<synchronous>, transform_indices = @transform_12, window_bounds = array<i64: 6, 3>}, {pipeline_mode = #tpu.pipeline_mode<synchronous>, transform_indices = @transform_13, window_bounds = array<i64: 1, 3>}, {transform_indices = @transform_14, window_bounds = array<i64: 128, 4>}, {transform_indices = @transform_15, window_bounds = array<i64: 8, 3>}]} {
    %c0 = arith.constant 0 : index
    %c0_0 = arith.constant 0 : index
    %0 = vector.load %arg1[%c0, %c0_0] : memref<32x360xf32, #tpu.memory_space<vmem>>, vector<32x360xf32>
    %1 = arith.truncf %0 : vector<32x360xf32> to vector<32x360xbf16>
    %c0_1 = arith.constant 0 : index
    %c0_2 = arith.constant 0 : index
    %2 = vector.load %arg2[%c0_1, %c0_2] : memref<360x360xbf16, #tpu.memory_space<vmem>>, vector<360x360xbf16>
    %cst = arith.constant dense<0.000000e+00> : vector<32x360xf32>
    %3 = tpu.matmul %1, %2, %cst {dimension_numbers = #tpu.dot_dimension_numbers<[1], [0], [0], [1], [0, 0, 1, 1], [], []>} : vector<32x360xbf16>, vector<360x360xbf16>, vector<32x360xf32> -> vector<32x360xf32>
    %4 = arith.addf %0, %3 : vector<32x360xf32>
    %c0_3 = arith.constant 0 : index
    %c0_4 = arith.constant 0 : index
    %5 = vector.load %arg3[%c0_3, %c0_4] : memref<1x360xf32, #tpu.memory_space<vmem>>, vector<1x360xf32>
    %6 = vector.broadcast %5 : vector<1x360xf32> to vector<32x360xf32>
    %7 = arith.addf %4, %6 : vector<32x360xf32>
    %c0_5 = arith.constant 0 : index
    %c0_6 = arith.constant 0 : index
    %8 = vector.load %arg4[%c0_5, %c0_6] : memref<128x32xbf16, #tpu.memory_space<vmem>>, vector<128x32xbf16>
    %9 = arith.truncf %7 : vector<32x360xf32> to vector<32x360xbf16>
    %cst_7 = arith.constant dense<0.000000e+00> : vector<128x360xf32>
    %10 = tpu.matmul %8, %9, %cst_7 {dimension_numbers = #tpu.dot_dimension_numbers<[1], [0], [0], [1], [0, 0, 1, 1], [], []>} : vector<128x32xbf16>, vector<32x360xbf16>, vector<128x360xf32> -> vector<128x360xf32>
    %c0_8 = arith.constant 0 : index
    %c0_9 = arith.constant 0 : index
    %11 = vector.load %arg5[%c0_8, %c0_9] : memref<128x360xf32, #tpu.memory_space<vmem>>, vector<128x360xf32>
    %12 = arith.mulf %10, %11 : vector<128x360xf32>
    %13 = arith.truncf %12 : vector<128x360xf32> to vector<128x360xbf16>
    %c0_10 = arith.constant 0 : index
    %c0_11 = arith.constant 0 : index
    %14 = vector.load %arg6[%c0_10, %c0_11] : memref<360x20xbf16, #tpu.memory_space<vmem>>, vector<360x20xbf16>
    %cst_12 = arith.constant dense<0.000000e+00> : vector<128x20xf32>
    %15 = tpu.matmul %13, %14, %cst_12 {dimension_numbers = #tpu.dot_dimension_numbers<[1], [0], [0], [1], [0, 0, 1, 1], [], []>} : vector<128x360xbf16>, vector<360x20xbf16>, vector<128x20xf32> -> vector<128x20xf32>
    %c0_13 = arith.constant 0 : index
    %c0_14 = arith.constant 0 : index
    %16 = vector.load %arg7[%c0_13, %c0_14] : memref<128x1xf32, #tpu.memory_space<vmem>>, vector<128x1xf32>
    %17 = vector.broadcast %16 : vector<128x1xf32> to vector<128x20xf32>
    %18 = arith.addf %15, %17 : vector<128x20xf32>
    %cst_15 = arith.constant 0.000000e+00 : f32
    %19 = vector.broadcast %cst_15 : f32 to vector<128x20xf32>
    %20 = arith.maximumf %18, %19 : vector<128x20xf32>
    %c0_16 = arith.constant 0 : index
    %c0_17 = arith.constant 0 : index
    %21 = vector.load %arg8[%c0_16, %c0_17] : memref<20x2xf32, #tpu.memory_space<vmem>>, vector<20x2xf32>
    %cst_18 = arith.constant dense<0.000000e+00> : vector<128x2xf32>
    %22 = tpu.matmul %20, %21, %cst_18 {dimension_numbers = #tpu.dot_dimension_numbers<[1], [0], [0], [1], [0, 0, 1, 1], [], []>} : vector<128x20xf32>, vector<20x2xf32>, vector<128x2xf32> -> vector<128x2xf32>
    %23 = arith.mulf %22, %22 : vector<128x2xf32>
    %cst_19 = arith.constant dense<0.000000e+00> : vector<128xf32>
    %24 = vector.multi_reduction <add>, %23, %cst_19 [1] : vector<128x2xf32> to vector<128xf32>
    %25 = vector.shape_cast %24 : vector<128xf32> to vector<128x1xf32>
    %c0_20 = arith.constant 0 : index
    %c0_21 = arith.constant 0 : index
    %26 = vector.load %arg9[%c0_20, %c0_21] : memref<8x128xf32, #tpu.memory_space<vmem>>, vector<8x128xf32>
    %cst_22 = arith.constant dense<0.000000e+00> : vector<8x1xf32>
    %27 = tpu.matmul %26, %25, %cst_22 {dimension_numbers = #tpu.dot_dimension_numbers<[1], [0], [0], [1], [0, 0, 1, 1], [], []>} : vector<8x128xf32>, vector<128x1xf32>, vector<8x1xf32> -> vector<8x1xf32>
    %cst_23 = arith.constant 1.000000e-24 : f32
    %28 = vector.broadcast %cst_23 : f32 to vector<8x1xf32>
    %29 = arith.maximumf %27, %28 : vector<8x1xf32>
    %30 = math.rsqrt %29 : vector<8x1xf32>
    %c0_24 = arith.constant 0 : index
    %c0_25 = arith.constant 0 : index
    %31 = vector.load %arg10[%c0_24, %c0_25] : memref<128x8xf32, #tpu.memory_space<vmem>>, vector<128x8xf32>
    %cst_26 = arith.constant dense<0.000000e+00> : vector<128x1xf32>
    %32 = tpu.matmul %31, %30, %cst_26 {dimension_numbers = #tpu.dot_dimension_numbers<[1], [0], [0], [1], [0, 0, 1, 1], [], []>} : vector<128x8xf32>, vector<8x1xf32>, vector<128x1xf32> -> vector<128x1xf32>
    %c0_27 = arith.constant 0 : index
    %c0_28 = arith.constant 0 : index
    %33 = vector.load %arg11[%c0_27, %c0_28] : memref<2x6xf32, #tpu.memory_space<vmem>>, vector<2x6xf32>
    %cst_29 = arith.constant dense<0.000000e+00> : vector<128x6xf32>
    %34 = tpu.matmul %22, %33, %cst_29 {dimension_numbers = #tpu.dot_dimension_numbers<[1], [0], [0], [1], [0, 0, 1, 1], [], []>} : vector<128x2xf32>, vector<2x6xf32>, vector<128x6xf32> -> vector<128x6xf32>
    %c0_30 = arith.constant 0 : index
    %c0_31 = arith.constant 0 : index
    %35 = vector.load %arg12[%c0_30, %c0_31] : memref<128x6xf32, #tpu.memory_space<vmem>>, vector<128x6xf32>
    %36 = arith.mulf %34, %35 : vector<128x6xf32>
    %c0_32 = arith.constant 0 : index
    %c0_33 = arith.constant 0 : index
    %37 = vector.load %arg9[%c0_32, %c0_33] : memref<8x128xf32, #tpu.memory_space<vmem>>, vector<8x128xf32>
    %cst_34 = arith.constant dense<0.000000e+00> : vector<8x6xf32>
    %38 = tpu.matmul %37, %36, %cst_34 {dimension_numbers = #tpu.dot_dimension_numbers<[1], [0], [0], [1], [0, 0, 1, 1], [], []>} : vector<8x128xf32>, vector<128x6xf32>, vector<8x6xf32> -> vector<8x6xf32>
    %c0_35 = arith.constant 0 : index
    %c0_36 = arith.constant 0 : index
    %39 = vector.load %arg13[%c0_35, %c0_36] : memref<6x3xf32, #tpu.memory_space<vmem>>, vector<6x3xf32>
    %cst_37 = arith.constant dense<0.000000e+00> : vector<8x3xf32>
    %40 = tpu.matmul %38, %39, %cst_37 {dimension_numbers = #tpu.dot_dimension_numbers<[1], [0], [0], [1], [0, 0, 1, 1], [], []>} : vector<8x6xf32>, vector<6x3xf32>, vector<8x3xf32> -> vector<8x3xf32>
    %c0_38 = arith.constant 0 : index
    %c0_39 = arith.constant 0 : index
    %41 = vector.load %arg14[%c0_38, %c0_39] : memref<1x3xf32, #tpu.memory_space<vmem>>, vector<1x3xf32>
    %42 = vector.broadcast %41 : vector<1x3xf32> to vector<8x3xf32>
    %43 = arith.addf %40, %42 : vector<8x3xf32>
    %c0_40 = arith.constant 0 : index
    %c0_41 = arith.constant 0 : index
    %44 = vector.load %arg15[%c0_40, %c0_41] : memref<128x4xf32, #tpu.memory_space<vmem>>, vector<128x2xf32>
    tpu.vector_store %arg15[%c0_40, %c0_41], %22 {strides = array<i32>} : memref<128x4xf32, #tpu.memory_space<vmem>>, vector<128x2xf32>,
    %45 = vector.broadcast %32 : vector<128x1xf32> to vector<128x2xf32>
    %46 = arith.mulf %22, %45 : vector<128x2xf32>
    %c0_42 = arith.constant 0 : index
    %c2 = arith.constant 2 : index
    %47 = vector.load %arg15[%c0_42, %c2] : memref<128x4xf32, #tpu.memory_space<vmem>>, vector<128x2xf32>
    tpu.vector_store %arg15[%c0_42, %c2], %46 {strides = array<i32>} : memref<128x4xf32, #tpu.memory_space<vmem>>, vector<128x2xf32>,
    %c0_43 = arith.constant 0 : index
    %c0_44 = arith.constant 0 : index
    %48 = vector.load %arg16[%c0_43, %c0_44] : memref<8x3xf32, #tpu.memory_space<vmem>>, vector<8x3xf32>
    tpu.vector_store %arg16[%c0_43, %c0_44], %43 {strides = array<i32>} : memref<8x3xf32, #tpu.memory_space<vmem>>, vector<8x3xf32>,
    return
  }
  func.func @transform_0(%arg0: i32) -> (i32, i32) {
    %c0_i32 = arith.constant 0 : i32
    %c0_i32_0 = arith.constant 0 : i32
    return %arg0, %c0_i32 : i32, i32
  }
  func.func @transform_1(%arg0: i32) -> (i32, i32) {
    %c0_i32 = arith.constant 0 : i32
    %c0_i32_0 = arith.constant 0 : i32
    %c0_i32_1 = arith.constant 0 : i32
    return %c0_i32, %c0_i32_0 : i32, i32
  }
  func.func @transform_2(%arg0: i32) -> (i32, i32) {
    %c0_i32 = arith.constant 0 : i32
    %c0_i32_0 = arith.constant 0 : i32
    %c0_i32_1 = arith.constant 0 : i32
    return %c0_i32, %c0_i32_0 : i32, i32
  }
  func.func @transform_3(%arg0: i32) -> (i32, i32) {
    %c0_i32 = arith.constant 0 : i32
    %c0_i32_0 = arith.constant 0 : i32
    %c0_i32_1 = arith.constant 0 : i32
    return %c0_i32, %c0_i32_0 : i32, i32
  }
  func.func @transform_4(%arg0: i32) -> (i32, i32) {
    %c0_i32 = arith.constant 0 : i32
    %c0_i32_0 = arith.constant 0 : i32
    %c0_i32_1 = arith.constant 0 : i32
    return %c0_i32, %c0_i32_0 : i32, i32
  }
  func.func @transform_5(%arg0: i32) -> (i32, i32) {
    %c0_i32 = arith.constant 0 : i32
    %c0_i32_0 = arith.constant 0 : i32
    %c0_i32_1 = arith.constant 0 : i32
    return %c0_i32, %c0_i32_0 : i32, i32
  }
  func.func @transform_6(%arg0: i32) -> (i32, i32) {
    %c0_i32 = arith.constant 0 : i32
    %c0_i32_0 = arith.constant 0 : i32
    %c0_i32_1 = arith.constant 0 : i32
    return %c0_i32, %c0_i32_0 : i32, i32
  }
  func.func @transform_7(%arg0: i32) -> (i32, i32) {
    %c0_i32 = arith.constant 0 : i32
    %c0_i32_0 = arith.constant 0 : i32
    %c0_i32_1 = arith.constant 0 : i32
    return %c0_i32, %c0_i32_0 : i32, i32
  }
  func.func @transform_8(%arg0: i32) -> (i32, i32) {
    %c0_i32 = arith.constant 0 : i32
    %c0_i32_0 = arith.constant 0 : i32
    %c0_i32_1 = arith.constant 0 : i32
    return %c0_i32, %c0_i32_0 : i32, i32
  }
  func.func @transform_9(%arg0: i32) -> (i32, i32) {
    %c0_i32 = arith.constant 0 : i32
    %c0_i32_0 = arith.constant 0 : i32
    %c0_i32_1 = arith.constant 0 : i32
    return %c0_i32, %c0_i32_0 : i32, i32
  }
  func.func @transform_10(%arg0: i32) -> (i32, i32) {
    %c0_i32 = arith.constant 0 : i32
    %c0_i32_0 = arith.constant 0 : i32
    %c0_i32_1 = arith.constant 0 : i32
    return %c0_i32, %c0_i32_0 : i32, i32
  }
  func.func @transform_11(%arg0: i32) -> (i32, i32) {
    %c0_i32 = arith.constant 0 : i32
    %c0_i32_0 = arith.constant 0 : i32
    %c0_i32_1 = arith.constant 0 : i32
    return %c0_i32, %c0_i32_0 : i32, i32
  }
  func.func @transform_12(%arg0: i32) -> (i32, i32) {
    %c0_i32 = arith.constant 0 : i32
    %c0_i32_0 = arith.constant 0 : i32
    %c0_i32_1 = arith.constant 0 : i32
    return %c0_i32, %c0_i32_0 : i32, i32
  }
  func.func @transform_13(%arg0: i32) -> (i32, i32) {
    %c0_i32 = arith.constant 0 : i32
    %c0_i32_0 = arith.constant 0 : i32
    %c0_i32_1 = arith.constant 0 : i32
    return %c0_i32, %c0_i32_0 : i32, i32
  }
  func.func @transform_14(%arg0: i32) -> (i32, i32) {
    %c0_i32 = arith.constant 0 : i32
    %c0_i32_0 = arith.constant 0 : i32
    return %arg0, %c0_i32 : i32, i32
  }
  func.func @transform_15(%arg0: i32) -> (i32, i32) {
    %c0_i32 = arith.constant 0 : i32
    %c0_i32_0 = arith.constant 0 : i32
    return %arg0, %c0_i32 : i32, i32
  }
}

</mosaic_0001>

<bundles_post_ra>
// kernel: b76_forward.1
= control target key start
LH: loop header
LB: loop body
LE: loop exit
PB: predicated region body
PF: predicated region fallthrough
CT: control target
= control target key end

     0   :  { %s4256_s18 = smov 0   ;;  %s5341_s0 = inlined_call_operand.vmem [shape: f32[64,360], index: 0, kind: input, shape index: {}]   ;;  %s5342_s1 = inlined_call_operand.vmem [shape: bf16[360,360], index: 1, kind: input, shape index: {}]   ;;  %s5343_s2 = inlined_call_operand.vmem [shape: f32[1,360], index: 2, kind: input, shape index: {}]   ;;  %s5344_s3 = inlined_call_operand.vmem [shape: bf16[128,32], index: 3, kind: input, shape index: {}]   ;;  %s5345_s4 = inlined_call_operand.vmem [shape: f32[128,360], index: 4, kind: input, shape index: {}]   ;;  %s5346_s5 = inlined_call_operand.vmem [shape: bf16[360,20], index: 5, kind: input, shape index: {}]   ;;  %s5347_s6 = inlined_call_operand.vmem [shape: f32[128,1], index: 6, kind: input, shape index: {}]   ;;  %s5348_s7 = inlined_call_operand.vmem [shape: f32[20,2], index: 7, kind: input, shape index: {}]   ;;  %s5349_s8 = inlined_call_operand.vmem [shape: f32[8,128], index: 8, kind: input, shape index: {}]   ;;  %s5350_s9 = inlined_call_operand.vmem [shape: f32[128,8], index: 9, kind: input, shape index: {}]   ;;  %s5351_s10 = inlined_call_operand.vmem [shape: f32[2,6], index: 10, kind: input, shape index: {}]   ;;  %s5352_s11 = inlined_call_operand.vmem [shape: f32[128,6], index: 11, kind: input, shape index: {}]   ;;  %s5353_s12 = inlined_call_operand.vmem [shape: f32[6,3], index: 12, kind: input, shape index: {}]   ;;  %s5354_s13 = inlined_call_operand.vmem [shape: f32[1,3], index: 13, kind: input, shape index: {}]   ;;  %s5355_s14 = inlined_call_operand.vmem [shape: f32[256,4], index: 14, kind: output, shape index: {0}]   ;;  %s5356_s15 = inlined_call_operand.vmem [shape: f32[16,3], index: 15, kind: output, shape index: {1}]  }
   0x1 LB: > { %s4262_s19 = sadd.s32 4294967295, %s4170_s18   ;;  %p3393_p0 = scmp.ge.s32.totalorder %s4170_s18, 1  ;;  %s4170_s18 = sphi %s4256_s18, %s26_s18  }
   0x2   : > { %p442_p1 = scmp.lt.s32.totalorder %s4170_s18, 3 }
   0x4   : > { %p443_p2 = pnand %p3393_p0, %p442_p1 }
   0x5   : > { %s3394_s25 = sshll.u32 (!%p443_p2), %s4262_s19, 2  ;;  %p508_p5 = scmp.lt.s32.totalorder (!%p443_p2), %s4262_s19, 1 }
   0x6   : > { %446 = sbr.rel (%p443_p2) target bundleno = 1814 (0x716), region = 76  ;;  %p496_p3 = scmp.lt.s32.totalorder (!%p443_p2), %s3394_s25, 7 }
   0xb   : > { %v4040_v0 = vld [vmem:[%s5342_s1 + $0xac] ss:$12 sps:$4 sm:$0xff]   ;;  %v619_v1 = vld [vmem:[%s5342_s1 + $0x210] sm:$0xff]  ;;  %vm988_vm0 = vcmask 1043456   ;;  %v4172_v3 = vmov 0   ;;  %s5358_s25 = smov (!%p496_p3, %s3394_s25), 7 }
   0xc   : > { %v4043_v2 = vld [vmem:[%s5342_s1 + $0xa8] ss:$12 sps:$4 sm:$0xff]   ;;  %1083 = vmatprep.mubr.bf16.mxu1 %v4172_v3  ;;  %4038 = vset.pattern.permute.xlu0 %v4172_v3  ;;  %v3466_v4 = vcombine.high %v619_v1, %v619_v1  ;;  %v3465_v5 = vcombine.low %v619_v1, %v619_v1  ;;  %v4049_v8 = vld [vmem:[%s5342_s1 + $0x90] ss:$12 sps:$4 sm:$0xff]   ;;  %v4050_v10 = vld [vmem:[%s5342_s1 + $0x1f8] ss:$12 sps:$4 sm:$0xff]  }
   0xd   : > { %998 = vmatprep.subr.bf16.mxu0 %v4040_v0  ;;  %v4045_v6 = vld [vmem:[%s5342_s1 + $0x94] ss:$12 sps:$4 sm:$0xff]   ;;  %4039 = vset.pattern.permute.xlu1 %v4172_v3  ;;  %v4047_v7 = vld [vmem:[%s5342_s1 + $0x1fc] ss:$12 sps:$4 sm:$0xff]   ;;  %v4053_v12 = vld [vmem:[%s5342_s1 + $0x1e4] ss:$12 sps:$4 sm:$0xff]  }
   0xe   : > { %999 = vmatpush1.bf16.msra.mxu0 %v4043_v2  ;;  %3468 = vmatprep.subr.msk.bf16.mxu1 %vm988_vm0, %v3466_v4  ;;  %v990_v9 = vsel %vm988_vm0, %v3465_v5, 0  ;;  %v4051_v11 = vld [vmem:[%s5342_s1 + $0x7c] ss:$12 sps:$4 sm:$0xff]   ;;  %v4055_v13 = vld [vmem:[%s5342_s1 + $0x78] ss:$12 sps:$4 sm:$0xff]   ;;  %s4025_s23 = smul.u32 24, %s5358_s25 }
   0xf   : > { %1000 = vmatprep.subr.bf16.mxu0 %v4045_v6  ;;  %1054 = vmatpush1.bf16.msra.mxu1 %v990_v9  ;;  %v4057_v14 = vld [vmem:[%s5342_s1 + $0x64] ss:$12 sps:$4 sm:$0xff]   ;;  %v4056_v15 = vld [vmem:[%s5342_s1 + $0x1e0] ss:$12 sps:$4 sm:$0xff]   ;;  %v4062_v19 = vld [vmem:[%s5342_s1 + $0x1c8] ss:$12 sps:$4 sm:$0xff]  }
  0x10   : > { %1055 = vmatprep.subr.bf16.mxu1 %v4047_v7  ;;  %v4059_v16 = vld [vmem:[%s5342_s1 + $0x1cc] ss:$12 sps:$4 sm:$0xff]   ;;  %v4065_v20 = vld [vmem:[%s5342_s1 + $0x1b4] ss:$12 sps:$4 sm:$0xff]   ;;  %v4068_v23 = vld [vmem:[%s5342_s1 + $0x1b0] ss:$12 sps:$4 sm:$0xff]   ;;  %s4350_s24 = scalar_lea.vmem %s5341_s0, %s4025_s23 }
  0x11   : > { %v4061_v17 = vld [vmem:[%s5342_s1 + $0x60] ss:$12 sps:$4 sm:$0xff]   ;;  %v4067_v21 = vld [vmem:[%s5342_s1 + $0x48] ss:$12 sps:$4 sm:$0xff]   ;;  %v4073_v25 = vld [vmem:[%s5342_s1 + $0x30] ss:$12 sps:$4 sm:$0xff]  }
  0x12   : > { %1001 = vmatpush1.bf16.msra.mxu0 %v4049_v8  ;;  %v4063_v18 = vld [vmem:[%s5342_s1 + $0x4c] ss:$12 sps:$4 sm:$0xff]   ;;  %v4069_v22 = vld [vmem:[%s5342_s1 + $0x34] ss:$12 sps:$4 sm:$0xff]   ;;  %v4071_v24 = vld [vmem:[%s5342_s1 + $0x19c] ss:$12 sps:$4 sm:$0xff]  }
  0x13   : > { %1002 = vmatprep.subr.bf16.mxu0 %v4051_v11  ;;  %1056 = vmatpush1.bf16.msra.mxu1 %v4050_v10  ;;  %v4074_v26 = vld [vmem:[%s5342_s1 + $0x198] ss:$12 sps:$4 sm:$0xff]   ;;  %v4075_v27 = vld [vmem:[%s5342_s1 + $0x1c] ss:$12 sps:$4 sm:$0xff]   ;;  %v4080_v30 = vld [vmem:[%s5342_s1 + $0x180] ss:$12 sps:$4 sm:$0xff]  }
  0x14   : > { %1057 = vmatprep.subr.bf16.mxu1 %v4053_v12  ;;  %v4077_v28 = vld [vmem:[%s5342_s1 + $0x184] ss:$12 sps:$4 sm:$0xff]   ;;  %v4365_v33 = vld [vmem:[%s4350_s24 + $0x28] sm:$0xff]  ;;  %vm981_vm1 = vcmask 850944   ;;  %v4091_v41 = vld [vmem:[%s5342_s1 + $0x154] ss:$12 sps:$4 sm:$0xff]  }
  0x15   : > { %v4079_v29 = vld [vmem:[%s5342_s1 + $0x18] ss:$12 sps:$4 sm:$0xff]   ;;  %v4362_v32 = vld [vmem:[%s4350_s24 + $0x10] sm:$0xff]  ;;  %v4084_v35 = vld [vmem:[%s5342_s1] ss:$12 sps:$4 sm:$0xff]   ;;  %vm1305_vm2 = vcmask 261120  }
  0x16   : > { %1003 = vmatpush1.bf16.msra.mxu0 %v4055_v13  ;;  %v4081_v31 = vld [vmem:[%s5342_s1 + $0x4] ss:$12 sps:$4 sm:$0xff]   ;;  %v4375_v36 = vpack.c.bf16 %v4365_v33, %v4362_v32  ;;  %v4086_v37 = vld [vmem:[%s5342_s1 + $0x16c] ss:$12 sps:$4 sm:$0xff]   ;;  %v4089_v40 = vld [vmem:[%s5342_s1 + $0x168] ss:$12 sps:$4 sm:$0xff]  }
  0x17   : > { %1004 = vmatprep.subr.bf16.mxu0 %v4057_v14  ;;  %1058 = vmatpush1.bf16.msra.mxu1 %v4056_v15  ;;  %v4083_v34 = vld [vmem:[%s5342_s1 + $0x170] ss:$12 sps:$4 sm:$0xff]   ;;  %v4088_v39 = vld [vmem:[%s5342_s1 + $0x158] ss:$12 sps:$4 sm:$0xff]   ;;  %v4093_v43 = vld [vmem:[%s5342_s1 + $0x140] ss:$12 sps:$4 sm:$0xff]  }
  0x18   : > { %1059 = vmatprep.subr.bf16.mxu1 %v4059_v16  ;;  %v4085_v38 = vld [vmem:[%s5342_s1 + $0xb0] ss:$12 sps:$4 sm:$0xff]   ;;  %v4090_v42 = vld [vmem:[%s5342_s1 + $0x98] ss:$12 sps:$4 sm:$0xff]   ;;  %v4095_v46 = vld [vmem:[%s5342_s1 + $0x80] ss:$12 sps:$4 sm:$0xff]  }
  0x19   : > { %v4094_v44 = vld [vmem:[%s5342_s1 + $0x150] ss:$12 sps:$4 sm:$0xff]   ;;  %v4098_v47 = vld [vmem:[%s5342_s1 + $0x128] ss:$12 sps:$4 sm:$0xff]   ;;  %v4099_v48 = vld [vmem:[%s5342_s1 + $0x138] ss:$12 sps:$4 sm:$0xff]  }
  0x1a   : > { %1005 = vmatpush1.bf16.msra.mxu0 %v4061_v17  ;;  %v4096_v45 = vld [vmem:[%s5342_s1 + $0x13c] ss:$12 sps:$4 sm:$0xff]   ;;  %v4101_v50 = vld [vmem:[%s5342_s1 + $0x124] ss:$12 sps:$4 sm:$0xff]   ;;  %v4104_v55 = vld [vmem:[%s5342_s1 + $0x120] ss:$12 sps:$4 sm:$0xff]  }
  0x1b   : > { %1006 = vmatprep.subr.bf16.mxu0 %v4063_v18  ;;  %1060 = vmatpush1.bf16.msra.mxu1 %v4062_v19  ;;  %v4100_v49 = vld [vmem:[%s5342_s1 + $0x68] ss:$12 sps:$4 sm:$0xff]   ;;  %v4423_v51 = vld [vmem:[%s4350_s24 + $0x40] sm:$0xff]  ;;  %v4426_v52 = vld [vmem:[%s4350_s24 + $0x58] sm:$0xff]  ;;  %vm2176_vm3 = vcmask 162816   ;;  %vm2770_vm4 = vcmask 1041408  }
  0x1c   : > { %1061 = vmatprep.subr.bf16.mxu1 %v4065_v20  ;;  %v4103_v53 = vld [vmem:[%s5342_s1 + $0x110] ss:$12 sps:$4 sm:$0xff]   ;;  %v4433_v54 = vpack.c.bf16 %v4426_v52, %v4423_v51  ;;  %v4106_v56 = vld [vmem:[%s5342_s1 + $0x10c] ss:$12 sps:$4 sm:$0xff]   ;;  %v4109_v60 = vld [vmem:[%s5342_s1 + $0x108] ss:$12 sps:$4 sm:$0xff]  }
  0x1d   : > { %v4105_v57 = vld [vmem:[%s5342_s1 + $0x50] ss:$12 sps:$4 sm:$0xff]   ;;  %v4108_v58 = vld [vmem:[%s5342_s1 + $0xf8] ss:$12 sps:$4 sm:$0xff]   ;;  %v4450_v59 = vld [vmem:[%s4350_s24 + $0x8] sm:$0xff]  ;;  %s3396_s23 = sshll.u32 %s4262_s19, 4 }
  0x1e   : > { %1007 = vmatpush1.bf16.msra.mxu0 %v4067_v21  ;;  %v4456_v61 = vld [vmem:[%s4350_s24 + $0x20] sm:$0xff]  ;;  %v4114_v2 = vld [vmem:[%s5342_s1 + $0xf0] ss:$12 sps:$4 sm:$0xff]   ;;  %v4118_v6 = vld [vmem:[%s5342_s1 + $0xc8] ss:$12 sps:$4 sm:$0xff]   ;;  %p503_p4 = scmp.lt.s32.totalorder %s3396_s23, 31 }
  0x1f   : > { %1008 = vmatprep.subr.bf16.mxu0 %v4069_v22  ;;  %1062 = vmatpush1.bf16.msra.mxu1 %v4068_v23  ;;  %v4111_v62 = vld [vmem:[%s5342_s1 + $0xf4] ss:$12 sps:$4 sm:$0xff]   ;;  %v526_v63 = vpack.c.bf16 %v4456_v61, %v4450_v59  ;;  %v4110_v0 = vld [vmem:[%s5342_s1 + $0x38] ss:$12 sps:$4 sm:$0xff]   ;;  %v4116_v5 = vld [vmem:[%s5342_s1 + $0xdc] ss:$12 sps:$4 sm:$0xff]  }
  0x20   : > { %1063 = vmatprep.subr.bf16.mxu1 %v4071_v24  ;;  %v4113_v1 = vld [vmem:[%s5342_s1 + $0xe0] ss:$12 sps:$4 sm:$0xff]   ;;  %v4123_v7 = vld [vmem:[%s5342_s1 + $0x218] ss:$0 sps:$4 sm:$0xff]   ;;  %v4121_v9 = vld [vmem:[%s5342_s1 + $0xc4] ss:$12 sps:$4 sm:$0xff]  }
  0x21   : > { %v4115_v4 = vld [vmem:[%s5342_s1 + $0x20] ss:$12 sps:$4 sm:$0xff]   ;;  %1030 = vmatprep.mubr.bf16.mxu0 %v526_v63  ;;  %v4119_v8 = vld [vmem:[%s5342_s1 + $0xd8] ss:$12 sps:$4 sm:$0xff]   ;;  %v4120_v10 = vld [vmem:[%s5342_s1 + $0x8] ss:$12 sps:$4 sm:$0xff]  }
  0x22   : > { %1009 = vmatpush1.bf16.msra.mxu0 %v4073_v25  ;;  %v4494_v11 = vld [vmem:[%s4350_s24] sm:$0xff]  ;;  %v4497_v12 = vld [vmem:[%s4350_s24 + $0x18] sm:$0xff]  ;;  %v996_v13 = vsel %vm988_vm0, %v4123_v7, 0  ;;  %v4507_v16 = vld [vmem:[%s4350_s24 + $0x50] sm:$0xff]  ;;  %s5360_s23 = smov (!%p503_p4, %s3396_s23), 31  ;;  %vm2389_vm5 = vcmask 15360  }
  0x23   : > { %1010 = vmatprep.subr.bf16.mxu0 %v4075_v27  ;;  %1064 = vmatpush1.bf16.msra.mxu1 %v4074_v26  ;;  %v4124_v14 = vld [vmem:[%s5342_s1 + $0xc0] ss:$12 sps:$4 sm:$0xff]   ;;  %v4504_v15 = vld [vmem:[%s4350_s24 + $0x38] sm:$0xff]  ;;  %v525_v17 = vpack.c.bf16 %v4497_v12, %v4494_v11  ;;  %v4126_v20 = vld [vmem:[%s5342_s1 + $0x1e8] ss:$12 sps:$4 sm:$0xff]   ;;  %s3397_s17 = sshll.u32 %s5360_s23, 3 }
  0x24   : > { %1065 = vmatprep.subr.bf16.mxu1 %v4077_v28  ;;  %v4125_v18 = vld [vmem:[%s5342_s1 + $0x200] ss:$12 sps:$4 sm:$0xff]   ;;  %v529_v19 = vpack.c.bf16 %v4507_v16, %v4504_v15  ;;  %v4521_v21 = vld [vmem:[%s4350_s24 + $0x30] sm:$0xff]  ;;  %v4128_v25 = vld [vmem:[%s5342_s1 + $0x1b8] ss:$12 sps:$4 sm:$0xff]   ;;  %vm4174_vm6 = vmmov 0  }
  0x25   : > { %v4524_v22 = vld [vmem:[%s4350_s24 + $0x48] sm:$0xff]  ;;  %v4127_v23 = vld [vmem:[%s5342_s1 + $0x1d0] ss:$12 sps:$4 sm:$0xff]   ;;  %v4548_v28 = vld [vmem:[%s5344_s3] sm:$0xff]   ;;  %s4920_s24 = scalar_lea.vmem %s5355_s14, %s3397_s17  ;;  %vm2527_vm7 = vcmask 64512   ;;  %vm3033_vm8 = vcmask 1045504  }
  0x26   : > { %1011 = vmatpush1.bf16.msra.mxu0 %v4079_v29  ;;  %v528_v24 = vpack.c.bf16 %v4524_v22, %v4521_v21  ;;  %v4129_v26 = vld [vmem:[%s5342_s1 + $0x1a0] ss:$12 sps:$4 sm:$0xff]   ;;  %v4130_v27 = vld [vmem:[%s5342_s1 + $0x188] ss:$12 sps:$4 sm:$0xff]   ;;  %vm3029_vm9 = vcmask 48128   ;;  %s4175_s23 = smov 2  }
  0x27   : > { %1012 = vmatprep.subr.bf16.mxu0 %v4081_v31  ;;  %1066 = vmatpush1.bf16.msra.mxu1 %v4080_v30  ;;  %s5362_s19 = smov (!%p508_p5, %s4262_s19), 1  ;;  %vm3300_vm10 = vcmask 23552   ;;  %vm3283_vm11 = vcmask 31760  }
  0x28   : > { %3583 = vmatprep.subr.bf16.mxu1 %v4083_v34  ;;  %s3398_s17 = sshll.u32 %s5362_s19, 3 }
  0x29   : > { %s511_s26 = scalar_lea.vmem %s5356_s15, %s3398_s17 }
  0x2a   : > { %1013 = vmatpush1.bf16.msra.mxu0 %v4084_v35  ;;  %3469 = vmatmul.mubr.msk.bf16.vlgmr.msra.gmra.mxu1 %vm981_vm1, %v4375_v36 }
  0x2b   : > { %1014 = vmatprep.subr.bf16.mxu0 %v4086_v37  ;;  %3584 = vmatpush3.bf16.msra.mxu1 %v4085_v38 }
  0x2c   : > { %1093 = vmatprep.mubr.bf16.mxu1 %v4172_v3  ;;  %3585 = vmatprep.subr.bf16.mxu1 %v4088_v39 }
  0x2e   : > { %1015 = vmatpush2.bf16.msra.mxu0 %v4089_v40 }
  0x2f   : > { %1016 = vmatprep.subr.bf16.mxu0 %v4091_v41  ;;  %3586 = vmatpush3.bf16.msra.mxu1 %v4090_v42 }
  0x30   : > { %3587 = vmatprep.subr.bf16.mxu1 %v4093_v43 }
  0x32   : > { %1017 = vmatpush2.bf16.msra.mxu0 %v4094_v44  ;;  %3470 = vmatmul.mubr.msk.bf16.gmra.mxu1 %vm981_vm1, %v4433_v54  ;;  %v1216_v44 = vlaneseq }
  0x33   : > { %1018 = vmatprep.subr.bf16.mxu0 %v4096_v45  ;;  %3588 = vmatpush3.bf16.msra.mxu1 %v4095_v46 }
  0x34   : > { %3589 = vmatprep.subr.bf16.mxu1 %v4098_v47  ;;  %1136 = vmatprep.mubr.bf16.mxu1 %v526_v63 }
  0x36   : > { %1019 = vmatpush2.bf16.msra.mxu0 %v4099_v48  ;;  %v1217_v48 = vshrl.u32 %v1216_v44, 7 }
  0x37   : > { %1020 = vmatprep.subr.bf16.mxu0 %v4101_v50  ;;  %3590 = vmatpush3.bf16.msra.mxu1 %v4100_v49 }
  0x38   : > { %3591 = vmatprep.subr.bf16.mxu1 %v4103_v53  ;;  %v1222_v63 = vsub.s32 1, %v1217_v48 }
  0x3a   : > { %1021 = vmatpush2.bf16.msra.mxu0 %v4104_v55 }
  0x3b   : > { %1022 = vmatprep.subr.bf16.mxu0 %v4106_v56  ;;  %3592 = vmatpush3.bf16.msra.mxu1 %v4105_v57  ;;  %v1218_v56 = vsub.s32 0, %v1217_v48 }
  0x3c   : > { %3593 = vmatprep.subr.bf16.mxu1 %v4108_v58 }
  0x3e   : > { %1023 = vmatpush2.bf16.msra.mxu0 %v4109_v60  ;;  %v1214_v60 = vld [vmem:[%s5343_s2] sm:$0x7] }
  0x3f   : > { %1024 = vmatprep.subr.bf16.mxu0 %v4111_v62  ;;  %3594 = vmatpush3.bf16.msra.mxu1 %v4110_v0 }
  0x40   : > { %3595 = vmatprep.subr.bf16.mxu1 %v4113_v1 }
  0x42   : > { %1025 = vmatpush2.bf16.msra.mxu0 %v4114_v2 }
  0x43   : > { %1026 = vmatprep.subr.bf16.mxu0 %v4116_v5  ;;  %3596 = vmatpush3.bf16.msra.mxu1 %v4115_v4 }
  0x44   : > { %3597 = vmatprep.subr.bf16.mxu1 %v4118_v6 }
  0x46   : > { %1027 = vmatpush2.bf16.msra.mxu0 %v4119_v8 }
  0x47   : > { %1028 = vmatprep.subr.bf16.mxu0 %v4121_v9  ;;  %3598 = vmatpush3.bf16.msra.mxu1 %v4120_v10  ;;  %v1219_v10 = vrot.slane %v1214_v60, %v1218_v56 }
  0x48   : > { %4023 = vmatprep.subr.msk.bf16.mxu1 %vm988_vm0, %v4123_v7 }
  0x4a   : > { %1029 = vmatpush2.bf16.msra.mxu0 %v4124_v14  ;;  %1137 = vmatmul.mubr.bf16.vlgmr.msra.gmra.mxu1 %v525_v17 }
  0x4b   : > { %3799 = vmatpush3.bf16.msra.mxu1 %v996_v13  ;;  %1144 = vmatprep.mubr.bf16.mxu1 %v529_v19 }
  0x4c   : > { %3800 = vmatprep.subr.bf16.mxu1 %v4125_v18 }
  0x4d   : > { %1031 = vmatmul.mubr.bf16.vlgmr.msra.gmra.mxu0 %v525_v17  ;;  %v1223_v17 = vrot.slane %v1214_v60, %v1222_v63  ;;  %v4143_v63 = vld [vmem:[%s5346_s5 + $0x68] sm:$0xff]  }
  0x4e   : > { %1040 = vmatprep.mubr.bf16.mxu0 %v529_v19 }
  0x4f   : > { %3801 = vmatpush3.bf16.msra.mxu1 %v4125_v18 }
  0x50   : > { %3802 = vmatprep.subr.bf16.mxu1 %v4126_v20 }
  0x52   : > { %1145 = vmatmul.mubr.bf16.gmra.mxu1 %v528_v24 }
  0x53   : > { %3803 = vmatpush3.bf16.msra.mxu1 %v4126_v20  ;;  %3812 = vmatprep.mubr.msk.bf16.mxu1 %vm981_vm1, %v4375_v36 }
  0x54   : > { %3804 = vmatprep.subr.bf16.mxu1 %v4127_v23 }
  0x55   : > { %1041 = vmatmul.mubr.bf16.gmra.mxu0 %v528_v24 }
  0x56   : > { %1362 = vmatprep.mubr.bf16.mxu0 %v4172_v3 }
  0x57   : > { %3805 = vmatpush3.bf16.msra.mxu1 %v4127_v23 }
  0x58   : > { %3806 = vmatprep.subr.bf16.mxu1 %v4128_v25 }
  0x5b   : > { %3807 = vmatpush3.bf16.msra.mxu1 %v4128_v25 }
  0x5c   : > { %3808 = vmatprep.subr.bf16.mxu1 %v4129_v26 }
  0x5f   : > { %3809 = vmatpush3.bf16.msra.mxu1 %v4129_v26 }
  0x60   : > { %3810 = vmatprep.subr.bf16.mxu1 %v4130_v27 }
  0x63   : > { %3811 = vmatpush3.bf16.msra.mxu1 %v4130_v27 }
  0x66   : > { %3813 = vmatmul.mubr.msk.bf16.vlgmr.msra.gmra.mxu1 %vm981_vm1, %v4433_v54 }
  0x67   : > { %3820 = vmatprep.mubr.msk.bf16.mxu1 %vm1305_vm2, %v4548_v28 }
  0xea   : > { %v1085_v29 = vpop.f32.mrf.mxu1 }
  0xec   : > { %v1087_v30 = vpop.f32.mrf.mxu1 }
  0xee   : > { %v1089_v31 = vpop.f32.mrf.mxu1 }
  0xf0   : > { %v1091_v34 = vpop.f32.mrf.mxu1 }
  0xf2   : > { %v1095_v35 = vpop.f32.mrf.mxu1 }
  0xf4   : > { %v1097_v36 = vpop.f32.mrf.mxu1 }
  0xf6   : > { %v1099_v37 = vpop.f32.mrf.mxu1 }
  0xf8   : > { %v1101_v38 = vpop.f32.mrf.mxu1 }
 0x10a   : > { %v3599_v39 = vpop.f32.mrf.mxu1 }
 0x10c   : > { %v3600_v41 = vpop.f32.mrf.mxu1 }
 0x10d   : > { %v1032_v40 = vpop.f32.mrf.mxu0 }
 0x10e   : > { %v4552_v43 = vpop.f32.mrf.mxu1  ;;  %v1086_v9 = vadd.f32 %v1085_v29, %v1032_v40 }
 0x10f   : > { %v1034_v42 = vpop.f32.mrf.mxu0 }
 0x110   : > { %v3603_v47 = vpop.f32.mrf.mxu1  ;;  %v1088_v62 = vadd.f32 %v1087_v30, %v1034_v42 }
 0x111   : > { %v1036_v45 = vpop.f32.mrf.mxu0 }
 0x112   : > { %v3605_v53 = vpop.f32.mrf.mxu1  ;;  %v1090_v1 = vadd.f32 %v1089_v31, %v1036_v45  ;;  %v1203_v14 = vadd.f32 %v1088_v62, %v4450_v59  ;;  %v4142_v62 = vld [vmem:[%s5346_s5 + $0x30] sm:$0xff]  }
 0x113   : > { %v1038_v46 = vpop.f32.mrf.mxu0 }
 0x114   : > { %v1092_v54 = vadd.f32 %v1091_v34, %v1038_v46  ;;  %v3606_v4 = vpop.f32.mrf.mxu1  ;;  %v1205_v19 = vadd.f32 %v1090_v1, %v4497_v12  ;;  %v1232_v26 = vadd.f32 %v1223_v17, %v1203_v14  ;;  %v4149_v12 = vld [vmem:[%s5346_s5 + $0xb0] ss:$0 sps:$4 sm:$0xff]   ;;  %v4144_v1 = vld [vmem:[%s5346_s5 + $0x28] sm:$0xff]  }
 0x115   : > { %v1042_v49 = vpop.f32.mrf.mxu0  ;;  %v3607_v31 = vadd.f32 %v3606_v4, %v3605_v53  ;;  %v1961_v45 = vsel %vm988_vm0, %v4149_v12, 0  ;;  %v4145_v4 = vld [vmem:[%s5346_s5 + $0x60] sm:$0xff]   ;;  %v4151_v14 = vld [vmem:[%s5346_s5 + $0x10] sm:$0xff]  }
 0x116   : > { %v1096_v57 = vadd.f32 %v1095_v35, %v1042_v49  ;;  %v1206_v5 = vadd.f32 %v1092_v54, %v4456_v61  ;;  %v3608_v23 = vpop.f32.mrf.mxu1  ;;  %v1234_v29 = vadd.f32 %v1219_v10, %v1205_v19  ;;  %v3604_v49 = vadd.f32 %v3603_v47, %v4552_v43  ;;  %v4132_v43 = vld [vmem:[%s5344_s3 + $0x8] sm:$0xff]   ;;  %v4155_v19 = vld [vmem:[%s5346_s5 + $0xa0] sm:$0xff]  }
 0x117   : > { %v1044_v50 = vpop.f32.mrf.mxu0 }
 0x118   : > { %v1098_v55 = vadd.f32 %v1097_v36, %v1044_v50  ;;  %v1208_v13 = vadd.f32 %v1096_v57, %v4521_v21  ;;  %v1235_v24 = vadd.f32 %v1223_v17, %v1206_v5  ;;  %v3609_v21 = vpop.f32.mrf.mxu1  ;;  %v3601_v36 = vadd.f32 %v3600_v41, %v3599_v39  ;;  %v4146_v5 = vld [vmem:[%s5346_s5 + $0x20] sm:$0xff]  }
 0x119   : > { %v1046_v58 = vpop.f32.mrf.mxu0 }
 0x11a   : > { %v1100_v0 = vadd.f32 %v1099_v37, %v1046_v58  ;;  %v1209_v6 = vadd.f32 %v1098_v55, %v4504_v15  ;;  %v1202_v15 = vadd.f32 %v1086_v9, %v4494_v11  ;;  %v1260_v59 = vpack.c.bf16 %v1235_v24, %v1232_v26  ;;  %v4148_v9 = vld [vmem:[%s5346_s5 + $0x18] sm:$0xff]   ;;  %v1707_v26 = vld [vmem:[%s5347_s6 + $0x10] sm:$0xff] }
 0x11b   : > { %v1048_v2 = vpop.f32.mrf.mxu0  ;;  %v3610_v11 = vadd.f32 %v3609_v21, %v3608_v23  ;;  %v4157_v23 = vld [vmem:[%s5346_s5] sm:$0xff]   ;;  %v4158_v24 = vld [vmem:[%s5346_s5 + $0x98] sm:$0xff]   ;;  %1733 = vperm.xlu1 %4039, %v1707_v26   ;;  %v1710_v21 = vld [vmem:[%s5347_s6 + $0x28] sm:$0xff] }
 0x11c   : > { %v1211_v7 = vadd.f32 %v1100_v0, %v4524_v22  ;;  %v1102_v8 = vadd.f32 %v1101_v38, %v1048_v2  ;;  %v1238_v61 = vadd.f32 %v1223_v17, %v1209_v6  ;;  %v1237_v22 = vadd.f32 %v1219_v10, %v1208_v13  ;;  %v4134_v0 = vld [vmem:[%s5344_s3 + $0x18] sm:$0xff]   ;;  %v4135_v2 = vld [vmem:[%s5344_s3 + $0x20] sm:$0xff]   ;;  %v4150_v13 = vld [vmem:[%s5346_s5 + $0x50] sm:$0xff]  }
 0x11d   : > { %v1231_v34 = vadd.f32 %v1219_v10, %v1202_v15  ;;  %v1226_v38 = vsub.s32 2, %v1217_v48  ;;  %v4147_v6 = vld [vmem:[%s5346_s5 + $0x58] sm:$0xff]   ;;  %v4161_v15 = vld [vmem:[%s5346_s5 + $0x80] sm:$0xff]  }
 0x11e   : > { %v1212_v18 = vadd.f32 %v1102_v8, %v4507_v16  ;;  %v1240_v20 = vadd.f32 %v1219_v10, %v1211_v7  ;;  %v4136_v7 = vld [vmem:[%s5344_s3 + $0x28] sm:$0xff]   ;;  %v4137_v8 = vld [vmem:[%s5344_s3 + $0x30] sm:$0xff]   ;;  %v4138_v10 = vld [vmem:[%s5344_s3 + $0x38] sm:$0xff]  }
 0x11f   : > { %v1259_v16 = vpack.c.bf16 %v1234_v29, %v1231_v34  ;;  %v1227_v50 = vrot.slane %v1214_v60, %v1226_v38  ;;  %v4141_v60 = vld [vmem:[%s5346_s5 + $0x70] sm:$0xff]   ;;  %v1708_v29 = vld [vmem:[%s5347_s6 + $0x18] sm:$0xff]  ;;  %v1713_v34 = vld [vmem:[%s5347_s6 + $0x40] sm:$0xff] }
 0x120   : > { %v1241_v25 = vadd.f32 %v1223_v17, %v1212_v18  ;;  %v1262_v30 = vpack.c.bf16 %v1240_v20, %v1237_v22  ;;  %v4152_v17 = vld [vmem:[%s5346_s5 + $0xa8] sm:$0xff]   ;;  %v4156_v20 = vld [vmem:[%s5346_s5 + $0x40] sm:$0xff]   ;;  %1738 = vperm.xlu1 %4039, %v1708_v29   ;;  %v1720_v38 = vld [vmem:[%s5347_s6 + $0x78] sm:$0xff] }
 0x121   : > { %v4154_v18 = vld [vmem:[%s5346_s5 + $0x8] sm:$0xff]   ;;  %v1705_v22 = vld [vmem:[%s5347_s6] sm:$0xff] }
 0x122   : > { %v1263_v27 = vpack.c.bf16 %v1241_v25, %v1238_v61  ;;  %v4159_v61 = vld [vmem:[%s5346_s5 + $0x90] sm:$0xff]   ;;  %v4160_v25 = vld [vmem:[%s5346_s5 + $0x88] sm:$0xff]   ;;  %1723 = vperm.xlu0 %4038, %v1705_v22  }
 0x124   : > { %1342 = vmatprep.subr.bf16.mxu0 %v1263_v27  ;;  %v1706_v27 = vld [vmem:[%s5347_s6 + $0x8] sm:$0xff]  ;;  %1748 = vperm.xlu1 %4039, %v1710_v21  }
 0x125   : > { %1343 = vmatpush1.bf16.msra.mxu0 %v1262_v30  ;;  %v1709_v30 = vld [vmem:[%s5347_s6 + $0x20] sm:$0xff] }
 0x126   : > { %1344 = vmatprep.subr.bf16.mxu0 %v1260_v59  ;;  %v3814_v35 = vpop.f32.mrf.mxu1  ;;  %1728 = vperm.xlu0 %4038, %v1706_v27   ;;  %v1712_v59 = vld [vmem:[%s5347_s6 + $0x38] sm:$0xff] }
 0x127   : > { %v1196_v37 = vadd.f32 %v3814_v35, %v3607_v31  ;;  %v1711_v31 = vld [vmem:[%s5347_s6 + $0x30] sm:$0xff]  ;;  %v1716_v35 = vld [vmem:[%s5347_s6 + $0x58] sm:$0xff] }
 0x128   : > { %v1187_v40 = vpop.f32.mrf.mxu1  ;;  %1758 = vperm.xlu1 %4039, %v1712_v59  }
 0x129   : > { %1345 = vmatpush1.bf16.msra.mxu0 %v1259_v16  ;;  %v1210_v42 = vadd.f32 %v1196_v37, %v4423_v51  ;;  %v1188_v44 = vadd.f32 %v3601_v36, %v1187_v40  ;;  %v1715_v16 = vld [vmem:[%s5347_s6 + $0x50] sm:$0xff]  ;;  %v1717_v36 = vld [vmem:[%s5347_s6 + $0x60] sm:$0xff] }
 0x12a   : > { %4024 = vmatprep.subr.msk.bf16.mxu0 %vm988_vm0, %v4149_v12  ;;  %v3815_v46 = vpop.f32.mrf.mxu1  ;;  %1743 = vperm.xlu0 %4038, %v1709_v30   ;;  %v1714_v12 = vld [vmem:[%s5347_s6 + $0x48] sm:$0xff]  ;;  %v1719_v37 = vld [vmem:[%s5347_s6 + $0x70] sm:$0xff] }
 0x12b   : > { %v1199_v53 = vadd.f32 %v3815_v46, %v3610_v11  ;;  %v1239_v41 = vadd.f32 %v1227_v50, %v1210_v42  ;;  %v1204_v51 = vadd.f32 %v1188_v44, %v4362_v32  ;;  %v4139_v32 = vld [vmem:[%s5346_s5 + $0x78] sm:$0xff]   ;;  %v1718_v11 = vld [vmem:[%s5347_s6 + $0x68] sm:$0xff] }
 0x12c   : > { %3481 = vmatmul.mubr.msk.bf16.vlgmr.msra.gmra.mxu0 %vm1305_vm2, %v4548_v28  ;;  %v1190_v39 = vpop.f32.mrf.mxu1  ;;  %1768 = vperm.xlu1 %4039, %v1714_v12   ;;  %v1543_v44 = vld [vmem:[%s5345_s4 + $0x18] sm:$0xff]  ;;  %v1560_v12 = vld [vmem:[%s5345_s4 + $0xa0] sm:$0xff] }
 0x12d   : > { %1372 = vmatprep.mubr.bf16.mxu0 %v4172_v3  ;;  %3837 = vmatpush3.bf16.msra.mxu0 %v1961_v45  ;;  %v1213_v48 = vadd.f32 %v1199_v53, %v4426_v52  ;;  %v1191_v54 = vadd.f32 %v3604_v49, %v1190_v39  ;;  %v1233_v47 = vadd.f32 %v1227_v50, %v1204_v51  ;;  %v4140_v52 = vld [vmem:[%s5346_s5 + $0x38] sm:$0xff]   ;;  %v1541_v45 = vld [vmem:[%s5345_s4 + $0x8] sm:$0xff]  ;;  %v1544_v49 = vld [vmem:[%s5345_s4 + $0x20] sm:$0xff] }
 0x12e   : > { %3838 = vmatprep.subr.bf16.mxu0 %v4152_v17  ;;  %1753 = vperm.xlu0 %4038, %v1711_v31  }
 0x12f   : > { %v1242_v55 = vadd.f32 %v1227_v50, %v1213_v48  ;;  %v1207_v56 = vadd.f32 %v1191_v54, %v4365_v33  ;;  %v4133_v33 = vld [vmem:[%s5344_s3 + $0x10] sm:$0xff]  }
 0x130   : > { %1778 = vperm.xlu1 %4039, %v1716_v35  }
 0x131   : > { %v1236_v57 = vadd.f32 %v1227_v50, %v1207_v56  ;;  %v1264_v28 = vpack.c.bf16 %v1242_v55, %v1239_v41  ;;  %3839 = vmatpush3.bf16.msra.mxu0 %v4152_v17  ;;  %v1540_v50 = vld [vmem:[%s5345_s4] sm:$0xff] }
 0x132   : > { %3840 = vmatprep.subr.bf16.mxu0 %v4155_v19  ;;  %1763 = vperm.xlu0 %4038, %v1713_v34  }
 0x133   : > { %3816 = vmatprep.subr.bf16.mxu1 %v1264_v28  ;;  %v1261_v58 = vpack.c.bf16 %v1236_v57, %v1233_v47  ;;  %v1549_v47 = vld [vmem:[%s5345_s4 + $0x48] sm:$0xff]  ;;  %v1547_v57 = vld [vmem:[%s5345_s4 + $0x38] sm:$0xff] }
 0x134   : > { %3482 = vmatmul.mubr.msk.bf16.gmra.mxu0 %vm1305_vm2, %v4132_v43  ;;  %3817 = vmatpush3.bf16.msra.mxu1 %v1264_v28 }
 0x135   : > { %1382 = vmatprep.mubr.bf16.mxu0 %v4172_v3  ;;  %3818 = vmatprep.subr.bf16.mxu1 %v1261_v58 }
 0x136   : > { %3841 = vmatpush3.bf16.msra.mxu0 %v4155_v19  ;;  %1773 = vperm.xlu0 %4038, %v1715_v16   ;;  %v1556_v19 = vld [vmem:[%s5345_s4 + $0x80] sm:$0xff] }
 0x137   : > { %3842 = vmatprep.subr.bf16.mxu0 %v4158_v24  ;;  %1788 = vperm.xlu1 %4039, %v1718_v11  }
 0x138   : > { %3819 = vmatpush3.bf16.msra.mxu1 %v1261_v58  ;;  %v1550_v58 = vld [vmem:[%s5345_s4 + $0x50] sm:$0xff] }
 0x139   : > { %3630 = vmatprep.subr.bf16.mxu1 %v4139_v32  ;;  %v1546_v32 = vld [vmem:[%s5345_s4 + $0x30] sm:$0xff] }
 0x13a   : > { %3843 = vmatpush3.bf16.msra.mxu0 %v4158_v24  ;;  %1783 = vperm.xlu0 %4038, %v1717_v36   ;;  %v1554_v36 = vld [vmem:[%s5345_s4 + $0x70] sm:$0xff] }
 0x13b   : > { %3821 = vmatmul.mubr.msk.bf16.vlgmr.msra.gmra.mxu1 %vm1305_vm2, %v4132_v43  ;;  %3844 = vmatprep.subr.bf16.mxu0 %v4159_v61 }
 0x13c   : > { %3483 = vmatmul.mubr.msk.bf16.gmra.mxu0 %vm1305_vm2, %v4133_v33  ;;  %3824 = vmatprep.mubr.msk.bf16.mxu1 %vm1305_vm2, %v4133_v33 }
 0x13d   : > { %1392 = vmatprep.mubr.bf16.mxu0 %v4172_v3  ;;  %3631 = vmatpush3.bf16.msra.mxu1 %v4140_v52 }
 0x13e   : > { %3632 = vmatprep.subr.bf16.mxu1 %v4141_v60  ;;  %3845 = vmatpush3.bf16.msra.mxu0 %v4159_v61 }
 0x13f   : > { %3846 = vmatprep.subr.bf16.mxu0 %v4160_v25  ;;  %1793 = vperm.xlu0 %4038, %v1719_v37   ;;  %v1563_v37 = vld [vmem:[%s5345_s4 + $0xb8] sm:$0xff] }
 0x140   : > { %1798 = vperm.xlu1 %4039, %v1720_v38   ;;  %v1561_v38 = vld [vmem:[%s5345_s4 + $0xa8] sm:$0xff] }
 0x141   : > { %3633 = vmatpush3.bf16.msra.mxu1 %v4142_v62 }
 0x142   : > { %3634 = vmatprep.subr.bf16.mxu1 %v4143_v63  ;;  %3847 = vmatpush3.bf16.msra.mxu0 %v4160_v25 }
 0x143   : > { %3825 = vmatmul.mubr.msk.bf16.gmra.mxu1 %vm1305_vm2, %v4134_v0  ;;  %3848 = vmatprep.subr.bf16.mxu0 %v4161_v15 }
 0x144   : > { %3484 = vmatmul.mubr.msk.bf16.gmra.mxu0 %vm1305_vm2, %v4134_v0  ;;  %3828 = vmatprep.mubr.msk.bf16.mxu1 %vm1305_vm2, %v4135_v2 }
 0x145   : > { %1402 = vmatprep.mubr.bf16.mxu0 %v4172_v3  ;;  %3635 = vmatpush3.bf16.msra.mxu1 %v4144_v1 }
 0x146   : > { %3636 = vmatprep.subr.bf16.mxu1 %v4145_v4  ;;  %3849 = vmatpush3.bf16.msra.mxu0 %v4161_v15  ;;  %v1548_v4 = vld [vmem:[%s5345_s4 + $0x40] sm:$0xff] }
 0x149   : > { %3637 = vmatpush3.bf16.msra.mxu1 %v4146_v5 }
 0x14a   : > { %3638 = vmatprep.subr.bf16.mxu1 %v4147_v6 }
 0x14b   : > { %3829 = vmatmul.mubr.msk.bf16.gmra.mxu1 %vm1305_vm2, %v4136_v7 }
 0x14c   : > { %3485 = vmatmul.mubr.msk.bf16.gmra.mxu0 %vm1305_vm2, %v4135_v2  ;;  %3832 = vmatprep.mubr.msk.bf16.mxu1 %vm1305_vm2, %v4137_v8 }
 0x14d   : > { %1412 = vmatprep.mubr.bf16.mxu0 %v4172_v3  ;;  %3639 = vmatpush3.bf16.msra.mxu1 %v4148_v9  ;;  %v1551_v9 = vld [vmem:[%s5345_s4 + $0x58] sm:$0xff] }
 0x14e   : > { %3640 = vmatprep.subr.bf16.mxu1 %v4150_v13 }
 0x151   : > { %3641 = vmatpush3.bf16.msra.mxu1 %v4151_v14  ;;  %v1553_v14 = vld [vmem:[%s5345_s4 + $0x68] sm:$0xff] }
 0x153   : > { %3833 = vmatmul.mubr.msk.bf16.gmra.mxu1 %vm1305_vm2, %v4138_v10 }
 0x154   : > { %3486 = vmatmul.mubr.msk.bf16.gmra.mxu0 %vm1305_vm2, %v4136_v7  ;;  %v1542_v7 = vld [vmem:[%s5345_s4 + $0x10] sm:$0xff] }
 0x155   : > { %1422 = vmatprep.mubr.bf16.mxu0 %v4172_v3 }
 0x15c   : > { %3487 = vmatmul.mubr.msk.bf16.gmra.mxu0 %vm1305_vm2, %v4137_v8 }
 0x15d   : > { %1432 = vmatprep.mubr.bf16.mxu0 %v4172_v3  ;;  %v4153_v3 = vld [vmem:[%s5346_s5 + $0x48] sm:$0xff]  }
 0x15e   : > { %3642 = vmatprep.subr.bf16.mxu1 %v4153_v3 }
 0x15f   : > { %3643 = vmatpush3.bf16.msra.mxu1 %v4154_v18  ;;  %v1545_v18 = vld [vmem:[%s5345_s4 + $0x28] sm:$0xff] }
 0x160   : > { %3644 = vmatprep.subr.bf16.mxu1 %v4156_v20  ;;  %v1552_v20 = vld [vmem:[%s5345_s4 + $0x60] sm:$0xff] }
 0x163   : > { %3645 = vmatpush3.bf16.msra.mxu1 %v4157_v23 }
 0x164   : > { %3488 = vmatmul.mubr.msk.bf16.gmra.mxu0 %vm1305_vm2, %v4138_v10  ;;  %v1555_v10 = vld [vmem:[%s5345_s4 + $0x78] sm:$0xff] }
 0x1ec   : > { %v1364_v40 = vpop.f32.mrf.mxu0 }
 0x1ed   : > { %v1588_v48 = vmul.f32 %v1540_v50, %v1364_v40  ;;  %v1558_v50 = vld [vmem:[%s5345_s4 + $0x90] sm:$0xff] }
 0x1ee   : > { %v1366_v42 = vpop.f32.mrf.mxu0 }
 0x1ef   : > { %v1589_v41 = vmul.f32 %v1541_v45, %v1366_v42  ;;  %v1559_v42 = vld [vmem:[%s5345_s4 + $0x98] sm:$0xff] }
 0x1f0   : > { %v1368_v46 = vpop.f32.mrf.mxu0 }
 0x1f1   : > { %v1591_v53 = vmul.f32 %v1543_v44, %v1368_v46  ;;  %v1557_v46 = vld [vmem:[%s5345_s4 + $0x88] sm:$0xff] }
 0x1f2   : > { %v1370_v39 = vpop.f32.mrf.mxu0 }
 0x1f3   : > { %v1592_v51 = vmul.f32 %v1544_v49, %v1370_v39  ;;  %v1636_v56 = vpack.c.bf16 %v1591_v53, %v1588_v48  ;;  %v1562_v49 = vld [vmem:[%s5345_s4 + $0xb0] sm:$0xff] }
 0x1f4   : > { %v1374_v54 = vpop.f32.mrf.mxu0 }
 0x1f5   : > { %v1637_v55 = vpack.c.bf16 %v1592_v51, %v1589_v41  ;;  %v1594_v63 = vmul.f32 %v1546_v32, %v1374_v54 }
 0x1f6   : > { %v1376_v43 = vpop.f32.mrf.mxu0 }
 0x1f7   : > { %1995 = vmatprep.mubr.bf16.mxu1 %v1637_v55  ;;  %v1595_v60 = vmul.f32 %v1547_v57, %v1376_v43 }
 0x1f8   : > { %v1378_v28 = vpop.f32.mrf.mxu0  ;;  %1996 = vmatmul.mubr.bf16.vlgmr.msra.gmra.mxu1 %v1636_v56 }
 0x1f9   : > { %v1597_v33 = vmul.f32 %v1549_v47, %v1378_v28 }
 0x1fa   : > { %v1380_v52 = vpop.f32.mrf.mxu0 }
 0x1fb   : > { %v1598_v62 = vmul.f32 %v1550_v58, %v1380_v52  ;;  %v3822_v0 = vpop.f32.mrf.mxu1  ;;  %v1639_v5 = vpack.c.bf16 %v1597_v33, %v1594_v63  ;;  %v1572_v33 = vld [vmem:[%s5345_s4 + $0x100] sm:$0xff]  ;;  %v1566_v63 = vld [vmem:[%s5345_s4 + $0xd0] sm:$0xff] }
 0x1fc   : > { %v1384_v1 = vpop.f32.mrf.mxu0  ;;  %v1596_v13 = vmul.f32 %v3822_v0, %v1548_v4  ;;  %v1575_v0 = vld [vmem:[%s5345_s4 + $0x118] sm:$0xff] }
 0x1fd   : > { %v1640_v2 = vpack.c.bf16 %v1598_v62, %v1595_v60  ;;  %v1477_v6 = vpop.f32.mrf.mxu1  ;;  %v1600_v29 = vmul.f32 %v1552_v20, %v1384_v1  ;;  %v1567_v1 = vld [vmem:[%s5345_s4 + $0xd8] sm:$0xff] }
 0x1fe   : > { %v1386_v8 = vpop.f32.mrf.mxu0  ;;  %v1590_v23 = vmul.f32 %v1542_v7, %v1477_v6  ;;  %v1568_v6 = vld [vmem:[%s5345_s4 + $0xe0] sm:$0xff] }
 0x1ff   : > { %2003 = vmatprep.mubr.bf16.mxu1 %v1640_v2  ;;  %v3823_v17 = vpop.f32.mrf.mxu1  ;;  %v1601_v22 = vmul.f32 %v1553_v14, %v1386_v8  ;;  %v1565_v2 = vld [vmem:[%s5345_s4 + $0xc8] sm:$0xff] }
 0x200   : > { %v1388_v3 = vpop.f32.mrf.mxu0  ;;  %2004 = vmatmul.mubr.bf16.gmra.mxu1 %v1639_v5  ;;  %v1599_v24 = vmul.f32 %v3823_v17, %v1551_v9  ;;  %v1569_v8 = vld [vmem:[%s5345_s4 + $0xe8] sm:$0xff]  ;;  %v1564_v9 = vld [vmem:[%s5345_s4 + $0xc0] sm:$0xff] }
 0x201   : > { %v1603_v61 = vmul.f32 %v1555_v10, %v1388_v3  ;;  %v1480_v25 = vpop.f32.mrf.mxu1 }
 0x202   : > { %v1390_v15 = vpop.f32.mrf.mxu0  ;;  %v1593_v26 = vmul.f32 %v1545_v18, %v1480_v25  ;;  %v1641_v30 = vpack.c.bf16 %v1599_v24, %v1596_v13 }
 0x203   : > { %v1604_v27 = vmul.f32 %v1556_v19, %v1390_v15  ;;  %v3826_v21 = vpop.f32.mrf.mxu1  ;;  %v1642_v16 = vpack.c.bf16 %v1603_v61, %v1600_v29 }
 0x204   : > { %v1394_v31 = vpop.f32.mrf.mxu0  ;;  %v1638_v59 = vpack.c.bf16 %v1593_v26, %v1590_v23  ;;  %v1608_v40 = vmul.f32 %v3826_v21, %v1560_v12  ;;  %v1584_v26 = vld [vmem:[%s5345_s4 + $0x160] sm:$0xff]  ;;  %v1578_v21 = vld [vmem:[%s5345_s4 + $0x130] sm:$0xff] }
 0x205   : > { %v1643_v34 = vpack.c.bf16 %v1604_v27, %v1601_v22  ;;  %v1493_v35 = vpop.f32.mrf.mxu1  ;;  %v1606_v43 = vmul.f32 %v1558_v50, %v1394_v31  ;;  %v1587_v31 = vld [vmem:[%s5345_s4 + $0x178] sm:$0xff] }
 0x206   : > { %v1396_v11 = vpop.f32.mrf.mxu0  ;;  %3850 = vmatprep.mubr.msk.bf16.mxu0 %vm981_vm1, %v1638_v59  ;;  %v1602_v53 = vmul.f32 %v1554_v36, %v1493_v35  ;;  %v1573_v59 = vld [vmem:[%s5345_s4 + $0x108] sm:$0xff]  ;;  %v1574_v35 = vld [vmem:[%s5345_s4 + $0x110] sm:$0xff] }
 0x207   : > { %2011 = vmatprep.mubr.bf16.mxu1 %v1643_v34  ;;  %v3827_v44 = vpop.f32.mrf.mxu1  ;;  %3851 = vmatmul.mubr.msk.bf16.vlgmr.msra.gmra.mxu0 %vm981_vm1, %v1641_v30  ;;  %v1607_v54 = vmul.f32 %v1559_v42, %v1396_v11  ;;  %v1571_v34 = vld [vmem:[%s5345_s4 + $0xf8] sm:$0xff]  ;;  %v1581_v11 = vld [vmem:[%s5345_s4 + $0x148] sm:$0xff] }
 0x208   : > { %v1398_v45 = vpop.f32.mrf.mxu0  ;;  %2012 = vmatmul.mubr.bf16.gmra.mxu1 %v1642_v16  ;;  %v1611_v39 = vmul.f32 %v3827_v44, %v1563_v37  ;;  %v1570_v37 = vld [vmem:[%s5345_s4 + $0xf0] sm:$0xff] }
 0x209   : > { %v1609_v41 = vmul.f32 %v1561_v38, %v1398_v45  ;;  %v1496_v51 = vpop.f32.mrf.mxu1 }
 0x20a   : > { %v1400_v48 = vpop.f32.mrf.mxu0  ;;  %v1605_v55 = vmul.f32 %v1557_v46, %v1496_v51  ;;  %v1647_v47 = vpack.c.bf16 %v1611_v39, %v1608_v40 }
 0x20b   : > { %v1610_v56 = vmul.f32 %v1562_v49, %v1400_v48  ;;  %v3830_v28 = vpop.f32.mrf.mxu1  ;;  %v1645_v52 = vpack.c.bf16 %v1609_v41, %v1606_v43  ;;  %v1577_v43 = vld [vmem:[%s5345_s4 + $0x128] sm:$0xff] }
 0x20c   : > { %v1404_v57 = vpop.f32.mrf.mxu0  ;;  %v1644_v58 = vpack.c.bf16 %v1605_v55, %v1602_v53  ;;  %v1620_v4 = vmul.f32 %v3830_v28, %v1572_v33  ;;  %v1576_v28 = vld [vmem:[%s5345_s4 + $0x120] sm:$0xff] }
 0x20d   : > { %v1646_v32 = vpack.c.bf16 %v1610_v56, %v1607_v54  ;;  %v1509_v62 = vpop.f32.mrf.mxu1  ;;  %v1612_v23 = vmul.f32 %v1564_v9, %v1404_v57  ;;  %v1579_v56 = vld [vmem:[%s5345_s4 + $0x138] sm:$0xff]  ;;  %v1580_v57 = vld [vmem:[%s5345_s4 + $0x140] sm:$0xff] }
 0x20e   : > { %v1406_v60 = vpop.f32.mrf.mxu0  ;;  %3854 = vmatprep.mubr.msk.bf16.mxu0 %vm981_vm1, %v1644_v58  ;;  %v1614_v10 = vmul.f32 %v1566_v63, %v1509_v62 }
 0x20f   : > { %2019 = vmatprep.mubr.bf16.mxu1 %v1646_v32  ;;  %3855 = vmatmul.mubr.msk.bf16.gmra.mxu0 %vm981_vm1, %v1647_v47  ;;  %v3831_v7 = vpop.f32.mrf.mxu1  ;;  %v1613_v18 = vmul.f32 %v1565_v2, %v1406_v60  ;;  %v1585_v2 = vld [vmem:[%s5345_s4 + $0x168] sm:$0xff] }
 0x210   : > { %v1408_v5 = vpop.f32.mrf.mxu0  ;;  %2020 = vmatmul.mubr.bf16.gmra.mxu1 %v1645_v52  ;;  %v1623_v13 = vmul.f32 %v3831_v7, %v1575_v0  ;;  %v1582_v7 = vld [vmem:[%s5345_s4 + $0x150] sm:$0xff] }
 0x211   : > { %v1615_v14 = vmul.f32 %v1567_v1, %v1408_v5  ;;  %v1512_v3 = vpop.f32.mrf.mxu1 }
 0x212   : > { %v1410_v17 = vpop.f32.mrf.mxu0  ;;  %v1617_v20 = vmul.f32 %v1569_v8, %v1512_v3  ;;  %v1653_v24 = vpack.c.bf16 %v1623_v13, %v1620_v4  ;;  %v1583_v4 = vld [vmem:[%s5345_s4 + $0x158] sm:$0xff] }
 0x213   : > { %v1616_v19 = vmul.f32 %v1568_v6, %v1410_v17  ;;  %v3834_v25 = vpop.f32.mrf.mxu1  ;;  %v1648_v27 = vpack.c.bf16 %v1615_v14, %v1612_v23  ;;  %v1586_v6 = vld [vmem:[%s5345_s4 + $0x170] sm:$0xff] }
 0x214   : > { %v1414_v61 = vpop.f32.mrf.mxu0  ;;  %v1650_v22 = vpack.c.bf16 %v1617_v20, %v1614_v10  ;;  %v1632_v12 = vmul.f32 %v3834_v25, %v1584_v26  ;;  %v2173_v20 = vld [vmem:[%s5348_s7] sm:$0xff] }
 0x215   : > { %v1649_v15 = vpack.c.bf16 %v1616_v19, %v1613_v18  ;;  %v1525_v30 = vpop.f32.mrf.mxu1  ;;  %v1618_v53 = vmul.f32 %v1570_v37, %v1414_v61  ;;  %v2175_v18 = vld [vmem:[%s5348_s7 + $0x10] sm:$0xf]  ;;  %v2174_v19 = vld [vmem:[%s5348_s7 + $0x8] sm:$0xff] }
 0x216   : > { %v1416_v29 = vpop.f32.mrf.mxu0  ;;  %3858 = vmatprep.mubr.msk.bf16.mxu0 %vm981_vm1, %v1650_v22  ;;  %v1626_v38 = vmul.f32 %v1578_v21, %v1525_v30  ;;  %3866 = vmatprep.subr.msk.mxu0 %vm988_vm0, %v2175_v18  ;;  %v1724_v22 = vpop.permute.xlu0 %1723 }
 0x217   : > { %2027 = vmatprep.mubr.bf16.mxu1 %v1649_v15  ;;  %v3835_v36 = vpop.f32.mrf.mxu1  ;;  %3859 = vmatmul.mubr.msk.bf16.gmra.mxu0 %vm981_vm1, %v1653_v24  ;;  %v1619_v46 = vmul.f32 %v1571_v34, %v1416_v29  ;;  %v1734_v30 = vpop.permute.xlu1 %1733 }
 0x218   : > { %v1418_v16 = vpop.f32.mrf.mxu0  ;;  %2028 = vmatmul.mubr.bf16.gmra.mxu1 %v1648_v27  ;;  %v1635_v40 = vmul.f32 %v3835_v36, %v1587_v31  ;;  %3867 = vmatpush3.msk.msra.mxu0 %vm988_vm0, %v2175_v18 }
 0x219   : > { %v1621_v42 = vmul.f32 %v1573_v59, %v1418_v16  ;;  %v1528_v45 = vpop.f32.mrf.mxu1  ;;  %3868 = vmatprep.subr.mxu0 %v2174_v19 }
 0x21a   : > { %v1420_v44 = vpop.f32.mrf.mxu0  ;;  %v1629_v50 = vmul.f32 %v1581_v11, %v1528_v45  ;;  %v1659_v39 = vpack.c.bf16 %v1635_v40, %v1632_v12  ;;  %3869 = vmatpush3.msra.mxu0 %v2174_v19  ;;  %v1729_v59 = vpop.permute.xlu0 %1728 }
 0x21b   : > { %v1622_v49 = vmul.f32 %v1574_v35, %v1420_v44  ;;  %v1651_v54 = vpack.c.bf16 %v1621_v42, %v1618_v53  ;;  %3870 = vmatprep.subr.mxu0 %v2173_v20  ;;  %v1739_v40 = vpop.permute.xlu1 %1738 }
 0x21c   : > { %v1424_v41 = vpop.f32.mrf.mxu0  ;;  %v1656_v48 = vpack.c.bf16 %v1629_v50, %v1626_v38  ;;  %3871 = vmatpush3.msra.mxu0 %v2173_v20 }
 0x21d   : > { %v1652_v51 = vpack.c.bf16 %v1622_v49, %v1619_v46  ;;  %v1624_v60 = vmul.f32 %v1576_v28, %v1424_v41 }
 0x21e   : > { %v1426_v55 = vpop.f32.mrf.mxu0  ;;  %3862 = vmatprep.mubr.msk.bf16.mxu0 %vm981_vm1, %v1656_v48  ;;  %v1744_v49 = vpop.permute.xlu0 %1743 }
 0x21f   : > { %2035 = vmatprep.mubr.bf16.mxu1 %v1652_v51  ;;  %3863 = vmatmul.mubr.msk.bf16.gmra.mxu0 %vm981_vm1, %v1659_v39  ;;  %v1625_v33 = vmul.f32 %v1577_v43, %v1426_v55  ;;  %v1749_v43 = vpop.permute.xlu1 %1748 }
 0x220   : > { %v1428_v47 = vpop.f32.mrf.mxu0  ;;  %2036 = vmatmul.mubr.bf16.gmra.mxu1 %v1651_v54 }
 0x221   : > { %v1627_v58 = vmul.f32 %v1579_v56, %v1428_v47 }
 0x222   : > { %v1430_v32 = vpop.f32.mrf.mxu0 }
 0x223   : > { %v1628_v52 = vmul.f32 %v1580_v57, %v1430_v32  ;;  %v1654_v0 = vpack.c.bf16 %v1627_v58, %v1624_v60  ;;  %v1754_v60 = vpop.permute.xlu0 %1753 }
 0x224   : > { %v1434_v62 = vpop.f32.mrf.mxu0 }
 0x225   : > { %v1655_v63 = vpack.c.bf16 %v1628_v52, %v1625_v33  ;;  %v1630_v14 = vmul.f32 %v1582_v7, %v1434_v62 }
 0x226   : > { %v1436_v1 = vpop.f32.mrf.mxu0 }
 0x227   : > { %2043 = vmatprep.mubr.bf16.mxu1 %v1655_v63  ;;  %v1631_v10 = vmul.f32 %v1583_v4, %v1436_v1 }
 0x228   : > { %v1438_v5 = vpop.f32.mrf.mxu0  ;;  %2044 = vmatmul.mubr.bf16.gmra.mxu1 %v1654_v0 }
 0x229   : > { %v1633_v8 = vmul.f32 %v1585_v2, %v1438_v5 }
 0x22a   : > { %v1440_v9 = vpop.f32.mrf.mxu0 }
 0x22b   : > { %v1634_v13 = vmul.f32 %v1586_v6, %v1440_v9  ;;  %v1657_v3 = vpack.c.bf16 %v1633_v8, %v1630_v14  ;;  %v1759_v9 = vpop.permute.xlu1 %1758 }
 0x22d   : > { %v1658_v17 = vpack.c.bf16 %v1634_v13, %v1631_v10 }
 0x22f   : > { %2051 = vmatprep.mubr.bf16.mxu1 %v1658_v17 }
 0x230   : > { %2052 = vmatmul.mubr.bf16.gmra.mxu1 %v1657_v3 }
 0x2b8   : > { %v3646_v23 = vpop.f32.mrf.mxu1 }
 0x2ba   : > { %v3647_v24 = vpop.f32.mrf.mxu1 }
 0x2bb   : > { %v3648_v29 = vadd.f32 %v3647_v24, %v3646_v23 }
 0x2bc   : > { %v3649_v61 = vpop.f32.mrf.mxu1 }
 0x2bd   : > { %v1998_v16 = vadd.f32 %v3648_v29, %v1724_v22 }
 0x2be   : > { %v3650_v25 = vpop.f32.mrf.mxu1 }
 0x2bf   : > { %v3651_v35 = vadd.f32 %v3650_v25, %v3649_v61  ;;  %v1764_v61 = vpop.permute.xlu0 %1763 }
 0x2c0   : > { %v3652_v15 = vpop.f32.mrf.mxu1 }
 0x2c1   : > { %v2001_v46 = vadd.f32 %v3651_v35, %v1729_v59 }
 0x2c2   : > { %v3653_v26 = vpop.f32.mrf.mxu1 }
 0x2c3   : > { %v3654_v21 = vadd.f32 %v3653_v26, %v3652_v15 }
 0x2c4   : > { %v3655_v27 = vpop.f32.mrf.mxu1 }
 0x2c5   : > { %v2006_v11 = vadd.f32 %v3654_v21, %v1734_v30  ;;  %v1769_v21 = vpop.permute.xlu1 %1768 }
 0x2c6   : > { %v3656_v31 = vpop.f32.mrf.mxu1 }
 0x2c7   : > { %v3852_v34 = vpop.f32.mrf.mxu0  ;;  %v3657_v36 = vadd.f32 %v3656_v31, %v3655_v27 }
 0x2c8   : > { %v3658_v12 = vpop.f32.mrf.mxu1  ;;  %v2103_v41 = vadd.f32 %v3852_v34, %v2006_v11 }
 0x2c9   : > { %v2094_v37 = vpop.f32.mrf.mxu0  ;;  %v2009_v39 = vadd.f32 %v3657_v36, %v1739_v40 }
 0x2ca   : > { %v3659_v38 = vpop.f32.mrf.mxu1  ;;  %v2095_v42 = vadd.f32 %v2094_v37, %v1998_v16  ;;  %v2159_v32 = vmax.f32 %v2103_v41, 0.0 }
 0x2cb   : > { %v3853_v44 = vpop.f32.mrf.mxu0  ;;  %v3660_v53 = vadd.f32 %v3659_v38, %v3658_v12  ;;  %v1774_v38 = vpop.permute.xlu0 %1773 }
 0x2cc   : > { %v3661_v45 = vpop.f32.mrf.mxu1  ;;  %v2157_v50 = vmax.f32 %v2095_v42, 0.0  ;;  %v2106_v47 = vadd.f32 %v3853_v44, %v2009_v39 }
 0x2cd   : > { %v2097_v51 = vpop.f32.mrf.mxu0  ;;  %v2014_v58 = vadd.f32 %v3660_v53, %v1744_v49  ;;  %v1779_v53 = vpop.permute.xlu1 %1778 }
 0x2ce   : > { %v3662_v48 = vpop.f32.mrf.mxu1  ;;  %v2098_v54 = vadd.f32 %v2097_v51, %v2001_v46  ;;  %3872 = vmatprep.mubr.msk.f32.mxu0 %vm2176_vm3, %v2157_v50  ;;  %v2160_v2 = vmax.f32 %v2106_v47, 0.0 }
 0x2cf   : > { %v3856_v55 = vpop.f32.mrf.mxu0  ;;  %v3663_v28 = vadd.f32 %v3662_v48, %v3661_v45 }
 0x2d0   : > { %v3664_v56 = vpop.f32.mrf.mxu1  ;;  %v2158_v57 = vmax.f32 %v2098_v54, 0.0 }
 0x2d1   : > { %v2110_v33 = vpop.f32.mrf.mxu0  ;;  %v2017_v6 = vadd.f32 %v3663_v28, %v1749_v43  ;;  %v1784_v43 = vpop.permute.xlu0 %1783 }
 0x2d2   : > { %v3665_v52 = vpop.f32.mrf.mxu1  ;;  %v2111_v62 = vadd.f32 %v2110_v33, %v2014_v58  ;;  %3873 = vmatmul.mubr.msk.f32.vlgmr.msra.gmra.mxu0 %vm2176_vm3, %v2158_v57 }
 0x2d3   : > { %v3666_v63 = vadd.f32 %v3665_v52, %v3664_v56  ;;  %v3857_v0 = vpop.f32.mrf.mxu0  ;;  %3875 = vmatprep.mubr.msk.f32.mxu0 %vm2176_vm3, %v2159_v32 }
 0x2d4   : > { %v3667_v1 = vpop.f32.mrf.mxu1  ;;  %v2161_v4 = vmax.f32 %v2111_v62, 0.0 }
 0x2d5   : > { %v2022_v5 = vadd.f32 %v3666_v63, %v1754_v60  ;;  %v2113_v7 = vpop.f32.mrf.mxu0  ;;  %v1789_v60 = vpop.permute.xlu1 %1788 }
 0x2d6   : > { %v3668_v8 = vpop.f32.mrf.mxu1  ;;  %v2114_v13 = vadd.f32 %v2113_v7, %v2017_v6  ;;  %3876 = vmatmul.mubr.msk.f32.gmra.mxu0 %vm2176_vm3, %v2160_v2  ;;  %v1794_v6 = vpop.permute.xlu0 %1793 }
 0x2d7   : > { %v2119_v10 = vadd.f32 %v3856_v55, %v2022_v5  ;;  %v3669_v14 = vadd.f32 %v3668_v8, %v3667_v1  ;;  %3878 = vmatprep.mubr.msk.f32.mxu0 %vm2176_vm3, %v2161_v4  ;;  %v3860_v3 = vpop.f32.mrf.mxu0 }
 0x2d8   : > { %v3670_v17 = vpop.f32.mrf.mxu1  ;;  %v2162_v19 = vmax.f32 %v2114_v13, 0.0 }
 0x2d9   : > { %v2163_v18 = vmax.f32 %v2119_v10, 0.0  ;;  %v2025_v20 = vadd.f32 %v3669_v14, %v1759_v9  ;;  %v2126_v24 = vpop.f32.mrf.mxu0 }
 0x2da   : > { %v3671_v23 = vpop.f32.mrf.mxu1  ;;  %3879 = vmatmul.mubr.msk.f32.gmra.mxu0 %vm2176_vm3, %v2162_v19 }
 0x2db   : > { %v2122_v25 = vadd.f32 %v3857_v0, %v2025_v20  ;;  %v3672_v15 = vadd.f32 %v3671_v23, %v3670_v17  ;;  %3881 = vmatprep.mubr.msk.f32.mxu0 %vm2176_vm3, %v2163_v18  ;;  %v3861_v26 = vpop.f32.mrf.mxu0  ;;  %v1799_v17 = vpop.permute.xlu1 %1798  ;;  %v2721_v23 = vld [vmem:[%s5351_s10] sm:$0x3] }
 0x2dc   : > { %v3673_v22 = vpop.f32.mrf.mxu1  ;;  %3957 = vmatprep.subr.msk.mxu0 %vm2770_vm4, %v2721_v23 }
 0x2dd   : > { %v2164_v27 = vmax.f32 %v2122_v25, 0.0  ;;  %v2030_v29 = vadd.f32 %v3672_v15, %v1764_v61  ;;  %v2129_v12 = vpop.f32.mrf.mxu0  ;;  %3958 = vmatpush3.msk.msra.mxu0 %vm2770_vm4, %v2721_v23 }
 0x2de   : > { %v3674_v30 = vpop.f32.mrf.mxu1 }
 0x2df   : > { %v2127_v31 = vadd.f32 %v2126_v24, %v2030_v29  ;;  %v3675_v59 = vadd.f32 %v3674_v30, %v3673_v22  ;;  %3882 = vmatmul.mubr.msk.f32.gmra.mxu0 %vm2176_vm3, %v2164_v27  ;;  %v3864_v45 = vpop.f32.mrf.mxu0  ;;  %v4173_v24 = vmov 0.0  }
 0x2e0   : > { %v3676_v34 = vpop.f32.mrf.mxu1  ;;  %3896 = vmatprep.subr.mxu1 %v4173_v24  ;;  %3928 = vmatprep.mubr.msk.f32.mxu1 %vm4174_vm6, %v4173_v24 }
 0x2e1   : > { %v2165_v16 = vmax.f32 %v2127_v31, 0.0  ;;  %v2033_v35 = vadd.f32 %v3675_v59, %v1769_v21  ;;  %v2142_v48 = vpop.f32.mrf.mxu0 }
 0x2e2   : > { %v3677_v36 = vpop.f32.mrf.mxu1 }
 0x2e3   : > { %v2130_v11 = vadd.f32 %v2129_v12, %v2033_v35  ;;  %v3678_v37 = vadd.f32 %v3677_v36, %v3676_v34  ;;  %3884 = vmatprep.mubr.msk.f32.mxu0 %vm2176_vm3, %v2165_v16  ;;  %v3865_v58 = vpop.f32.mrf.mxu0 }
 0x2e4   : > { %v3679_v40 = vpop.f32.mrf.mxu1 }
 0x2e5   : > { %v2166_v42 = vmax.f32 %v2130_v11, 0.0  ;;  %v2038_v44 = vadd.f32 %v3678_v37, %v1774_v38  ;;  %v2145_v1 = vpop.f32.mrf.mxu0 }
 0x2e6   : > { %v3680_v46 = vpop.f32.mrf.mxu1 }
 0x2e7   : > { %v2135_v49 = vadd.f32 %v3860_v3, %v2038_v44  ;;  %v3681_v50 = vadd.f32 %v3680_v46, %v3679_v40  ;;  %3885 = vmatmul.mubr.msk.f32.gmra.mxu0 %vm2176_vm3, %v2166_v42 }
 0x2e8   : > { %v3682_v39 = vpop.f32.mrf.mxu1 }
 0x2e9   : > { %v2167_v41 = vmax.f32 %v2135_v49, 0.0  ;;  %v2041_v51 = vadd.f32 %v3681_v50, %v1779_v53 }
 0x2ea   : > { %v3683_v54 = vpop.f32.mrf.mxu1 }
 0x2eb   : > { %v2138_v55 = vadd.f32 %v3861_v26, %v2041_v51  ;;  %v3684_v56 = vadd.f32 %v3683_v54, %v3682_v39  ;;  %3887 = vmatprep.mubr.msk.f32.mxu0 %vm2176_vm3, %v2167_v41 }
 0x2ec   : > { %v3685_v47 = vpop.f32.mrf.mxu1 }
 0x2ed   : > { %v2168_v57 = vmax.f32 %v2138_v55, 0.0  ;;  %v2046_v28 = vadd.f32 %v3684_v56, %v1784_v43 }
 0x2ee   : > { %v3686_v32 = vpop.f32.mrf.mxu1 }
 0x2ef   : > { %v2143_v33 = vadd.f32 %v2142_v48, %v2046_v28  ;;  %v3687_v52 = vadd.f32 %v3686_v32, %v3685_v47  ;;  %3888 = vmatmul.mubr.msk.f32.gmra.mxu0 %vm2176_vm3, %v2168_v57 }
 0x2f0   : > { %v3688_v62 = vpop.f32.mrf.mxu1 }
 0x2f1   : > { %v2169_v63 = vmax.f32 %v2143_v33, 0.0  ;;  %v2049_v0 = vadd.f32 %v3687_v52, %v1789_v60 }
 0x2f2   : > { %v3689_v2 = vpop.f32.mrf.mxu1 }
 0x2f3   : > { %v2146_v4 = vadd.f32 %v2145_v1, %v2049_v0  ;;  %v3690_v5 = vadd.f32 %v3689_v2, %v3688_v62  ;;  %3890 = vmatprep.mubr.msk.f32.mxu0 %vm2176_vm3, %v2169_v63 }
 0x2f4   : > { %v3691_v7 = vpop.f32.mrf.mxu1 }
 0x2f5   : > { %v2170_v8 = vmax.f32 %v2146_v4, 0.0  ;;  %v2054_v9 = vadd.f32 %v3690_v5, %v1794_v6 }
 0x2f6   : > { %v3692_v10 = vpop.f32.mrf.mxu1 }
 0x2f7   : > { %v2151_v13 = vadd.f32 %v3864_v45, %v2054_v9  ;;  %v3693_v14 = vadd.f32 %v3692_v10, %v3691_v7  ;;  %3891 = vmatmul.mubr.msk.f32.gmra.mxu0 %vm2176_vm3, %v2170_v8 }
 0x2f9   : > { %v2171_v3 = vmax.f32 %v2151_v13, 0.0  ;;  %v2057_v18 = vadd.f32 %v3693_v14, %v1799_v17 }
 0x2fb   : > { %v2154_v19 = vadd.f32 %v3865_v58, %v2057_v18  ;;  %3893 = vmatprep.mubr.msk.f32.mxu0 %vm2176_vm3, %v2171_v3 }
 0x2fd   : > { %v2172_v20 = vmax.f32 %v2154_v19, 0.0 }
 0x2ff   : > { %3894 = vmatmul.mubr.msk.f32.gmra.mxu0 %vm2176_vm3, %v2172_v20 }
 0x392   : > { %v4922_v61 = vpop.f32.mrf.mxu0 }
 0x393   : > { %3108 = vst.msk [vmem:[%s4920_s24 + $0x8] sm:$0xff] %vm2389_vm5, %v4922_v61  ;;  %v2374_v52 = vmul.f32 %v4922_v61, %v4922_v61 }
 0x394   : > { %v4927_v25 = vpop.f32.mrf.mxu0 }
 0x395   : > { %3107 = vst.msk [vmem:[%s4920_s24] sm:$0xff] %vm2389_vm5, %v4927_v25  ;;  %3959 = vmatprep.mubr.msk.f32.mxu0 %vm2389_vm5, %v4927_v25  ;;  %v2393_v63 = vsel %vm2389_vm5, %v2374_v52, 0.0  ;;  %v2373_v1 = vmul.f32 %v4927_v25, %v4927_v25  ;;  %v2933_v52 = vld [vmem:[%s5352_s11 + $0x70] sm:$0xff] }
 0x396   : > { %v4934_v15 = vpop.f32.mrf.mxu0  ;;  %3960 = vmatmul.mubr.msk.f32.vlgmr.msra.gmra.mxu0 %vm2389_vm5, %v4922_v61 }
 0x397   : > { %3110 = vst.msk [vmem:[%s4920_s24 + $0x18] sm:$0xff] %vm2389_vm5, %v4934_v15  ;;  %v2376_v28 = vmul.f32 %v4934_v15, %v4934_v15  ;;  %v2390_v2 = vsel %vm2389_vm5, %v2373_v1, 0.0  ;;  %v2514_v1 = vld [vmem:[%s5350_s9 + $0x18] sm:$0xff] }
 0x398   : > { %v4941_v22 = vpop.f32.mrf.mxu0 }
 0x399   : > { %3109 = vst.msk [vmem:[%s4920_s24 + $0x10] sm:$0xff] %vm2389_vm5, %v4941_v22  ;;  %3962 = vmatprep.mubr.msk.f32.mxu0 %vm2389_vm5, %v4941_v22  ;;  %v2399_v33 = vsel %vm2389_vm5, %v2376_v28, 0.0  ;;  %v2375_v62 = vmul.f32 %v4941_v22, %v4941_v22  ;;  %v2934_v28 = vld [vmem:[%s5352_s11 + $0x78] sm:$0xff] }
 0x39a   : > { %v4948_v26 = vpop.f32.mrf.mxu0  ;;  %3963 = vmatmul.mubr.msk.f32.gmra.mxu0 %vm2389_vm5, %v4934_v15 }
 0x39b   : > { %3112 = vst.msk [vmem:[%s4920_s24 + $0x28] sm:$0xff] %vm2389_vm5, %v4948_v26  ;;  %v2378_v56 = vmul.f32 %v4948_v26, %v4948_v26  ;;  %v2396_v0 = vsel %vm2389_vm5, %v2375_v62, 0.0 }
 0x39c   : > { %v4955_v27 = vpop.f32.mrf.mxu0 }
 0x39d   : > { %3111 = vst.msk [vmem:[%s4920_s24 + $0x20] sm:$0xff] %vm2389_vm5, %v4955_v27  ;;  %3965 = vmatprep.mubr.msk.f32.mxu0 %vm2389_vm5, %v4955_v27  ;;  %v2405_v57 = vsel %vm2389_vm5, %v2378_v56, 0.0  ;;  %v2377_v32 = vmul.f32 %v4955_v27, %v4955_v27 }
 0x39e   : > { %3966 = vmatmul.mubr.msk.f32.gmra.mxu0 %vm2389_vm5, %v4948_v26 }
 0x39f   : > { %v4964_v29 = vpop.f32.mrf.mxu0  ;;  %v2402_v60 = vsel %vm2389_vm5, %v2377_v32, 0.0  ;;  %v2512_v32 = vld [vmem:[%s5350_s9 + $0x8] sm:$0xff] }
 0x3a0   : > { %3114 = vst.msk [vmem:[%s4920_s24 + $0x38] sm:$0xff] %vm2389_vm5, %v4964_v29  ;;  %v2380_v51 = vmul.f32 %v4964_v29, %v4964_v29 }
 0x3a1   : > { %v4969_v30 = vpop.f32.mrf.mxu0 }
 0x3a2   : > { %3113 = vst.msk [vmem:[%s4920_s24 + $0x30] sm:$0xff] %vm2389_vm5, %v4969_v30  ;;  %3968 = vmatprep.mubr.msk.f32.mxu0 %vm2389_vm5, %v4969_v30  ;;  %v2411_v55 = vsel %vm2389_vm5, %v2380_v51, 0.0  ;;  %v2379_v47 = vmul.f32 %v4969_v30, %v4969_v30 }
 0x3a3   : > { %3969 = vmatmul.mubr.msk.f32.gmra.mxu0 %vm2389_vm5, %v4964_v29 }
 0x3a4   : > { %v2408_v58 = vsel %vm2389_vm5, %v2379_v47, 0.0 }
 0x3a7   : > { %v4978_v21 = vpop.f32.mrf.mxu0 }
 0x3a8   : > { %3116 = vst.msk [vmem:[%s4920_s24 + $0x48] sm:$0xff] %vm2389_vm5, %v4978_v21  ;;  %v2382_v50 = vmul.f32 %v4978_v21, %v4978_v21 }
 0x3a9   : > { %v4983_v31 = vpop.f32.mrf.mxu0 }
 0x3aa   : > { %3115 = vst.msk [vmem:[%s4920_s24 + $0x40] sm:$0xff] %vm2389_vm5, %v4983_v31  ;;  %3971 = vmatprep.mubr.msk.f32.mxu0 %vm2389_vm5, %v4983_v31  ;;  %v2417_v41 = vsel %vm2389_vm5, %v2382_v50, 0.0  ;;  %v2381_v54 = vmul.f32 %v4983_v31, %v4983_v31 }
 0x3ab   : > { %3972 = vmatmul.mubr.msk.f32.gmra.mxu0 %vm2389_vm5, %v4978_v21 }
 0x3ac   : > { %v2414_v43 = vsel %vm2389_vm5, %v2381_v54, 0.0 }
 0x3af   : > { %v4992_v59 = vpop.f32.mrf.mxu0 }
 0x3b0   : > { %3118 = vst.msk [vmem:[%s4920_s24 + $0x58] sm:$0xff] %vm2389_vm5, %v4992_v59  ;;  %v2384_v44 = vmul.f32 %v4992_v59, %v4992_v59 }
 0x3b1   : > { %v4997_v34 = vpop.f32.mrf.mxu0 }
 0x3b2   : > { %3117 = vst.msk [vmem:[%s4920_s24 + $0x50] sm:$0xff] %vm2389_vm5, %v4997_v34  ;;  %3974 = vmatprep.mubr.msk.f32.mxu0 %vm2389_vm5, %v4997_v34  ;;  %v2423_v49 = vsel %vm2389_vm5, %v2384_v44, 0.0  ;;  %v2383_v39 = vmul.f32 %v4997_v34, %v4997_v34 }
 0x3b3   : > { %3975 = vmatmul.mubr.msk.f32.gmra.mxu0 %vm2389_vm5, %v4992_v59 }
 0x3b4   : > { %v2420_v48 = vsel %vm2389_vm5, %v2383_v39, 0.0 }
 0x3b7   : > { %v5006_v12 = vpop.f32.mrf.mxu0 }
 0x3b8   : > { %3120 = vst.msk [vmem:[%s4920_s24 + $0x68] sm:$0xff] %vm2389_vm5, %v5006_v12  ;;  %v2386_v40 = vmul.f32 %v5006_v12, %v5006_v12 }
 0x3b9   : > { %v5011_v16 = vpop.f32.mrf.mxu0 }
 0x3ba   : > { %3119 = vst.msk [vmem:[%s4920_s24 + $0x60] sm:$0xff] %vm2389_vm5, %v5011_v16  ;;  %3977 = vmatprep.mubr.msk.f32.mxu0 %vm2389_vm5, %v5011_v16  ;;  %v2429_v45 = vsel %vm2389_vm5, %v2386_v40, 0.0  ;;  %v2385_v46 = vmul.f32 %v5011_v16, %v5011_v16 }
 0x3bb   : > { %3978 = vmatmul.mubr.msk.f32.gmra.mxu0 %vm2389_vm5, %v5006_v12 }
 0x3bc   : > { %v2426_v53 = vsel %vm2389_vm5, %v2385_v46, 0.0 }
 0x3bf   : > { %v5020_v35 = vpop.f32.mrf.mxu0 }
 0x3c0   : > { %3122 = vst.msk [vmem:[%s4920_s24 + $0x78] sm:$0xff] %vm2389_vm5, %v5020_v35  ;;  %v2388_v36 = vmul.f32 %v5020_v35, %v5020_v35 }
 0x3c1   : > { %v5027_v11 = vpop.f32.mrf.mxu0 }
 0x3c2   : > { %3121 = vst.msk [vmem:[%s4920_s24 + $0x70] sm:$0xff] %vm2389_vm5, %v5027_v11  ;;  %3980 = vmatprep.mubr.msk.f32.mxu0 %vm2389_vm5, %v5027_v11  ;;  %v2435_v37 = vsel %vm2389_vm5, %v2388_v36, 0.0  ;;  %v2387_v38 = vmul.f32 %v5027_v11, %v5027_v11  ;;  %v5101_v36 = vld [vmem:[%s5349_s8] sm:$0xff] }
 0x3c3   : > { %2436 = vadd.xlane.f32.xlu0 %v2435_v37  ;;  %3981 = vmatmul.mubr.msk.f32.gmra.mxu0 %vm2389_vm5, %v5020_v35 }
 0x3c4   : > { %v2432_v42 = vsel %vm2389_vm5, %v2387_v38, 0.0  ;;  %v2511_v38 = vld [vmem:[%s5350_s9] sm:$0xff] }
 0x3c5   : > { %2433 = vadd.xlane.f32.xlu1 %v2432_v42 }
 0x3c7   : > { %2430 = vadd.xlane.f32.xlu0 %v2429_v45 }
 0x3c9   : > { %2424 = vadd.xlane.f32.xlu1 %v2423_v49 }
 0x3cb   : > { %2427 = vadd.xlane.f32.xlu0 %v2426_v53 }
 0x3cd   : > { %2418 = vadd.xlane.f32.xlu1 %v2417_v41 }
 0x3cf   : > { %2421 = vadd.xlane.f32.xlu0 %v2420_v48 }
 0x3d1   : > { %2412 = vadd.xlane.f32.xlu1 %v2411_v55 }
 0x3d3   : > { %2415 = vadd.xlane.f32.xlu0 %v2414_v43 }
 0x3d5   : > { %2406 = vadd.xlane.f32.xlu1 %v2405_v57 }
 0x3d7   : > { %2409 = vadd.xlane.f32.xlu0 %v2408_v58 }
 0x3d9   : > { %2400 = vadd.xlane.f32.xlu1 %v2399_v33 }
 0x3db   : > { %2403 = vadd.xlane.f32.xlu0 %v2402_v60  ;;  %v2513_v60 = vld [vmem:[%s5350_s9 + $0x10] sm:$0xff] }
 0x3dd   : > { %2394 = vadd.xlane.f32.xlu1 %v2393_v63  ;;  %v2932_v63 = vld [vmem:[%s5352_s11 + $0x68] sm:$0xff] }
 0x3df   : > { %2397 = vadd.xlane.f32.xlu0 %v2396_v0 }
 0x3e3   : > { %2391 = vadd.xlane.f32.xlu0 %v2390_v2  ;;  %v2931_v2 = vld [vmem:[%s5352_s11 + $0x60] sm:$0xff] }
 0x44c   : > { %v2437_v4 = vpop.xlane.xlu0 %2436 }
 0x44d   : > { %3897 = vmatpush3.msra.mxu1 %v2437_v4  ;;  %v2515_v4 = vld [vmem:[%s5350_s9 + $0x20] sm:$0xff] }
 0x44e   : > { %3898 = vmatprep.subr.mxu1 %v4173_v24  ;;  %v2434_v5 = vpop.xlane.xlu1 %2433 }
 0x44f   : > { %3899 = vmatpush3.msra.mxu1 %v2434_v5 }
 0x450   : > { %v2431_v6 = vpop.xlane.xlu0 %2430  ;;  %3900 = vmatprep.subr.mxu1 %v4173_v24 }
 0x451   : > { %3901 = vmatpush3.msra.mxu1 %v2431_v6  ;;  %v2930_v6 = vld [vmem:[%s5352_s11 + $0x58] sm:$0xff] }
 0x452   : > { %v2425_v7 = vpop.xlane.xlu1 %2424  ;;  %3902 = vmatprep.subr.mxu1 %v4173_v24 }
 0x454   : > { %v2428_v8 = vpop.xlane.xlu0 %2427 }
 0x455   : > { %3903 = vmatpush3.msra.mxu1 %v2428_v8  ;;  %v2516_v8 = vld [vmem:[%s5350_s9 + $0x28] sm:$0xff] }
 0x456   : > { %3904 = vmatprep.subr.mxu1 %v4173_v24  ;;  %v2419_v9 = vpop.xlane.xlu1 %2418  ;;  %v5109_v40 = vpop.f32.mrf.mxu0 }
 0x457   : > { %3905 = vmatpush3.msra.mxu1 %v2425_v7 }
 0x458   : > { %v2422_v10 = vpop.xlane.xlu0 %2421  ;;  %3906 = vmatprep.subr.mxu1 %v4173_v24  ;;  %v5111_v42 = vpop.f32.mrf.mxu0 }
 0x459   : > { %3907 = vmatpush3.msra.mxu1 %v2422_v10  ;;  %v2517_v10 = vld [vmem:[%s5350_s9 + $0x30] sm:$0xff] }
 0x45a   : > { %3908 = vmatprep.subr.mxu1 %v4173_v24  ;;  %v2413_v13 = vpop.xlane.xlu1 %2412  ;;  %v5113_v44 = vpop.f32.mrf.mxu0 }
 0x45b   : > { %3909 = vmatpush3.msra.mxu1 %v2419_v9  ;;  %v2929_v9 = vld [vmem:[%s5352_s11 + $0x50] sm:$0xff] }
 0x45c   : > { %v2416_v14 = vpop.xlane.xlu0 %2415  ;;  %3910 = vmatprep.subr.mxu1 %v4173_v24  ;;  %v5115_v45 = vpop.f32.mrf.mxu0 }
 0x45d   : > { %3911 = vmatpush3.msra.mxu1 %v2416_v14  ;;  %v2928_v14 = vld [vmem:[%s5352_s11 + $0x48] sm:$0xff] }
 0x45e   : > { %3912 = vmatprep.subr.mxu1 %v4173_v24  ;;  %v2407_v17 = vpop.xlane.xlu1 %2406  ;;  %v5117_v46 = vpop.f32.mrf.mxu0 }
 0x45f   : > { %3913 = vmatpush3.msra.mxu1 %v2413_v13 }
 0x460   : > { %v2410_v3 = vpop.xlane.xlu0 %2409  ;;  %3914 = vmatprep.subr.mxu1 %v4173_v24  ;;  %v5119_v49 = vpop.f32.mrf.mxu0 }
 0x461   : > { %3915 = vmatpush3.msra.mxu1 %v2410_v3  ;;  %v2518_v3 = vld [vmem:[%s5350_s9 + $0x38] sm:$0xff] }
 0x462   : > { %3916 = vmatprep.subr.mxu1 %v4173_v24  ;;  %v2401_v18 = vpop.xlane.xlu1 %2400 }
 0x463   : > { %3917 = vmatpush3.msra.mxu1 %v2407_v17  ;;  %v5121_v50 = vpop.f32.mrf.mxu0 }
 0x464   : > { %v2404_v19 = vpop.xlane.xlu0 %2403  ;;  %3918 = vmatprep.subr.mxu1 %v4173_v24 }
 0x465   : > { %3919 = vmatpush3.msra.mxu1 %v2404_v19  ;;  %v5123_v53 = vpop.f32.mrf.mxu0  ;;  %v2519_v19 = vld [vmem:[%s5350_s9 + $0x40] sm:$0xff] }
 0x466   : > { %3920 = vmatprep.subr.mxu1 %v4173_v24  ;;  %v2395_v23 = vpop.xlane.xlu1 %2394 }
 0x467   : > { %3921 = vmatpush3.msra.mxu1 %v2401_v18  ;;  %v2927_v18 = vld [vmem:[%s5352_s11 + $0x40] sm:$0xff] }
 0x468   : > { %v2398_v20 = vpop.xlane.xlu0 %2397  ;;  %3922 = vmatprep.subr.mxu1 %v4173_v24 }
 0x469   : > { %3923 = vmatpush3.msra.mxu1 %v2398_v20 }
 0x46a   : > { %3924 = vmatprep.subr.mxu1 %v4173_v24 }
 0x46b   : > { %3925 = vmatpush3.msra.mxu1 %v2395_v23  ;;  %v3973_v39 = vpop.f32.mrf.mxu0  ;;  %v2926_v23 = vld [vmem:[%s5352_s11 + $0x38] sm:$0xff] }
 0x46c   : > { %v2392_v37 = vpop.xlane.xlu0 %2391  ;;  %3926 = vmatprep.subr.mxu1 %v4173_v24  ;;  %v2944_v20 = vmul.f32 %v3973_v39, %v2928_v14  ;;  %v2925_v39 = vld [vmem:[%s5352_s11 + $0x30] sm:$0xff] }
 0x46d   : > { %3927 = vmatpush3.msra.mxu1 %v2392_v37  ;;  %v2880_v41 = vpop.f32.mrf.mxu0 }
 0x46e   : > { %3929 = vmatmul.mubr.f32.vlgmr.msra.gmra.mxu1 %v5101_v36  ;;  %v2943_v37 = vmul.f32 %v2927_v18, %v2880_v41  ;;  %v2924_v41 = vld [vmem:[%s5352_s11 + $0x28] sm:$0xff] }
 0x46f   : > { %3933 = vmatprep.mubr.msk.f32.mxu1 %vm2527_vm7, %v2511_v38  ;;  %v2520_v38 = vld [vmem:[%s5350_s9 + $0x48] sm:$0xff] }
 0x473   : > { %v3976_v48 = vpop.f32.mrf.mxu0 }
 0x474   : > { %v2946_v13 = vmul.f32 %v3976_v48, %v2930_v6  ;;  %v2942_v48 = vmul.f32 %v5121_v50, %v2926_v23  ;;  %v2923_v50 = vld [vmem:[%s5352_s11 + $0x20] sm:$0xff] }
 0x475   : > { %v2890_v56 = vpop.f32.mrf.mxu0 }
 0x476   : > { %v2945_v17 = vmul.f32 %v2929_v9, %v2890_v56  ;;  %v2523_v56 = vld [vmem:[%s5350_s9 + $0x60] sm:$0xff] }
 0x47b   : > { %v3979_v43 = vpop.f32.mrf.mxu0 }
 0x47c   : > { %v2948_v5 = vmul.f32 %v3979_v43, %v2932_v63  ;;  %v2940_v43 = vmul.f32 %v5117_v46, %v2924_v41  ;;  %v2921_v46 = vld [vmem:[%s5352_s11 + $0x10] sm:$0xff] }
 0x47d   : > { %v2900_v47 = vpop.f32.mrf.mxu0 }
 0x47e   : > { %v2947_v7 = vmul.f32 %v2931_v2, %v2900_v47  ;;  %v2939_v47 = vmul.f32 %v2923_v50, %v5119_v49  ;;  %v2920_v49 = vld [vmem:[%s5352_s11 + $0x8] sm:$0xff] }
 0x483   : > { %v3982_v57 = vpop.f32.mrf.mxu0 }
 0x484   : > { %v2950_v62 = vmul.f32 %v3982_v57, %v2934_v28  ;;  %v2524_v57 = vld [vmem:[%s5350_s9 + $0x68] sm:$0xff]  ;;  %v2525_v28 = vld [vmem:[%s5350_s9 + $0x70] sm:$0xff] }
 0x485   : > { %v2910_v33 = vpop.f32.mrf.mxu0 }
 0x486   : > { %v2949_v0 = vmul.f32 %v2933_v52, %v2910_v33  ;;  %v2526_v33 = vld [vmem:[%s5350_s9 + $0x78] sm:$0xff]  ;;  %v2936_v52 = vmul.f32 %v5109_v40, %v2920_v49  ;;  %v3021_v40 = vld [vmem:[%s5353_s12] sm:$0x3f] }
 0x52e   : > { %v2505_v51 = vpop.f32.mrf.mxu1 }
 0x52f   : > { %v2509_v54 = vmax.f32 %v2505_v51, 1e-24  ;;  %v2521_v51 = vld [vmem:[%s5350_s9 + $0x50] sm:$0xff] }
 0x530   : > { %v3930_v55 = vpop.f32.mrf.mxu1 }
 0x531   : > { %4162 = vrsqrt.f32 %v2509_v54  ;;  %v2941_v54 = vmul.f32 %v2925_v39, %v5123_v53  ;;  %v2522_v55 = vld [vmem:[%s5350_s9 + $0x58] sm:$0xff] }
 0x532   : > { %v2922_v53 = vld [vmem:[%s5352_s11 + $0x18] sm:$0xff] }
 0x53e   : > { %v4163_v58 = vpop.eup %4162 }
 0x53f   : > { %3931 = vmatprep.subr.mxu1 %v4163_v58 }
 0x540   : > { %3932 = vmatpush3.msra.mxu1 %v4163_v58  ;;  %v2938_v58 = vmul.f32 %v5113_v44, %v2922_v53  ;;  %v2919_v44 = vld [vmem:[%s5352_s11] sm:$0xff] }
 0x541   : > { %3934 = vmatmul.mubr.msk.f32.vlgmr.msra.gmra.mxu1 %vm2527_vm7, %v2512_v32  ;;  %3983 = vmatprep.subr.mxu1 %v4173_v24  ;;  %v2937_v32 = vmul.f32 %v2921_v46, %v5115_v45  ;;  %v2935_v45 = vmul.f32 %v2919_v44, %v5111_v42 }
 0x542   : > { %3984 = vmatpush3.msra.mxu1 %v2950_v62  ;;  %3936 = vmatprep.mubr.msk.f32.mxu1 %vm2527_vm7, %v2513_v60 }
 0x543   : > { %3985 = vmatprep.subr.mxu1 %v4173_v24 }
 0x544   : > { %3986 = vmatpush3.msra.mxu1 %v2949_v0 }
 0x545   : > { %3937 = vmatmul.mubr.msk.f32.gmra.mxu1 %vm2527_vm7, %v2514_v1  ;;  %3987 = vmatprep.subr.mxu1 %v4173_v24 }
 0x546   : > { %3988 = vmatpush3.msra.mxu1 %v2948_v5  ;;  %3939 = vmatprep.mubr.msk.f32.mxu1 %vm2527_vm7, %v2515_v4 }
 0x547   : > { %3989 = vmatprep.subr.mxu1 %v4173_v24 }
 0x548   : > { %3990 = vmatpush3.msra.mxu1 %v2947_v7 }
 0x549   : > { %3940 = vmatmul.mubr.msk.f32.gmra.mxu1 %vm2527_vm7, %v2516_v8  ;;  %3991 = vmatprep.subr.mxu1 %v4173_v24 }
 0x54a   : > { %3992 = vmatpush3.msra.mxu1 %v2946_v13  ;;  %3942 = vmatprep.mubr.msk.f32.mxu1 %vm2527_vm7, %v2517_v10 }
 0x54b   : > { %3993 = vmatprep.subr.mxu1 %v4173_v24 }
 0x54c   : > { %3994 = vmatpush3.msra.mxu1 %v2945_v17 }
 0x54d   : > { %3943 = vmatmul.mubr.msk.f32.gmra.mxu1 %vm2527_vm7, %v2518_v3  ;;  %3995 = vmatprep.subr.mxu1 %v4173_v24 }
 0x54e   : > { %3996 = vmatpush3.msra.mxu1 %v2944_v20  ;;  %3945 = vmatprep.mubr.msk.f32.mxu1 %vm2527_vm7, %v2519_v19 }
 0x54f   : > { %3997 = vmatprep.subr.mxu1 %v4173_v24 }
 0x550   : > { %3998 = vmatpush3.msra.mxu1 %v2943_v37 }
 0x551   : > { %3946 = vmatmul.mubr.msk.f32.gmra.mxu1 %vm2527_vm7, %v2520_v38  ;;  %3999 = vmatprep.subr.mxu1 %v4173_v24 }
 0x552   : > { %4000 = vmatpush3.msra.mxu1 %v2942_v48  ;;  %3948 = vmatprep.mubr.msk.f32.mxu1 %vm2527_vm7, %v2521_v51 }
 0x553   : > { %4001 = vmatprep.subr.mxu1 %v4173_v24 }
 0x554   : > { %4002 = vmatpush3.msra.mxu1 %v2941_v54 }
 0x555   : > { %3949 = vmatmul.mubr.msk.f32.gmra.mxu1 %vm2527_vm7, %v2522_v55  ;;  %4003 = vmatprep.subr.mxu1 %v4173_v24 }
 0x556   : > { %4004 = vmatpush3.msra.mxu1 %v2940_v43  ;;  %3951 = vmatprep.mubr.msk.f32.mxu1 %vm2527_vm7, %v2523_v56 }
 0x557   : > { %4005 = vmatprep.subr.mxu1 %v4173_v24 }
 0x558   : > { %4006 = vmatpush3.msra.mxu1 %v2939_v47 }
 0x559   : > { %3952 = vmatmul.mubr.msk.f32.gmra.mxu1 %vm2527_vm7, %v2524_v57  ;;  %4007 = vmatprep.subr.mxu1 %v4173_v24 }
 0x55a   : > { %4008 = vmatpush3.msra.mxu1 %v2938_v58  ;;  %3954 = vmatprep.mubr.msk.f32.mxu1 %vm2527_vm7, %v2525_v28 }
 0x55b   : > { %4009 = vmatprep.subr.mxu1 %v4173_v24 }
 0x55c   : > { %4010 = vmatpush3.msra.mxu1 %v2937_v32 }
 0x55d   : > { %3955 = vmatmul.mubr.msk.f32.gmra.mxu1 %vm2527_vm7, %v2526_v33  ;;  %4011 = vmatprep.subr.mxu1 %v4173_v24 }
 0x55e   : > { %4012 = vmatpush3.msra.mxu1 %v2936_v52  ;;  %4015 = vmatprep.mubr.msk.f32.mxu1 %vm4174_vm6, %v4173_v24 }
 0x55f   : > { %4013 = vmatprep.subr.mxu1 %v4173_v24 }
 0x560   : > { %4014 = vmatpush3.msra.mxu1 %v2935_v45 }
 0x561   : > { %4016 = vmatmul.mubr.f32.vlgmr.msra.gmra.mxu1 %v5101_v36  ;;  %4018 = vmatprep.subr.mxu1 %v4173_v24 }
 0x562   : > { %4020 = vmatprep.mubr.msk.f32.mxu1 %vm4174_vm6, %v4173_v24  ;;  %4019 = vmatpush3.msk.msra.mxu1 %vm3033_vm8, %v3021_v40 }
 0x601   : > { %v3935_v42 = vpop.f32.mrf.mxu1 }
 0x602   : > { %3130 = vperm.xlu0 %4038, %v3935_v42  }
 0x603   : > { %v2642_v60 = vpop.f32.mrf.mxu1 }
 0x604   : > { %3125 = vperm.xlu1 %4039, %v2642_v60  }
 0x605   : > { %v3938_v62 = vpop.f32.mrf.mxu1 }
 0x607   : > { %v2652_v63 = vpop.f32.mrf.mxu1 }
 0x608   : > { %3140 = vperm.xlu1 %4039, %v3938_v62  }
 0x609   : > { %v3941_v0 = vpop.f32.mrf.mxu1 }
 0x60b   : > { %v2662_v36 = vpop.f32.mrf.mxu1 }
 0x60c   : > { %3135 = vperm.xlu1 %4039, %v2652_v63   ;;  %3145 = vperm.xlu0 %4038, %v2662_v36  }
 0x60d   : > { %v3944_v1 = vpop.f32.mrf.mxu1 }
 0x60f   : > { %v2672_v2 = vpop.f32.mrf.mxu1 }
 0x610   : > { %3150 = vperm.xlu1 %4039, %v3941_v0   ;;  %3155 = vperm.xlu0 %4038, %v2672_v2  }
 0x611   : > { %v3947_v24 = vpop.f32.mrf.mxu1 }
 0x613   : > { %v2682_v4 = vpop.f32.mrf.mxu1 }
 0x614   : > { %3160 = vperm.xlu1 %4039, %v3944_v1   ;;  %3165 = vperm.xlu0 %4038, %v2682_v4  }
 0x615   : > { %v3950_v5 = vpop.f32.mrf.mxu1 }
 0x617   : > { %v2692_v6 = vpop.f32.mrf.mxu1 }
 0x618   : > { %3170 = vperm.xlu1 %4039, %v3947_v24   ;;  %3175 = vperm.xlu0 %4038, %v2692_v6  }
 0x619   : > { %v3953_v7 = vpop.f32.mrf.mxu1 }
 0x61b   : > { %v2702_v8 = vpop.f32.mrf.mxu1 }
 0x61c   : > { %3180 = vperm.xlu1 %4039, %v3950_v5   ;;  %3185 = vperm.xlu0 %4038, %v2702_v8  }
 0x61d   : > { %v3956_v9 = vpop.f32.mrf.mxu1 }
 0x61f   : > { %v2712_v10 = vpop.f32.mrf.mxu1 }
 0x620   : > { %3190 = vperm.xlu1 %4039, %v3953_v7   ;;  %3195 = vperm.xlu0 %4038, %v2712_v10  }
 0x621   : > { %v3017_v13 = vpop.f32.mrf.mxu1 }
 0x622   : > { %4021 = vmatmul.mubr.msk.f32.vlgmr.msra.gmra.mxu1 %vm3029_vm9, %v3017_v13 }
 0x623   : > { %v4017_v14 = vpop.f32.mrf.mxu1 }
 0x624   : > { %3200 = vperm.xlu1 %4039, %v3956_v9  }
 0x67d   : > { %v3131_v17 = vpop.permute.xlu0 %3130 }
 0x67e   : > { %v3204_v3 = vmul.f32 %v4922_v61, %v3131_v17 }
 0x67f   : > { %v3126_v18 = vpop.permute.xlu1 %3125 }
 0x680   : > { %v3203_v19 = vmul.f32 %v3126_v18, %v4927_v25  ;;  %3237 = vrot.lane.b32.xlu1 %v3204_v3, %s4175_s23 }
 0x682   : > { %3235 = vrot.lane.b32.xlu0 %v3203_v19, %s4175_s23 }
 0x683   : > { %v3141_v20 = vpop.permute.xlu1 %3140 }
 0x684   : > { %v3206_v23 = vmul.f32 %v4934_v15, %v3141_v20 }
 0x686   : > { %3241 = vrot.lane.b32.xlu1 %v3206_v23, %s4175_s23 }
 0x687   : > { %v3136_v37 = vpop.permute.xlu1 %3135  ;;  %v3146_v38 = vpop.permute.xlu0 %3145 }
 0x688   : > { %v3205_v39 = vmul.f32 %v3136_v37, %v4941_v22  ;;  %v3207_v25 = vmul.f32 %v3146_v38, %v4955_v27 }
 0x68a   : > { %3239 = vrot.lane.b32.xlu0 %v3205_v39, %s4175_s23 }
 0x68b   : > { %v3151_v61 = vpop.permute.xlu1 %3150  ;;  %v3156_v51 = vpop.permute.xlu0 %3155 }
 0x68c   : > { %v3208_v48 = vmul.f32 %v4948_v26, %v3151_v61  ;;  %v3209_v54 = vmul.f32 %v3156_v51, %v4969_v30 }
 0x68e   : > { %3245 = vrot.lane.b32.xlu1 %v3208_v48, %s4175_s23  ;;  %3243 = vrot.lane.b32.xlu0 %v3207_v25, %s4175_s23 }
 0x68f   : > { %v3161_v41 = vpop.permute.xlu1 %3160  ;;  %v3166_v15 = vpop.permute.xlu0 %3165 }
 0x690   : > { %v3210_v55 = vmul.f32 %v4964_v29, %v3161_v41  ;;  %v3211_v27 = vmul.f32 %v3166_v15, %v4983_v31 }
 0x692   : > { %3249 = vrot.lane.b32.xlu1 %v3210_v55, %s4175_s23  ;;  %3247 = vrot.lane.b32.xlu0 %v3209_v54, %s4175_s23 }
 0x693   : > { %v3171_v22 = vpop.permute.xlu1 %3170  ;;  %v3176_v50 = vpop.permute.xlu0 %3175 }
 0x694   : > { %v3212_v26 = vmul.f32 %v4978_v21, %v3171_v22  ;;  %v3213_v30 = vmul.f32 %v3176_v50, %v4997_v34 }
 0x696   : > { %3253 = vrot.lane.b32.xlu1 %v3212_v26, %s4175_s23  ;;  %3251 = vrot.lane.b32.xlu0 %v3211_v27, %s4175_s23 }
 0x697   : > { %v3181_v56 = vpop.permute.xlu1 %3180  ;;  %v3186_v43 = vpop.permute.xlu0 %3185 }
 0x698   : > { %v3214_v29 = vmul.f32 %v4992_v59, %v3181_v56  ;;  %v3215_v31 = vmul.f32 %v3186_v43, %v5011_v16 }
 0x69a   : > { %3257 = vrot.lane.b32.xlu1 %v3214_v29, %s4175_s23  ;;  %3255 = vrot.lane.b32.xlu0 %v3213_v30, %s4175_s23 }
 0x69b   : > { %v3191_v53 = vpop.permute.xlu1 %3190  ;;  %v3196_v47 = vpop.permute.xlu0 %3195 }
 0x69c   : > { %v3216_v21 = vmul.f32 %v5006_v12, %v3191_v53  ;;  %v3217_v34 = vmul.f32 %v3196_v47, %v5027_v11  ;;  %v3578_v12 = vld [vmem:[%s5354_s13] ss:$0 sm:$0xff] }
 0x69e   : > { %3261 = vrot.lane.b32.xlu1 %v3216_v21, %s4175_s23  ;;  %3259 = vrot.lane.b32.xlu0 %v3215_v31, %s4175_s23 }
 0x69f   : > { %v3201_v57 = vpop.permute.xlu1 %3200 }
 0x6a0   : > { %v3218_v59 = vmul.f32 %v5020_v35, %v3201_v57 }
 0x6a2   : > { %3265 = vrot.lane.b32.xlu1 %v3218_v59, %s4175_s23  ;;  %3263 = vrot.lane.b32.xlu0 %v3217_v34, %s4175_s23 }
 0x6e2   : > { %v3103_v16 = vpop.f32.mrf.mxu1 }
 0x6e3   : > { %v3104_v35 = vadd.f32 %v3578_v12, %v3103_v16 }
 0x6e4   : > { %v4022_v11 = vpop.f32.mrf.mxu1 }
 0x6e5   : > { %3301 = vst.msk [vmem:[%s511_s26] sm:$0xff] %vm3300_vm10, %v3104_v35 }
 0x6f2   : > { %v3238_v46 = vpop.permute.xlu1 %3237 }
 0x6f3   : > { %3285 = vst.msk [vmem:[%s4920_s24 + $0x8] sm:$0xff] %vm3283_vm11, %v3238_v46 }
 0x6f4   : > { %v3236_v28 = vpop.permute.xlu0 %3235 }
 0x6f5   : > { %3284 = vst.msk [vmem:[%s4920_s24] sm:$0xff] %vm3283_vm11, %v3236_v28 }
 0x6f8   : > { %v3242_v58 = vpop.permute.xlu1 %3241 }
 0x6f9   : > { %3287 = vst.msk [vmem:[%s4920_s24 + $0x18] sm:$0xff] %vm3283_vm11, %v3242_v58 }
 0x6fc   : > { %v3240_v49 = vpop.permute.xlu0 %3239 }
 0x6fd   : > { %3286 = vst.msk [vmem:[%s4920_s24 + $0x10] sm:$0xff] %vm3283_vm11, %v3240_v49 }
 0x700   : > { %v3246_v32 = vpop.permute.xlu1 %3245  ;;  %v3244_v33 = vpop.permute.xlu0 %3243 }
 0x701   : > { %3289 = vst.msk [vmem:[%s4920_s24 + $0x28] sm:$0xff] %vm3283_vm11, %v3246_v32  ;;  %3288 = vst.msk [vmem:[%s4920_s24 + $0x20] sm:$0xff] %vm3283_vm11, %v3244_v33 }
 0x704   : > { %v3250_v44 = vpop.permute.xlu1 %3249  ;;  %v3248_v52 = vpop.permute.xlu0 %3247 }
 0x705   : > { %3291 = vst.msk [vmem:[%s4920_s24 + $0x38] sm:$0xff] %vm3283_vm11, %v3250_v44  ;;  %3290 = vst.msk [vmem:[%s4920_s24 + $0x30] sm:$0xff] %vm3283_vm11, %v3248_v52 }
 0x708   : > { %v3254_v45 = vpop.permute.xlu1 %3253  ;;  %v3252_v40 = vpop.permute.xlu0 %3251 }
 0x709   : > { %3293 = vst.msk [vmem:[%s4920_s24 + $0x48] sm:$0xff] %vm3283_vm11, %v3254_v45  ;;  %3292 = vst.msk [vmem:[%s4920_s24 + $0x40] sm:$0xff] %vm3283_vm11, %v3252_v40 }
 0x70c   : > { %v3258_v42 = vpop.permute.xlu1 %3257  ;;  %v3256_v60 = vpop.permute.xlu0 %3255 }
 0x70d   : > { %3295 = vst.msk [vmem:[%s4920_s24 + $0x58] sm:$0xff] %vm3283_vm11, %v3258_v42  ;;  %3294 = vst.msk [vmem:[%s4920_s24 + $0x50] sm:$0xff] %vm3283_vm11, %v3256_v60 }
 0x710   : > { %v3262_v62 = vpop.permute.xlu1 %3261  ;;  %v3260_v63 = vpop.permute.xlu0 %3259 }
 0x711   : > { %3297 = vst.msk [vmem:[%s4920_s24 + $0x68] sm:$0xff] %vm3283_vm11, %v3262_v62  ;;  %3296 = vst.msk [vmem:[%s4920_s24 + $0x60] sm:$0xff] %vm3283_vm11, %v3260_v63 }
 0x714   : > { %v3266_v0 = vpop.permute.xlu1 %3265  ;;  %v3264_v36 = vpop.permute.xlu0 %3263 }
 0x715   : > { %3299 = vst.msk [vmem:[%s4920_s24 + $0x78] sm:$0xff] %vm3283_vm11, %v3266_v0  ;;  %3298 = vst.msk [vmem:[%s4920_s24 + $0x70] sm:$0xff] %vm3283_vm11, %v3264_v36 }
 0x716 PF: > { %s26_s18 = sadd.s32 1, %s4170_s18  }
 0x717   : > { %p23_p6 = scmp.ge.s32.totalorder %s26_s18, 4  }
 0x719   :  { %25 = sbr.rel (!%p23_p6) target bundleno = 1 (0x1), region = 118 }

// kernel: b76_forward.1
= control target key start
LH: loop header
LB: loop body
LE: loop exit
PB: predicated region body
PF: predicated region fallthrough
CT: control target
= control target key end

     0   :  { %s4256_s18 = smov 0   ;;  %s5341_s0 = inlined_call_operand.vmem [shape: f32[64,360], index: 0, kind: input, shape index: {}]   ;;  %s5342_s1 = inlined_call_operand.vmem [shape: bf16[360,360], index: 1, kind: input, shape index: {}]   ;;  %s5343_s2 = inlined_call_operand.vmem [shape: f32[1,360], index: 2, kind: input, shape index: {}]   ;;  %s5344_s3 = inlined_call_operand.vmem [shape: bf16[128,32], index: 3, kind: input, shape index: {}]   ;;  %s5345_s4 = inlined_call_operand.vmem [shape: f32[128,360], index: 4, kind: input, shape index: {}]   ;;  %s5346_s5 = inlined_call_operand.vmem [shape: bf16[360,20], index: 5, kind: input, shape index: {}]   ;;  %s5347_s6 = inlined_call_operand.vmem [shape: f32[128,1], index: 6, kind: input, shape index: {}]   ;;  %s5348_s7 = inlined_call_operand.vmem [shape: f32[20,2], index: 7, kind: input, shape index: {}]   ;;  %s5349_s8 = inlined_call_operand.vmem [shape: f32[8,128], index: 8, kind: input, shape index: {}]   ;;  %s5350_s9 = inlined_call_operand.vmem [shape: f32[128,8], index: 9, kind: input, shape index: {}]   ;;  %s5351_s10 = inlined_call_operand.vmem [shape: f32[2,6], index: 10, kind: input, shape index: {}]   ;;  %s5352_s11 = inlined_call_operand.vmem [shape: f32[128,6], index: 11, kind: input, shape index: {}]   ;;  %s5353_s12 = inlined_call_operand.vmem [shape: f32[6,3], index: 12, kind: input, shape index: {}]   ;;  %s5354_s13 = inlined_call_operand.vmem [shape: f32[1,3], index: 13, kind: input, shape index: {}]   ;;  %s5355_s14 = inlined_call_operand.vmem [shape: f32[256,4], index: 14, kind: output, shape index: {0}]   ;;  %s5356_s15 = inlined_call_operand.vmem [shape: f32[16,3], index: 15, kind: output, shape index: {1}]  }
   0x1 LB: > { %s4262_s19 = sadd.s32 4294967295, %s4170_s18   ;;  %p3393_p0 = scmp.ge.s32.totalorder %s4170_s18, 1  ;;  %s4170_s18 = sphi %s4256_s18, %s26_s18  }
   0x2   : > { %p442_p1 = scmp.lt.s32.totalorder %s4170_s18, 3 }
   0x4   : > { %p443_p2 = pnand %p3393_p0, %p442_p1 }
   0x5   : > { %s3394_s25 = sshll.u32 (!%p443_p2), %s4262_s19, 2  ;;  %p508_p5 = scmp.lt.s32.totalorder (!%p443_p2), %s4262_s19, 1 }
   0x6   : > { %446 = sbr.rel (%p443_p2) target bundleno = 1814 (0x716), region = 76  ;;  %p496_p3 = scmp.lt.s32.totalorder (!%p443_p2), %s3394_s25, 7 }
   0xb   : > { %v4040_v0 = vld [vmem:[%s5342_s1 + $0xac] ss:$12 sps:$4 sm:$0xff]   ;;  %v619_v1 = vld [vmem:[%s5342_s1 + $0x210] sm:$0xff]  ;;  %vm988_vm0 = vcmask 1043456   ;;  %v4172_v3 = vmov 0   ;;  %s5358_s25 = smov (!%p496_p3, %s3394_s25), 7 }
   0xc   : > { %v4043_v2 = vld [vmem:[%s5342_s1 + $0xa8] ss:$12 sps:$4 sm:$0xff]   ;;  %1083 = vmatprep.mubr.bf16.mxu1 %v4172_v3  ;;  %4038 = vset.pattern.permute.xlu0 %v4172_v3  ;;  %v3466_v4 = vcombine.high %v619_v1, %v619_v1  ;;  %v3465_v5 = vcombine.low %v619_v1, %v619_v1  ;;  %v4049_v8 = vld [vmem:[%s5342_s1 + $0x90] ss:$12 sps:$4 sm:$0xff]   ;;  %v4050_v10 = vld [vmem:[%s5342_s1 + $0x1f8] ss:$12 sps:$4 sm:$0xff]  }
   0xd   : > { %998 = vmatprep.subr.bf16.mxu0 %v4040_v0  ;;  %v4045_v6 = vld [vmem:[%s5342_s1 + $0x94] ss:$12 sps:$4 sm:$0xff]   ;;  %4039 = vset.pattern.permute.xlu1 %v4172_v3  ;;  %v4047_v7 = vld [vmem:[%s5342_s1 + $0x1fc] ss:$12 sps:$4 sm:$0xff]   ;;  %v4053_v12 = vld [vmem:[%s5342_s1 + $0x1e4] ss:$12 sps:$4 sm:$0xff]  }
   0xe   : > { %999 = vmatpush1.bf16.msra.mxu0 %v4043_v2  ;;  %3468 = vmatprep.subr.msk.bf16.mxu1 %vm988_vm0, %v3466_v4  ;;  %v990_v9 = vsel %vm988_vm0, %v3465_v5, 0  ;;  %v4051_v11 = vld [vmem:[%s5342_s1 + $0x7c] ss:$12 sps:$4 sm:$0xff]   ;;  %v4055_v13 = vld [vmem:[%s5342_s1 + $0x78] ss:$12 sps:$4 sm:$0xff]   ;;  %s4025_s23 = smul.u32 24, %s5358_s25 }
   0xf   : > { %1000 = vmatprep.subr.bf16.mxu0 %v4045_v6  ;;  %1054 = vmatpush1.bf16.msra.mxu1 %v990_v9  ;;  %v4057_v14 = vld [vmem:[%s5342_s1 + $0x64] ss:$12 sps:$4 sm:$0xff]   ;;  %v4056_v15 = vld [vmem:[%s5342_s1 + $0x1e0] ss:$12 sps:$4 sm:$0xff]   ;;  %v4062_v19 = vld [vmem:[%s5342_s1 + $0x1c8] ss:$12 sps:$4 sm:$0xff]  }
  0x10   : > { %1055 = vmatprep.subr.bf16.mxu1 %v4047_v7  ;;  %v4059_v16 = vld [vmem:[%s5342_s1 + $0x1cc] ss:$12 sps:$4 sm:$0xff]   ;;  %v4065_v20 = vld [vmem:[%s5342_s1 + $0x1b4] ss:$12 sps:$4 sm:$0xff]   ;;  %v4068_v23 = vld [vmem:[%s5342_s1 + $0x1b0] ss:$12 sps:$4 sm:$0xff]   ;;  %s4350_s24 = scalar_lea.vmem %s5341_s0, %s4025_s23 }
  0x11   : > { %v4061_v17 = vld [vmem:[%s5342_s1 + $0x60] ss:$12 sps:$4 sm:$0xff]   ;;  %v4067_v21 = vld [vmem:[%s5342_s1 + $0x48] ss:$12 sps:$4 sm:$0xff]   ;;  %v4073_v25 = vld [vmem:[%s5342_s1 + $0x30] ss:$12 sps:$4 sm:$0xff]  }
  0x12   : > { %1001 = vmatpush1.bf16.msra.mxu0 %v4049_v8  ;;  %v4063_v18 = vld [vmem:[%s5342_s1 + $0x4c] ss:$12 sps:$4 sm:$0xff]   ;;  %v4069_v22 = vld [vmem:[%s5342_s1 + $0x34] ss:$12 sps:$4 sm:$0xff]   ;;  %v4071_v24 = vld [vmem:[%s5342_s1 + $0x19c] ss:$12 sps:$4 sm:$0xff]  }
  0x13   : > { %1002 = vmatprep.subr.bf16.mxu0 %v4051_v11  ;;  %1056 = vmatpush1.bf16.msra.mxu1 %v4050_v10  ;;  %v4074_v26 = vld [vmem:[%s5342_s1 + $0x198] ss:$12 sps:$4 sm:$0xff]   ;;  %v4075_v27 = vld [vmem:[%s5342_s1 + $0x1c] ss:$12 sps:$4 sm:$0xff]   ;;  %v4080_v30 = vld [vmem:[%s5342_s1 + $0x180] ss:$12 sps:$4 sm:$0xff]  }
  0x14   : > { %1057 = vmatprep.subr.bf16.mxu1 %v4053_v12  ;;  %v4077_v28 = vld [vmem:[%s5342_s1 + $0x184] ss:$12 sps:$4 sm:$0xff]   ;;  %v4365_v33 = vld [vmem:[%s4350_s24 + $0x28] sm:$0xff]  ;;  %vm981_vm1 = vcmask 850944   ;;  %v4091_v41 = vld [vmem:[%s5342_s1 + $0x154] ss:$12 sps:$4 sm:$0xff]  }
  0x15   : > { %v4079_v29 = vld [vmem:[%s5342_s1 + $0x18] ss:$12 sps:$4 sm:$0xff]   ;;  %v4362_v32 = vld [vmem:[%s4350_s24 + $0x10] sm:$0xff]  ;;  %v4084_v35 = vld [vmem:[%s5342_s1] ss:$12 sps:$4 sm:$0xff]   ;;  %vm1305_vm2 = vcmask 261120  }
  0x16   : > { %1003 = vmatpush1.bf16.msra.mxu0 %v4055_v13  ;;  %v4081_v31 = vld [vmem:[%s5342_s1 + $0x4] ss:$12 sps:$4 sm:$0xff]   ;;  %v4375_v36 = vpack.c.bf16 %v4365_v33, %v4362_v32  ;;  %v4086_v37 = vld [vmem:[%s5342_s1 + $0x16c] ss:$12 sps:$4 sm:$0xff]   ;;  %v4089_v40 = vld [vmem:[%s5342_s1 + $0x168] ss:$12 sps:$4 sm:$0xff]  }
  0x17   : > { %1004 = vmatprep.subr.bf16.mxu0 %v4057_v14  ;;  %1058 = vmatpush1.bf16.msra.mxu1 %v4056_v15  ;;  %v4083_v34 = vld [vmem:[%s5342_s1 + $0x170] ss:$12 sps:$4 sm:$0xff]   ;;  %v4088_v39 = vld [vmem:[%s5342_s1 + $0x158] ss:$12 sps:$4 sm:$0xff]   ;;  %v4093_v43 = vld [vmem:[%s5342_s1 + $0x140] ss:$12 sps:$4 sm:$0xff]  }
  0x18   : > { %1059 = vmatprep.subr.bf16.mxu1 %v4059_v16  ;;  %v4085_v38 = vld [vmem:[%s5342_s1 + $0xb0] ss:$12 sps:$4 sm:$0xff]   ;;  %v4090_v42 = vld [vmem:[%s5342_s1 + $0x98] ss:$12 sps:$4 sm:$0xff]   ;;  %v4095_v46 = vld [vmem:[%s5342_s1 + $0x80] ss:$12 sps:$4 sm:$0xff]  }
  0x19   : > { %v4094_v44 = vld [vmem:[%s5342_s1 + $0x150] ss:$12 sps:$4 sm:$0xff]   ;;  %v4098_v47 = vld [vmem:[%s5342_s1 + $0x128] ss:$12 sps:$4 sm:$0xff]   ;;  %v4099_v48 = vld [vmem:[%s5342_s1 + $0x138] ss:$12 sps:$4 sm:$0xff]  }
  0x1a   : > { %1005 = vmatpush1.bf16.msra.mxu0 %v4061_v17  ;;  %v4096_v45 = vld [vmem:[%s5342_s1 + $0x13c] ss:$12 sps:$4 sm:$0xff]   ;;  %v4101_v50 = vld [vmem:[%s5342_s1 + $0x124] ss:$12 sps:$4 sm:$0xff]   ;;  %v4104_v55 = vld [vmem:[%s5342_s1 + $0x120] ss:$12 sps:$4 sm:$0xff]  }
  0x1b   : > { %1006 = vmatprep.subr.bf16.mxu0 %v4063_v18  ;;  %1060 = vmatpush1.bf16.msra.mxu1 %v4062_v19  ;;  %v4100_v49 = vld [vmem:[%s5342_s1 + $0x68] ss:$12 sps:$4 sm:$0xff]   ;;  %v4423_v51 = vld [vmem:[%s4350_s24 + $0x40] sm:$0xff]  ;;  %v4426_v52 = vld [vmem:[%s4350_s24 + $0x58] sm:$0xff]  ;;  %vm2176_vm3 = vcmask 162816   ;;  %vm2770_vm4 = vcmask 1041408  }
  0x1c   : > { %1061 = vmatprep.subr.bf16.mxu1 %v4065_v20  ;;  %v4103_v53 = vld [vmem:[%s5342_s1 + $0x110] ss:$12 sps:$4 sm:$0xff]   ;;  %v4433_v54 = vpack.c.bf16 %v4426_v52, %v4423_v51  ;;  %v4106_v56 = vld [vmem:[%s5342_s1 + $0x10c] ss:$12 sps:$4 sm:$0xff]   ;;  %v4109_v60 = vld [vmem:[%s5342_s1 + $0x108] ss:$12 sps:$4 sm:$0xff]  }
  0x1d   : > { %v4105_v57 = vld [vmem:[%s5342_s1 + $0x50] ss:$12 sps:$4 sm:$0xff]   ;;  %v4108_v58 = vld [vmem:[%s5342_s1 + $0xf8] ss:$12 sps:$4 sm:$0xff]   ;;  %v4450_v59 = vld [vmem:[%s4350_s24 + $0x8] sm:$0xff]  ;;  %s3396_s23 = sshll.u32 %s4262_s19, 4 }
  0x1e   : > { %1007 = vmatpush1.bf16.msra.mxu0 %v4067_v21  ;;  %v4456_v61 = vld [vmem:[%s4350_s24 + $0x20] sm:$0xff]  ;;  %v4114_v2 = vld [vmem:[%s5342_s1 + $0xf0] ss:$12 sps:$4 sm:$0xff]   ;;  %v4118_v6 = vld [vmem:[%s5342_s1 + $0xc8] ss:$12 sps:$4 sm:$0xff]   ;;  %p503_p4 = scmp.lt.s32.totalorder %s3396_s23, 31 }
  0x1f   : > { %1008 = vmatprep.subr.bf16.mxu0 %v4069_v22  ;;  %1062 = vmatpush1.bf16.msra.mxu1 %v4068_v23  ;;  %v4111_v62 = vld [vmem:[%s5342_s1 + $0xf4] ss:$12 sps:$4 sm:$0xff]   ;;  %v526_v63 = vpack.c.bf16 %v4456_v61, %v4450_v59  ;;  %v4110_v0 = vld [vmem:[%s5342_s1 + $0x38] ss:$12 sps:$4 sm:$0xff]   ;;  %v4116_v5 = vld [vmem:[%s5342_s1 + $0xdc] ss:$12 sps:$4 sm:$0xff]  }
  0x20   : > { %1063 = vmatprep.subr.bf16.mxu1 %v4071_v24  ;;  %v4113_v1 = vld [vmem:[%s5342_s1 + $0xe0] ss:$12 sps:$4 sm:$0xff]   ;;  %v4123_v7 = vld [vmem:[%s5342_s1 + $0x218] ss:$0 sps:$4 sm:$0xff]   ;;  %v4121_v9 = vld [vmem:[%s5342_s1 + $0xc4] ss:$12 sps:$4 sm:$0xff]  }
  0x21   : > { %v4115_v4 = vld [vmem:[%s5342_s1 + $0x20] ss:$12 sps:$4 sm:$0xff]   ;;  %1030 = vmatprep.mubr.bf16.mxu0 %v526_v63  ;;  %v4119_v8 = vld [vmem:[%s5342_s1 + $0xd8] ss:$12 sps:$4 sm:$0xff]   ;;  %v4120_v10 = vld [vmem:[%s5342_s1 + $0x8] ss:$12 sps:$4 sm:$0xff]  }
  0x22   : > { %1009 = vmatpush1.bf16.msra.mxu0 %v4073_v25  ;;  %v4494_v11 = vld [vmem:[%s4350_s24] sm:$0xff]  ;;  %v4497_v12 = vld [vmem:[%s4350_s24 + $0x18] sm:$0xff]  ;;  %v996_v13 = vsel %vm988_vm0, %v4123_v7, 0  ;;  %v4507_v16 = vld [vmem:[%s4350_s24 + $0x50] sm:$0xff]  ;;  %s5360_s23 = smov (!%p503_p4, %s3396_s23), 31  ;;  %vm2389_vm5 = vcmask 15360  }
  0x23   : > { %1010 = vmatprep.subr.bf16.mxu0 %v4075_v27  ;;  %1064 = vmatpush1.bf16.msra.mxu1 %v4074_v26  ;;  %v4124_v14 = vld [vmem:[%s5342_s1 + $0xc0] ss:$12 sps:$4 sm:$0xff]   ;;  %v4504_v15 = vld [vmem:[%s4350_s24 + $0x38] sm:$0xff]  ;;  %v525_v17 = vpack.c.bf16 %v4497_v12, %v4494_v11  ;;  %v4126_v20 = vld [vmem:[%s5342_s1 + $0x1e8] ss:$12 sps:$4 sm:$0xff]   ;;  %s3397_s17 = sshll.u32 %s5360_s23, 3 }
  0x24   : > { %1065 = vmatprep.subr.bf16.mxu1 %v4077_v28  ;;  %v4125_v18 = vld [vmem:[%s5342_s1 + $0x200] ss:$12 sps:$4 sm:$0xff]   ;;  %v529_v19 = vpack.c.bf16 %v4507_v16, %v4504_v15  ;;  %v4521_v21 = vld [vmem:[%s4350_s24 + $0x30] sm:$0xff]  ;;  %v4128_v25 = vld [vmem:[%s5342_s1 + $0x1b8] ss:$12 sps:$4 sm:$0xff]   ;;  %vm4174_vm6 = vmmov 0  }
  0x25   : > { %v4524_v22 = vld [vmem:[%s4350_s24 + $0x48] sm:$0xff]  ;;  %v4127_v23 = vld [vmem:[%s5342_s1 + $0x1d0] ss:$12 sps:$4 sm:$0xff]   ;;  %v4548_v28 = vld [vmem:[%s5344_s3] sm:$0xff]   ;;  %s4920_s24 = scalar_lea.vmem %s5355_s14, %s3397_s17  ;;  %vm2527_vm7 = vcmask 64512   ;;  %vm3033_vm8 = vcmask 1045504  }
  0x26   : > { %1011 = vmatpush1.bf16.msra.mxu0 %v4079_v29  ;;  %v528_v24 = vpack.c.bf16 %v4524_v22, %v4521_v21  ;;  %v4129_v26 = vld [vmem:[%s5342_s1 + $0x1a0] ss:$12 sps:$4 sm:$0xff]   ;;  %v4130_v27 = vld [vmem:[%s5342_s1 + $0x188] ss:$12 sps:$4 sm:$0xff]   ;;  %vm3029_vm9 = vcmask 48128   ;;  %s4175_s23 = smov 2  }
  0x27   : > { %1012 = vmatprep.subr.bf16.mxu0 %v4081_v31  ;;  %1066 = vmatpush1.bf16.msra.mxu1 %v4080_v30  ;;  %s5362_s19 = smov (!%p508_p5, %s4262_s19), 1  ;;  %vm3300_vm10 = vcmask 23552   ;;  %vm3283_vm11 = vcmask 31760  }
  0x28   : > { %3583 = vmatprep.subr.bf16.mxu1 %v4083_v34  ;;  %s3398_s17 = sshll.u32 %s5362_s19, 3 }
  0x29   : > { %s511_s26 = scalar_lea.vmem %s5356_s15, %s3398_s17 }
  0x2a   : > { %1013 = vmatpush1.bf16.msra.mxu0 %v4084_v35  ;;  %3469 = vmatmul.mubr.msk.bf16.vlgmr.msra.gmra.mxu1 %vm981_vm1, %v4375_v36 }
  0x2b   : > { %1014 = vmatprep.subr.bf16.mxu0 %v4086_v37  ;;  %3584 = vmatpush3.bf16.msra.mxu1 %v4085_v38 }
  0x2c   : > { %1093 = vmatprep.mubr.bf16.mxu1 %v4172_v3  ;;  %3585 = vmatprep.subr.bf16.mxu1 %v4088_v39 }
  0x2e   : > { %1015 = vmatpush2.bf16.msra.mxu0 %v4089_v40 }
  0x2f   : > { %1016 = vmatprep.subr.bf16.mxu0 %v4091_v41  ;;  %3586 = vmatpush3.bf16.msra.mxu1 %v4090_v42 }
  0x30   : > { %3587 = vmatprep.subr.bf16.mxu1 %v4093_v43 }
  0x32   : > { %1017 = vmatpush2.bf16.msra.mxu0 %v4094_v44  ;;  %3470 = vmatmul.mubr.msk.bf16.gmra.mxu1 %vm981_vm1, %v4433_v54  ;;  %v1216_v44 = vlaneseq }
  0x33   : > { %1018 = vmatprep.subr.bf16.mxu0 %v4096_v45  ;;  %3588 = vmatpush3.bf16.msra.mxu1 %v4095_v46 }
  0x34   : > { %3589 = vmatprep.subr.bf16.mxu1 %v4098_v47  ;;  %1136 = vmatprep.mubr.bf16.mxu1 %v526_v63 }
  0x36   : > { %1019 = vmatpush2.bf16.msra.mxu0 %v4099_v48  ;;  %v1217_v48 = vshrl.u32 %v1216_v44, 7 }
  0x37   : > { %1020 = vmatprep.subr.bf16.mxu0 %v4101_v50  ;;  %3590 = vmatpush3.bf16.msra.mxu1 %v4100_v49 }
  0x38   : > { %3591 = vmatprep.subr.bf16.mxu1 %v4103_v53  ;;  %v1222_v63 = vsub.s32 1, %v1217_v48 }
  0x3a   : > { %1021 = vmatpush2.bf16.msra.mxu0 %v4104_v55 }
  0x3b   : > { %1022 = vmatprep.subr.bf16.mxu0 %v4106_v56  ;;  %3592 = vmatpush3.bf16.msra.mxu1 %v4105_v57  ;;  %v1218_v56 = vsub.s32 0, %v1217_v48 }
  0x3c   : > { %3593 = vmatprep.subr.bf16.mxu1 %v4108_v58 }
  0x3e   : > { %1023 = vmatpush2.bf16.msra.mxu0 %v4109_v60  ;;  %v1214_v60 = vld [vmem:[%s5343_s2] sm:$0x7] }
  0x3f   : > { %1024 = vmatprep.subr.bf16.mxu0 %v4111_v62  ;;  %3594 = vmatpush3.bf16.msra.mxu1 %v4110_v0 }
  0x40   : > { %3595 = vmatprep.subr.bf16.mxu1 %v4113_v1 }
  0x42   : > { %1025 = vmatpush2.bf16.msra.mxu0 %v4114_v2 }
  0x43   : > { %1026 = vmatprep.subr.bf16.mxu0 %v4116_v5  ;;  %3596 = vmatpush3.bf16.msra.mxu1 %v4115_v4 }
  0x44   : > { %3597 = vmatprep.subr.bf16.mxu1 %v4118_v6 }
  0x46   : > { %1027 = vmatpush2.bf16.msra.mxu0 %v4119_v8 }
  0x47   : > { %1028 = vmatprep.subr.bf16.mxu0 %v4121_v9  ;;  %3598 = vmatpush3.bf16.msra.mxu1 %v4120_v10  ;;  %v1219_v10 = vrot.slane %v1214_v60, %v1218_v56 }
  0x48   : > { %4023 = vmatprep.subr.msk.bf16.mxu1 %vm988_vm0, %v4123_v7 }
  0x4a   : > { %1029 = vmatpush2.bf16.msra.mxu0 %v4124_v14  ;;  %1137 = vmatmul.mubr.bf16.vlgmr.msra.gmra.mxu1 %v525_v17 }
  0x4b   : > { %3799 = vmatpush3.bf16.msra.mxu1 %v996_v13  ;;  %1144 = vmatprep.mubr.bf16.mxu1 %v529_v19 }
  0x4c   : > { %3800 = vmatprep.subr.bf16.mxu1 %v4125_v18 }
  0x4d   : > { %1031 = vmatmul.mubr.bf16.vlgmr.msra.gmra.mxu0 %v525_v17  ;;  %v1223_v17 = vrot.slane %v1214_v60, %v1222_v63  ;;  %v4143_v63 = vld [vmem:[%s5346_s5 + $0x68] sm:$0xff]  }
  0x4e   : > { %1040 = vmatprep.mubr.bf16.mxu0 %v529_v19 }
  0x4f   : > { %3801 = vmatpush3.bf16.msra.mxu1 %v4125_v18 }
  0x50   : > { %3802 = vmatprep.subr.bf16.mxu1 %v4126_v20 }
  0x52   : > { %1145 = vmatmul.mubr.bf16.gmra.mxu1 %v528_v24 }
  0x53   : > { %3803 = vmatpush3.bf16.msra.mxu1 %v4126_v20  ;;  %3812 = vmatprep.mubr.msk.bf16.mxu1 %vm981_vm1, %v4375_v36 }
  0x54   : > { %3804 = vmatprep.subr.bf16.mxu1 %v4127_v23 }
  0x55   : > { %1041 = vmatmul.mubr.bf16.gmra.mxu0 %v528_v24 }
  0x56   : > { %1362 = vmatprep.mubr.bf16.mxu0 %v4172_v3 }
  0x57   : > { %3805 = vmatpush3.bf16.msra.mxu1 %v4127_v23 }
  0x58   : > { %3806 = vmatprep.subr.bf16.mxu1 %v4128_v25 }
  0x5b   : > { %3807 = vmatpush3.bf16.msra.mxu1 %v4128_v25 }
  0x5c   : > { %3808 = vmatprep.subr.bf16.mxu1 %v4129_v26 }
  0x5f   : > { %3809 = vmatpush3.bf16.msra.mxu1 %v4129_v26 }
  0x60   : > { %3810 = vmatprep.subr.bf16.mxu1 %v4130_v27 }
  0x63   : > { %3811 = vmatpush3.bf16.msra.mxu1 %v4130_v27 }
  0x66   : > { %3813 = vmatmul.mubr.msk.bf16.vlgmr.msra.gmra.mxu1 %vm981_vm1, %v4433_v54 }
  0x67   : > { %3820 = vmatprep.mubr.msk.bf16.mxu1 %vm1305_vm2, %v4548_v28 }
  0xea   : > { %v1085_v29 = vpop.f32.mrf.mxu1 }
  0xec   : > { %v1087_v30 = vpop.f32.mrf.mxu1 }
  0xee   : > { %v1089_v31 = vpop.f32.mrf.mxu1 }
  0xf0   : > { %v1091_v34 = vpop.f32.mrf.mxu1 }
  0xf2   : > { %v1095_v35 = vpop.f32.mrf.mxu1 }
  0xf4   : > { %v1097_v36 = vpop.f32.mrf.mxu1 }
  0xf6   : > { %v1099_v37 = vpop.f32.mrf.mxu1 }
  0xf8   : > { %v1101_v38 = vpop.f32.mrf.mxu1 }
 0x10a   : > { %v3599_v39 = vpop.f32.mrf.mxu1 }
 0x10c   : > { %v3600_v41 = vpop.f32.mrf.mxu1 }
 0x10d   : > { %v1032_v40 = vpop.f32.mrf.mxu0 }
 0x10e   : > { %v4552_v43 = vpop.f32.mrf.mxu1  ;;  %v1086_v9 = vadd.f32 %v1085_v29, %v1032_v40 }
 0x10f   : > { %v1034_v42 = vpop.f32.mrf.mxu0 }
 0x110   : > { %v3603_v47 = vpop.f32.mrf.mxu1  ;;  %v1088_v62 = vadd.f32 %v1087_v30, %v1034_v42 }
 0x111   : > { %v1036_v45 = vpop.f32.mrf.mxu0 }
 0x112   : > { %v3605_v53 = vpop.f32.mrf.mxu1  ;;  %v1090_v1 = vadd.f32 %v1089_v31, %v1036_v45  ;;  %v1203_v14 = vadd.f32 %v1088_v62, %v4450_v59  ;;  %v4142_v62 = vld [vmem:[%s5346_s5 + $0x30] sm:$0xff]  }
 0x113   : > { %v1038_v46 = vpop.f32.mrf.mxu0 }
 0x114   : > { %v1092_v54 = vadd.f32 %v1091_v34, %v1038_v46  ;;  %v3606_v4 = vpop.f32.mrf.mxu1  ;;  %v1205_v19 = vadd.f32 %v1090_v1, %v4497_v12  ;;  %v1232_v26 = vadd.f32 %v1223_v17, %v1203_v14  ;;  %v4149_v12 = vld [vmem:[%s5346_s5 + $0xb0] ss:$0 sps:$4 sm:$0xff]   ;;  %v4144_v1 = vld [vmem:[%s5346_s5 + $0x28] sm:$0xff]  }
 0x115   : > { %v1042_v49 = vpop.f32.mrf.mxu0  ;;  %v3607_v31 = vadd.f32 %v3606_v4, %v3605_v53  ;;  %v1961_v45 = vsel %vm988_vm0, %v4149_v12, 0  ;;  %v4145_v4 = vld [vmem:[%s5346_s5 + $0x60] sm:$0xff]   ;;  %v4151_v14 = vld [vmem:[%s5346_s5 + $0x10] sm:$0xff]  }
 0x116   : > { %v1096_v57 = vadd.f32 %v1095_v35, %v1042_v49  ;;  %v1206_v5 = vadd.f32 %v1092_v54, %v4456_v61  ;;  %v3608_v23 = vpop.f32.mrf.mxu1  ;;  %v1234_v29 = vadd.f32 %v1219_v10, %v1205_v19  ;;  %v3604_v49 = vadd.f32 %v3603_v47, %v4552_v43  ;;  %v4132_v43 = vld [vmem:[%s5344_s3 + $0x8] sm:$0xff]   ;;  %v4155_v19 = vld [vmem:[%s5346_s5 + $0xa0] sm:$0xff]  }
 0x117   : > { %v1044_v50 = vpop.f32.mrf.mxu0 }
 0x118   : > { %v1098_v55 = vadd.f32 %v1097_v36, %v1044_v50  ;;  %v1208_v13 = vadd.f32 %v1096_v57, %v4521_v21  ;;  %v1235_v24 = vadd.f32 %v1223_v17, %v1206_v5  ;;  %v3609_v21 = vpop.f32.mrf.mxu1  ;;  %v3601_v36 = vadd.f32 %v3600_v41, %v3599_v39  ;;  %v4146_v5 = vld [vmem:[%s5346_s5 + $0x20] sm:$0xff]  }
 0x119   : > { %v1046_v58 = vpop.f32.mrf.mxu0 }
 0x11a   : > { %v1100_v0 = vadd.f32 %v1099_v37, %v1046_v58  ;;  %v1209_v6 = vadd.f32 %v1098_v55, %v4504_v15  ;;  %v1202_v15 = vadd.f32 %v1086_v9, %v4494_v11  ;;  %v1260_v59 = vpack.c.bf16 %v1235_v24, %v1232_v26  ;;  %v4148_v9 = vld [vmem:[%s5346_s5 + $0x18] sm:$0xff]   ;;  %v1707_v26 = vld [vmem:[%s5347_s6 + $0x10] sm:$0xff] }
 0x11b   : > { %v1048_v2 = vpop.f32.mrf.mxu0  ;;  %v3610_v11 = vadd.f32 %v3609_v21, %v3608_v23  ;;  %v4157_v23 = vld [vmem:[%s5346_s5] sm:$0xff]   ;;  %v4158_v24 = vld [vmem:[%s5346_s5 + $0x98] sm:$0xff]   ;;  %1733 = vperm.xlu1 %4039, %v1707_v26   ;;  %v1710_v21 = vld [vmem:[%s5347_s6 + $0x28] sm:$0xff] }
 0x11c   : > { %v1211_v7 = vadd.f32 %v1100_v0, %v4524_v22  ;;  %v1102_v8 = vadd.f32 %v1101_v38, %v1048_v2  ;;  %v1238_v61 = vadd.f32 %v1223_v17, %v1209_v6  ;;  %v1237_v22 = vadd.f32 %v1219_v10, %v1208_v13  ;;  %v4134_v0 = vld [vmem:[%s5344_s3 + $0x18] sm:$0xff]   ;;  %v4135_v2 = vld [vmem:[%s5344_s3 + $0x20] sm:$0xff]   ;;  %v4150_v13 = vld [vmem:[%s5346_s5 + $0x50] sm:$0xff]  }
 0x11d   : > { %v1231_v34 = vadd.f32 %v1219_v10, %v1202_v15  ;;  %v1226_v38 = vsub.s32 2, %v1217_v48  ;;  %v4147_v6 = vld [vmem:[%s5346_s5 + $0x58] sm:$0xff]   ;;  %v4161_v15 = vld [vmem:[%s5346_s5 + $0x80] sm:$0xff]  }
 0x11e   : > { %v1212_v18 = vadd.f32 %v1102_v8, %v4507_v16  ;;  %v1240_v20 = vadd.f32 %v1219_v10, %v1211_v7  ;;  %v4136_v7 = vld [vmem:[%s5344_s3 + $0x28] sm:$0xff]   ;;  %v4137_v8 = vld [vmem:[%s5344_s3 + $0x30] sm:$0xff]   ;;  %v4138_v10 = vld [vmem:[%s5344_s3 + $0x38] sm:$0xff]  }
 0x11f   : > { %v1259_v16 = vpack.c.bf16 %v1234_v29, %v1231_v34  ;;  %v1227_v50 = vrot.slane %v1214_v60, %v1226_v38  ;;  %v4141_v60 = vld [vmem:[%s5346_s5 + $0x70] sm:$0xff]   ;;  %v1708_v29 = vld [vmem:[%s5347_s6 + $0x18] sm:$0xff]  ;;  %v1713_v34 = vld [vmem:[%s5347_s6 + $0x40] sm:$0xff] }
 0x120   : > { %v1241_v25 = vadd.f32 %v1223_v17, %v1212_v18  ;;  %v1262_v30 = vpack.c.bf16 %v1240_v20, %v1237_v22  ;;  %v4152_v17 = vld [vmem:[%s5346_s5 + $0xa8] sm:$0xff]   ;;  %v4156_v20 = vld [vmem:[%s5346_s5 + $0x40] sm:$0xff]   ;;  %1738 = vperm.xlu1 %4039, %v1708_v29   ;;  %v1720_v38 = vld [vmem:[%s5347_s6 + $0x78] sm:$0xff] }
 0x121   : > { %v4154_v18 = vld [vmem:[%s5346_s5 + $0x8] sm:$0xff]   ;;  %v1705_v22 = vld [vmem:[%s5347_s6] sm:$0xff] }
 0x122   : > { %v1263_v27 = vpack.c.bf16 %v1241_v25, %v1238_v61  ;;  %v4159_v61 = vld [vmem:[%s5346_s5 + $0x90] sm:$0xff]   ;;  %v4160_v25 = vld [vmem:[%s5346_s5 + $0x88] sm:$0xff]   ;;  %1723 = vperm.xlu0 %4038, %v1705_v22  }
 0x124   : > { %1342 = vmatprep.subr.bf16.mxu0 %v1263_v27  ;;  %v1706_v27 = vld [vmem:[%s5347_s6 + $0x8] sm:$0xff]  ;;  %1748 = vperm.xlu1 %4039, %v1710_v21  }
 0x125   : > { %1343 = vmatpush1.bf16.msra.mxu0 %v1262_v30  ;;  %v1709_v30 = vld [vmem:[%s5347_s6 + $0x20] sm:$0xff] }
 0x126   : > { %1344 = vmatprep.subr.bf16.mxu0 %v1260_v59  ;;  %v3814_v35 = vpop.f32.mrf.mxu1  ;;  %1728 = vperm.xlu0 %4038, %v1706_v27   ;;  %v1712_v59 = vld [vmem:[%s5347_s6 + $0x38] sm:$0xff] }
 0x127   : > { %v1196_v37 = vadd.f32 %v3814_v35, %v3607_v31  ;;  %v1711_v31 = vld [vmem:[%s5347_s6 + $0x30] sm:$0xff]  ;;  %v1716_v35 = vld [vmem:[%s5347_s6 + $0x58] sm:$0xff] }
 0x128   : > { %v1187_v40 = vpop.f32.mrf.mxu1  ;;  %1758 = vperm.xlu1 %4039, %v1712_v59  }
 0x129   : > { %1345 = vmatpush1.bf16.msra.mxu0 %v1259_v16  ;;  %v1210_v42 = vadd.f32 %v1196_v37, %v4423_v51  ;;  %v1188_v44 = vadd.f32 %v3601_v36, %v1187_v40  ;;  %v1715_v16 = vld [vmem:[%s5347_s6 + $0x50] sm:$0xff]  ;;  %v1717_v36 = vld [vmem:[%s5347_s6 + $0x60] sm:$0xff] }
 0x12a   : > { %4024 = vmatprep.subr.msk.bf16.mxu0 %vm988_vm0, %v4149_v12  ;;  %v3815_v46 = vpop.f32.mrf.mxu1  ;;  %1743 = vperm.xlu0 %4038, %v1709_v30   ;;  %v1714_v12 = vld [vmem:[%s5347_s6 + $0x48] sm:$0xff]  ;;  %v1719_v37 = vld [vmem:[%s5347_s6 + $0x70] sm:$0xff] }
 0x12b   : > { %v1199_v53 = vadd.f32 %v3815_v46, %v3610_v11  ;;  %v1239_v41 = vadd.f32 %v1227_v50, %v1210_v42  ;;  %v1204_v51 = vadd.f32 %v1188_v44, %v4362_v32  ;;  %v4139_v32 = vld [vmem:[%s5346_s5 + $0x78] sm:$0xff]   ;;  %v1718_v11 = vld [vmem:[%s5347_s6 + $0x68] sm:$0xff] }
 0x12c   : > { %3481 = vmatmul.mubr.msk.bf16.vlgmr.msra.gmra.mxu0 %vm1305_vm2, %v4548_v28  ;;  %v1190_v39 = vpop.f32.mrf.mxu1  ;;  %1768 = vperm.xlu1 %4039, %v1714_v12   ;;  %v1543_v44 = vld [vmem:[%s5345_s4 + $0x18] sm:$0xff]  ;;  %v1560_v12 = vld [vmem:[%s5345_s4 + $0xa0] sm:$0xff] }
 0x12d   : > { %1372 = vmatprep.mubr.bf16.mxu0 %v4172_v3  ;;  %3837 = vmatpush3.bf16.msra.mxu0 %v1961_v45  ;;  %v1213_v48 = vadd.f32 %v1199_v53, %v4426_v52  ;;  %v1191_v54 = vadd.f32 %v3604_v49, %v1190_v39  ;;  %v1233_v47 = vadd.f32 %v1227_v50, %v1204_v51  ;;  %v4140_v52 = vld [vmem:[%s5346_s5 + $0x38] sm:$0xff]   ;;  %v1541_v45 = vld [vmem:[%s5345_s4 + $0x8] sm:$0xff]  ;;  %v1544_v49 = vld [vmem:[%s5345_s4 + $0x20] sm:$0xff] }
 0x12e   : > { %3838 = vmatprep.subr.bf16.mxu0 %v4152_v17  ;;  %1753 = vperm.xlu0 %4038, %v1711_v31  }
 0x12f   : > { %v1242_v55 = vadd.f32 %v1227_v50, %v1213_v48  ;;  %v1207_v56 = vadd.f32 %v1191_v54, %v4365_v33  ;;  %v4133_v33 = vld [vmem:[%s5344_s3 + $0x10] sm:$0xff]  }
 0x130   : > { %1778 = vperm.xlu1 %4039, %v1716_v35  }
 0x131   : > { %v1236_v57 = vadd.f32 %v1227_v50, %v1207_v56  ;;  %v1264_v28 = vpack.c.bf16 %v1242_v55, %v1239_v41  ;;  %3839 = vmatpush3.bf16.msra.mxu0 %v4152_v17  ;;  %v1540_v50 = vld [vmem:[%s5345_s4] sm:$0xff] }
 0x132   : > { %3840 = vmatprep.subr.bf16.mxu0 %v4155_v19  ;;  %1763 = vperm.xlu0 %4038, %v1713_v34  }
 0x133   : > { %3816 = vmatprep.subr.bf16.mxu1 %v1264_v28  ;;  %v1261_v58 = vpack.c.bf16 %v1236_v57, %v1233_v47  ;;  %v1549_v47 = vld [vmem:[%s5345_s4 + $0x48] sm:$0xff]  ;;  %v1547_v57 = vld [vmem:[%s5345_s4 + $0x38] sm:$0xff] }
 0x134   : > { %3482 = vmatmul.mubr.msk.bf16.gmra.mxu0 %vm1305_vm2, %v4132_v43  ;;  %3817 = vmatpush3.bf16.msra.mxu1 %v1264_v28 }
 0x135   : > { %1382 = vmatprep.mubr.bf16.mxu0 %v4172_v3  ;;  %3818 = vmatprep.subr.bf16.mxu1 %v1261_v58 }
 0x136   : > { %3841 = vmatpush3.bf16.msra.mxu0 %v4155_v19  ;;  %1773 = vperm.xlu0 %4038, %v1715_v16   ;;  %v1556_v19 = vld [vmem:[%s5345_s4 + $0x80] sm:$0xff] }
 0x137   : > { %3842 = vmatprep.subr.bf16.mxu0 %v4158_v24  ;;  %1788 = vperm.xlu1 %4039, %v1718_v11  }
 0x138   : > { %3819 = vmatpush3.bf16.msra.mxu1 %v1261_v58  ;;  %v1550_v58 = vld [vmem:[%s5345_s4 + $0x50] sm:$0xff] }
 0x139   : > { %3630 = vmatprep.subr.bf16.mxu1 %v4139_v32  ;;  %v1546_v32 = vld [vmem:[%s5345_s4 + $0x30] sm:$0xff] }
 0x13a   : > { %3843 = vmatpush3.bf16.msra.mxu0 %v4158_v24  ;;  %1783 = vperm.xlu0 %4038, %v1717_v36   ;;  %v1554_v36 = vld [vmem:[%s5345_s4 + $0x70] sm:$0xff] }
 0x13b   : > { %3821 = vmatmul.mubr.msk.bf16.vlgmr.msra.gmra.mxu1 %vm1305_vm2, %v4132_v43  ;;  %3844 = vmatprep.subr.bf16.mxu0 %v4159_v61 }
 0x13c   : > { %3483 = vmatmul.mubr.msk.bf16.gmra.mxu0 %vm1305_vm2, %v4133_v33  ;;  %3824 = vmatprep.mubr.msk.bf16.mxu1 %vm1305_vm2, %v4133_v33 }
 0x13d   : > { %1392 = vmatprep.mubr.bf16.mxu0 %v4172_v3  ;;  %3631 = vmatpush3.bf16.msra.mxu1 %v4140_v52 }
 0x13e   : > { %3632 = vmatprep.subr.bf16.mxu1 %v4141_v60  ;;  %3845 = vmatpush3.bf16.msra.mxu0 %v4159_v61 }
 0x13f   : > { %3846 = vmatprep.subr.bf16.mxu0 %v4160_v25  ;;  %1793 = vperm.xlu0 %4038, %v1719_v37   ;;  %v1563_v37 = vld [vmem:[%s5345_s4 + $0xb8] sm:$0xff] }
 0x140   : > { %1798 = vperm.xlu1 %4039, %v1720_v38   ;;  %v1561_v38 = vld [vmem:[%s5345_s4 + $0xa8] sm:$0xff] }
 0x141   : > { %3633 = vmatpush3.bf16.msra.mxu1 %v4142_v62 }
 0x142   : > { %3634 = vmatprep.subr.bf16.mxu1 %v4143_v63  ;;  %3847 = vmatpush3.bf16.msra.mxu0 %v4160_v25 }
 0x143   : > { %3825 = vmatmul.mubr.msk.bf16.gmra.mxu1 %vm1305_vm2, %v4134_v0  ;;  %3848 = vmatprep.subr.bf16.mxu0 %v4161_v15 }
 0x144   : > { %3484 = vmatmul.mubr.msk.bf16.gmra.mxu0 %vm1305_vm2, %v4134_v0  ;;  %3828 = vmatprep.mubr.msk.bf16.mxu1 %vm1305_vm2, %v4135_v2 }
 0x145   : > { %1402 = vmatprep.mubr.bf16.mxu0 %v4172_v3  ;;  %3635 = vmatpush3.bf16.msra.mxu1 %v4144_v1 }
 0x146   : > { %3636 = vmatprep.subr.bf16.mxu1 %v4145_v4  ;;  %3849 = vmatpush3.bf16.msra.mxu0 %v4161_v15  ;;  %v1548_v4 = vld [vmem:[%s5345_s4 + $0x40] sm:$0xff] }
 0x149   : > { %3637 = vmatpush3.bf16.msra.mxu1 %v4146_v5 }
 0x14a   : > { %3638 = vmatprep.subr.bf16.mxu1 %v4147_v6 }
 0x14b   : > { %3829 = vmatmul.mubr.msk.bf16.gmra.mxu1 %vm1305_vm2, %v4136_v7 }
 0x14c   : > { %3485 = vmatmul.mubr.msk.bf16.gmra.mxu0 %vm1305_vm2, %v4135_v2  ;;  %3832 = vmatprep.mubr.msk.bf16.mxu1 %vm1305_vm2, %v4137_v8 }
 0x14d   : > { %1412 = vmatprep.mubr.bf16.mxu0 %v4172_v3  ;;  %3639 = vmatpush3.bf16.msra.mxu1 %v4148_v9  ;;  %v1551_v9 = vld [vmem:[%s5345_s4 + $0x58] sm:$0xff] }
 0x14e   : > { %3640 = vmatprep.subr.bf16.mxu1 %v4150_v13 }
 0x151   : > { %3641 = vmatpush3.bf16.msra.mxu1 %v4151_v14  ;;  %v1553_v14 = vld [vmem:[%s5345_s4 + $0x68] sm:$0xff] }
 0x153   : > { %3833 = vmatmul.mubr.msk.bf16.gmra.mxu1 %vm1305_vm2, %v4138_v10 }
 0x154   : > { %3486 = vmatmul.mubr.msk.bf16.gmra.mxu0 %vm1305_vm2, %v4136_v7  ;;  %v1542_v7 = vld [vmem:[%s5345_s4 + $0x10] sm:$0xff] }
 0x155   : > { %1422 = vmatprep.mubr.bf16.mxu0 %v4172_v3 }
 0x15c   : > { %3487 = vmatmul.mubr.msk.bf16.gmra.mxu0 %vm1305_vm2, %v4137_v8 }
 0x15d   : > { %1432 = vmatprep.mubr.bf16.mxu0 %v4172_v3  ;;  %v4153_v3 = vld [vmem:[%s5346_s5 + $0x48] sm:$0xff]  }
 0x15e   : > { %3642 = vmatprep.subr.bf16.mxu1 %v4153_v3 }
 0x15f   : > { %3643 = vmatpush3.bf16.msra.mxu1 %v4154_v18  ;;  %v1545_v18 = vld [vmem:[%s5345_s4 + $0x28] sm:$0xff] }
 0x160   : > { %3644 = vmatprep.subr.bf16.mxu1 %v4156_v20  ;;  %v1552_v20 = vld [vmem:[%s5345_s4 + $0x60] sm:$0xff] }
 0x163   : > { %3645 = vmatpush3.bf16.msra.mxu1 %v4157_v23 }
 0x164   : > { %3488 = vmatmul.mubr.msk.bf16.gmra.mxu0 %vm1305_vm2, %v4138_v10  ;;  %v1555_v10 = vld [vmem:[%s5345_s4 + $0x78] sm:$0xff] }
 0x1ec   : > { %v1364_v40 = vpop.f32.mrf.mxu0 }
 0x1ed   : > { %v1588_v48 = vmul.f32 %v1540_v50, %v1364_v40  ;;  %v1558_v50 = vld [vmem:[%s5345_s4 + $0x90] sm:$0xff] }
 0x1ee   : > { %v1366_v42 = vpop.f32.mrf.mxu0 }
 0x1ef   : > { %v1589_v41 = vmul.f32 %v1541_v45, %v1366_v42  ;;  %v1559_v42 = vld [vmem:[%s5345_s4 + $0x98] sm:$0xff] }
 0x1f0   : > { %v1368_v46 = vpop.f32.mrf.mxu0 }
 0x1f1   : > { %v1591_v53 = vmul.f32 %v1543_v44, %v1368_v46  ;;  %v1557_v46 = vld [vmem:[%s5345_s4 + $0x88] sm:$0xff] }
 0x1f2   : > { %v1370_v39 = vpop.f32.mrf.mxu0 }
 0x1f3   : > { %v1592_v51 = vmul.f32 %v1544_v49, %v1370_v39  ;;  %v1636_v56 = vpack.c.bf16 %v1591_v53, %v1588_v48  ;;  %v1562_v49 = vld [vmem:[%s5345_s4 + $0xb0] sm:$0xff] }
 0x1f4   : > { %v1374_v54 = vpop.f32.mrf.mxu0 }
 0x1f5   : > { %v1637_v55 = vpack.c.bf16 %v1592_v51, %v1589_v41  ;;  %v1594_v63 = vmul.f32 %v1546_v32, %v1374_v54 }
 0x1f6   : > { %v1376_v43 = vpop.f32.mrf.mxu0 }
 0x1f7   : > { %1995 = vmatprep.mubr.bf16.mxu1 %v1637_v55  ;;  %v1595_v60 = vmul.f32 %v1547_v57, %v1376_v43 }
 0x1f8   : > { %v1378_v28 = vpop.f32.mrf.mxu0  ;;  %1996 = vmatmul.mubr.bf16.vlgmr.msra.gmra.mxu1 %v1636_v56 }
 0x1f9   : > { %v1597_v33 = vmul.f32 %v1549_v47, %v1378_v28 }
 0x1fa   : > { %v1380_v52 = vpop.f32.mrf.mxu0 }
 0x1fb   : > { %v1598_v62 = vmul.f32 %v1550_v58, %v1380_v52  ;;  %v3822_v0 = vpop.f32.mrf.mxu1  ;;  %v1639_v5 = vpack.c.bf16 %v1597_v33, %v1594_v63  ;;  %v1572_v33 = vld [vmem:[%s5345_s4 + $0x100] sm:$0xff]  ;;  %v1566_v63 = vld [vmem:[%s5345_s4 + $0xd0] sm:$0xff] }
 0x1fc   : > { %v1384_v1 = vpop.f32.mrf.mxu0  ;;  %v1596_v13 = vmul.f32 %v3822_v0, %v1548_v4  ;;  %v1575_v0 = vld [vmem:[%s5345_s4 + $0x118] sm:$0xff] }
 0x1fd   : > { %v1640_v2 = vpack.c.bf16 %v1598_v62, %v1595_v60  ;;  %v1477_v6 = vpop.f32.mrf.mxu1  ;;  %v1600_v29 = vmul.f32 %v1552_v20, %v1384_v1  ;;  %v1567_v1 = vld [vmem:[%s5345_s4 + $0xd8] sm:$0xff] }
 0x1fe   : > { %v1386_v8 = vpop.f32.mrf.mxu0  ;;  %v1590_v23 = vmul.f32 %v1542_v7, %v1477_v6  ;;  %v1568_v6 = vld [vmem:[%s5345_s4 + $0xe0] sm:$0xff] }
 0x1ff   : > { %2003 = vmatprep.mubr.bf16.mxu1 %v1640_v2  ;;  %v3823_v17 = vpop.f32.mrf.mxu1  ;;  %v1601_v22 = vmul.f32 %v1553_v14, %v1386_v8  ;;  %v1565_v2 = vld [vmem:[%s5345_s4 + $0xc8] sm:$0xff] }
 0x200   : > { %v1388_v3 = vpop.f32.mrf.mxu0  ;;  %2004 = vmatmul.mubr.bf16.gmra.mxu1 %v1639_v5  ;;  %v1599_v24 = vmul.f32 %v3823_v17, %v1551_v9  ;;  %v1569_v8 = vld [vmem:[%s5345_s4 + $0xe8] sm:$0xff]  ;;  %v1564_v9 = vld [vmem:[%s5345_s4 + $0xc0] sm:$0xff] }
 0x201   : > { %v1603_v61 = vmul.f32 %v1555_v10, %v1388_v3  ;;  %v1480_v25 = vpop.f32.mrf.mxu1 }
 0x202   : > { %v1390_v15 = vpop.f32.mrf.mxu0  ;;  %v1593_v26 = vmul.f32 %v1545_v18, %v1480_v25  ;;  %v1641_v30 = vpack.c.bf16 %v1599_v24, %v1596_v13 }
 0x203   : > { %v1604_v27 = vmul.f32 %v1556_v19, %v1390_v15  ;;  %v3826_v21 = vpop.f32.mrf.mxu1  ;;  %v1642_v16 = vpack.c.bf16 %v1603_v61, %v1600_v29 }
 0x204   : > { %v1394_v31 = vpop.f32.mrf.mxu0  ;;  %v1638_v59 = vpack.c.bf16 %v1593_v26, %v1590_v23  ;;  %v1608_v40 = vmul.f32 %v3826_v21, %v1560_v12  ;;  %v1584_v26 = vld [vmem:[%s5345_s4 + $0x160] sm:$0xff]  ;;  %v1578_v21 = vld [vmem:[%s5345_s4 + $0x130] sm:$0xff] }
 0x205   : > { %v1643_v34 = vpack.c.bf16 %v1604_v27, %v1601_v22  ;;  %v1493_v35 = vpop.f32.mrf.mxu1  ;;  %v1606_v43 = vmul.f32 %v1558_v50, %v1394_v31  ;;  %v1587_v31 = vld [vmem:[%s5345_s4 + $0x178] sm:$0xff] }
 0x206   : > { %v1396_v11 = vpop.f32.mrf.mxu0  ;;  %3850 = vmatprep.mubr.msk.bf16.mxu0 %vm981_vm1, %v1638_v59  ;;  %v1602_v53 = vmul.f32 %v1554_v36, %v1493_v35  ;;  %v1573_v59 = vld [vmem:[%s5345_s4 + $0x108] sm:$0xff]  ;;  %v1574_v35 = vld [vmem:[%s5345_s4 + $0x110] sm:$0xff] }
 0x207   : > { %2011 = vmatprep.mubr.bf16.mxu1 %v1643_v34  ;;  %v3827_v44 = vpop.f32.mrf.mxu1  ;;  %3851 = vmatmul.mubr.msk.bf16.vlgmr.msra.gmra.mxu0 %vm981_vm1, %v1641_v30  ;;  %v1607_v54 = vmul.f32 %v1559_v42, %v1396_v11  ;;  %v1571_v34 = vld [vmem:[%s5345_s4 + $0xf8] sm:$0xff]  ;;  %v1581_v11 = vld [vmem:[%s5345_s4 + $0x148] sm:$0xff] }
 0x208   : > { %v1398_v45 = vpop.f32.mrf.mxu0  ;;  %2012 = vmatmul.mubr.bf16.gmra.mxu1 %v1642_v16  ;;  %v1611_v39 = vmul.f32 %v3827_v44, %v1563_v37  ;;  %v1570_v37 = vld [vmem:[%s5345_s4 + $0xf0] sm:$0xff] }
 0x209   : > { %v1609_v41 = vmul.f32 %v1561_v38, %v1398_v45  ;;  %v1496_v51 = vpop.f32.mrf.mxu1 }
 0x20a   : > { %v1400_v48 = vpop.f32.mrf.mxu0  ;;  %v1605_v55 = vmul.f32 %v1557_v46, %v1496_v51  ;;  %v1647_v47 = vpack.c.bf16 %v1611_v39, %v1608_v40 }
 0x20b   : > { %v1610_v56 = vmul.f32 %v1562_v49, %v1400_v48  ;;  %v3830_v28 = vpop.f32.mrf.mxu1  ;;  %v1645_v52 = vpack.c.bf16 %v1609_v41, %v1606_v43  ;;  %v1577_v43 = vld [vmem:[%s5345_s4 + $0x128] sm:$0xff] }
 0x20c   : > { %v1404_v57 = vpop.f32.mrf.mxu0  ;;  %v1644_v58 = vpack.c.bf16 %v1605_v55, %v1602_v53  ;;  %v1620_v4 = vmul.f32 %v3830_v28, %v1572_v33  ;;  %v1576_v28 = vld [vmem:[%s5345_s4 + $0x120] sm:$0xff] }
 0x20d   : > { %v1646_v32 = vpack.c.bf16 %v1610_v56, %v1607_v54  ;;  %v1509_v62 = vpop.f32.mrf.mxu1  ;;  %v1612_v23 = vmul.f32 %v1564_v9, %v1404_v57  ;;  %v1579_v56 = vld [vmem:[%s5345_s4 + $0x138] sm:$0xff]  ;;  %v1580_v57 = vld [vmem:[%s5345_s4 + $0x140] sm:$0xff] }
 0x20e   : > { %v1406_v60 = vpop.f32.mrf.mxu0  ;;  %3854 = vmatprep.mubr.msk.bf16.mxu0 %vm981_vm1, %v1644_v58  ;;  %v1614_v10 = vmul.f32 %v1566_v63, %v1509_v62 }
 0x20f   : > { %2019 = vmatprep.mubr.bf16.mxu1 %v1646_v32  ;;  %3855 = vmatmul.mubr.msk.bf16.gmra.mxu0 %vm981_vm1, %v1647_v47  ;;  %v3831_v7 = vpop.f32.mrf.mxu1  ;;  %v1613_v18 = vmul.f32 %v1565_v2, %v1406_v60  ;;  %v1585_v2 = vld [vmem:[%s5345_s4 + $0x168] sm:$0xff] }
 0x210   : > { %v1408_v5 = vpop.f32.mrf.mxu0  ;;  %2020 = vmatmul.mubr.bf16.gmra.mxu1 %v1645_v52  ;;  %v1623_v13 = vmul.f32 %v3831_v7, %v1575_v0  ;;  %v1582_v7 = vld [vmem:[%s5345_s4 + $0x150] sm:$0xff] }
 0x211   : > { %v1615_v14 = vmul.f32 %v1567_v1, %v1408_v5  ;;  %v1512_v3 = vpop.f32.mrf.mxu1 }
 0x212   : > { %v1410_v17 = vpop.f32.mrf.mxu0  ;;  %v1617_v20 = vmul.f32 %v1569_v8, %v1512_v3  ;;  %v1653_v24 = vpack.c.bf16 %v1623_v13, %v1620_v4  ;;  %v1583_v4 = vld [vmem:[%s5345_s4 + $0x158] sm:$0xff] }
 0x213   : > { %v1616_v19 = vmul.f32 %v1568_v6, %v1410_v17  ;;  %v3834_v25 = vpop.f32.mrf.mxu1  ;;  %v1648_v27 = vpack.c.bf16 %v1615_v14, %v1612_v23  ;;  %v1586_v6 = vld [vmem:[%s5345_s4 + $0x170] sm:$0xff] }
 0x214   : > { %v1414_v61 = vpop.f32.mrf.mxu0  ;;  %v1650_v22 = vpack.c.bf16 %v1617_v20, %v1614_v10  ;;  %v1632_v12 = vmul.f32 %v3834_v25, %v1584_v26  ;;  %v2173_v20 = vld [vmem:[%s5348_s7] sm:$0xff] }
 0x215   : > { %v1649_v15 = vpack.c.bf16 %v1616_v19, %v1613_v18  ;;  %v1525_v30 = vpop.f32.mrf.mxu1  ;;  %v1618_v53 = vmul.f32 %v1570_v37, %v1414_v61  ;;  %v2175_v18 = vld [vmem:[%s5348_s7 + $0x10] sm:$0xf]  ;;  %v2174_v19 = vld [vmem:[%s5348_s7 + $0x8] sm:$0xff] }
 0x216   : > { %v1416_v29 = vpop.f32.mrf.mxu0  ;;  %3858 = vmatprep.mubr.msk.bf16.mxu0 %vm981_vm1, %v1650_v22  ;;  %v1626_v38 = vmul.f32 %v1578_v21, %v1525_v30  ;;  %3866 = vmatprep.subr.msk.mxu0 %vm988_vm0, %v2175_v18  ;;  %v1724_v22 = vpop.permute.xlu0 %1723 }
 0x217   : > { %2027 = vmatprep.mubr.bf16.mxu1 %v1649_v15  ;;  %v3835_v36 = vpop.f32.mrf.mxu1  ;;  %3859 = vmatmul.mubr.msk.bf16.gmra.mxu0 %vm981_vm1, %v1653_v24  ;;  %v1619_v46 = vmul.f32 %v1571_v34, %v1416_v29  ;;  %v1734_v30 = vpop.permute.xlu1 %1733 }
 0x218   : > { %v1418_v16 = vpop.f32.mrf.mxu0  ;;  %2028 = vmatmul.mubr.bf16.gmra.mxu1 %v1648_v27  ;;  %v1635_v40 = vmul.f32 %v3835_v36, %v1587_v31  ;;  %3867 = vmatpush3.msk.msra.mxu0 %vm988_vm0, %v2175_v18 }
 0x219   : > { %v1621_v42 = vmul.f32 %v1573_v59, %v1418_v16  ;;  %v1528_v45 = vpop.f32.mrf.mxu1  ;;  %3868 = vmatprep.subr.mxu0 %v2174_v19 }
 0x21a   : > { %v1420_v44 = vpop.f32.mrf.mxu0  ;;  %v1629_v50 = vmul.f32 %v1581_v11, %v1528_v45  ;;  %v1659_v39 = vpack.c.bf16 %v1635_v40, %v1632_v12  ;;  %3869 = vmatpush3.msra.mxu0 %v2174_v19  ;;  %v1729_v59 = vpop.permute.xlu0 %1728 }
 0x21b   : > { %v1622_v49 = vmul.f32 %v1574_v35, %v1420_v44  ;;  %v1651_v54 = vpack.c.bf16 %v1621_v42, %v1618_v53  ;;  %3870 = vmatprep.subr.mxu0 %v2173_v20  ;;  %v1739_v40 = vpop.permute.xlu1 %1738 }
 0x21c   : > { %v1424_v41 = vpop.f32.mrf.mxu0  ;;  %v1656_v48 = vpack.c.bf16 %v1629_v50, %v1626_v38  ;;  %3871 = vmatpush3.msra.mxu0 %v2173_v20 }
 0x21d   : > { %v1652_v51 = vpack.c.bf16 %v1622_v49, %v1619_v46  ;;  %v1624_v60 = vmul.f32 %v1576_v28, %v1424_v41 }
 0x21e   : > { %v1426_v55 = vpop.f32.mrf.mxu0  ;;  %3862 = vmatprep.mubr.msk.bf16.mxu0 %vm981_vm1, %v1656_v48  ;;  %v1744_v49 = vpop.permute.xlu0 %1743 }
 0x21f   : > { %2035 = vmatprep.mubr.bf16.mxu1 %v1652_v51  ;;  %3863 = vmatmul.mubr.msk.bf16.gmra.mxu0 %vm981_vm1, %v1659_v39  ;;  %v1625_v33 = vmul.f32 %v1577_v43, %v1426_v55  ;;  %v1749_v43 = vpop.permute.xlu1 %1748 }
 0x220   : > { %v1428_v47 = vpop.f32.mrf.mxu0  ;;  %2036 = vmatmul.mubr.bf16.gmra.mxu1 %v1651_v54 }
 0x221   : > { %v1627_v58 = vmul.f32 %v1579_v56, %v1428_v47 }
 0x222   : > { %v1430_v32 = vpop.f32.mrf.mxu0 }
 0x223   : > { %v1628_v52 = vmul.f32 %v1580_v57, %v1430_v32  ;;  %v1654_v0 = vpack.c.bf16 %v1627_v58, %v1624_v60  ;;  %v1754_v60 = vpop.permute.xlu0 %1753 }
 0x224   : > { %v1434_v62 = vpop.f32.mrf.mxu0 }
 0x225   : > { %v1655_v63 = vpack.c.bf16 %v1628_v52, %v1625_v33  ;;  %v1630_v14 = vmul.f32 %v1582_v7, %v1434_v62 }
 0x226   : > { %v1436_v1 = vpop.f32.mrf.mxu0 }
 0x227   : > { %2043 = vmatprep.mubr.bf16.mxu1 %v1655_v63  ;;  %v1631_v10 = vmul.f32 %v1583_v4, %v1436_v1 }
 0x228   : > { %v1438_v5 = vpop.f32.mrf.mxu0  ;;  %2044 = vmatmul.mubr.bf16.gmra.mxu1 %v1654_v0 }
 0x229   : > { %v1633_v8 = vmul.f32 %v1585_v2, %v1438_v5 }
 0x22a   : > { %v1440_v9 = vpop.f32.mrf.mxu0 }
 0x22b   : > { %v1634_v13 = vmul.f32 %v1586_v6, %v1440_v9  ;;  %v1657_v3 = vpack.c.bf16 %v1633_v8, %v1630_v14  ;;  %v1759_v9 = vpop.permute.xlu1 %1758 }
 0x22d   : > { %v1658_v17 = vpack.c.bf16 %v1634_v13, %v1631_v10 }
 0x22f   : > { %2051 = vmatprep.mubr.bf16.mxu1 %v1658_v17 }
 0x230   : > { %2052 = vmatmul.mubr.bf16.gmra.mxu1 %v1657_v3 }
 0x2b8   : > { %v3646_v23 = vpop.f32.mrf.mxu1 }
 0x2ba   : > { %v3647_v24 = vpop.f32.mrf.mxu1 }
 0x2bb   : > { %v3648_v29 = vadd.f32 %v3647_v24, %v3646_v23 }
 0x2bc   : > { %v3649_v61 = vpop.f32.mrf.mxu1 }
 0x2bd   : > { %v1998_v16 = vadd.f32 %v3648_v29, %v1724_v22 }
 0x2be   : > { %v3650_v25 = vpop.f32.mrf.mxu1 }
 0x2bf   : > { %v3651_v35 = vadd.f32 %v3650_v25, %v3649_v61  ;;  %v1764_v61 = vpop.permute.xlu0 %1763 }
 0x2c0   : > { %v3652_v15 = vpop.f32.mrf.mxu1 }
 0x2c1   : > { %v2001_v46 = vadd.f32 %v3651_v35, %v1729_v59 }
 0x2c2   : > { %v3653_v26 = vpop.f32.mrf.mxu1 }
 0x2c3   : > { %v3654_v21 = vadd.f32 %v3653_v26, %v3652_v15 }
 0x2c4   : > { %v3655_v27 = vpop.f32.mrf.mxu1 }
 0x2c5   : > { %v2006_v11 = vadd.f32 %v3654_v21, %v1734_v30  ;;  %v1769_v21 = vpop.permute.xlu1 %1768 }
 0x2c6   : > { %v3656_v31 = vpop.f32.mrf.mxu1 }
 0x2c7   : > { %v3852_v34 = vpop.f32.mrf.mxu0  ;;  %v3657_v36 = vadd.f32 %v3656_v31, %v3655_v27 }
 0x2c8   : > { %v3658_v12 = vpop.f32.mrf.mxu1  ;;  %v2103_v41 = vadd.f32 %v3852_v34, %v2006_v11 }
 0x2c9   : > { %v2094_v37 = vpop.f32.mrf.mxu0  ;;  %v2009_v39 = vadd.f32 %v3657_v36, %v1739_v40 }
 0x2ca   : > { %v3659_v38 = vpop.f32.mrf.mxu1  ;;  %v2095_v42 = vadd.f32 %v2094_v37, %v1998_v16  ;;  %v2159_v32 = vmax.f32 %v2103_v41, 0.0 }
 0x2cb   : > { %v3853_v44 = vpop.f32.mrf.mxu0  ;;  %v3660_v53 = vadd.f32 %v3659_v38, %v3658_v12  ;;  %v1774_v38 = vpop.permute.xlu0 %1773 }
 0x2cc   : > { %v3661_v45 = vpop.f32.mrf.mxu1  ;;  %v2157_v50 = vmax.f32 %v2095_v42, 0.0  ;;  %v2106_v47 = vadd.f32 %v3853_v44, %v2009_v39 }
 0x2cd   : > { %v2097_v51 = vpop.f32.mrf.mxu0  ;;  %v2014_v58 = vadd.f32 %v3660_v53, %v1744_v49  ;;  %v1779_v53 = vpop.permute.xlu1 %1778 }
 0x2ce   : > { %v3662_v48 = vpop.f32.mrf.mxu1  ;;  %v2098_v54 = vadd.f32 %v2097_v51, %v2001_v46  ;;  %3872 = vmatprep.mubr.msk.f32.mxu0 %vm2176_vm3, %v2157_v50  ;;  %v2160_v2 = vmax.f32 %v2106_v47, 0.0 }
 0x2cf   : > { %v3856_v55 = vpop.f32.mrf.mxu0  ;;  %v3663_v28 = vadd.f32 %v3662_v48, %v3661_v45 }
 0x2d0   : > { %v3664_v56 = vpop.f32.mrf.mxu1  ;;  %v2158_v57 = vmax.f32 %v2098_v54, 0.0 }
 0x2d1   : > { %v2110_v33 = vpop.f32.mrf.mxu0  ;;  %v2017_v6 = vadd.f32 %v3663_v28, %v1749_v43  ;;  %v1784_v43 = vpop.permute.xlu0 %1783 }
 0x2d2   : > { %v3665_v52 = vpop.f32.mrf.mxu1  ;;  %v2111_v62 = vadd.f32 %v2110_v33, %v2014_v58  ;;  %3873 = vmatmul.mubr.msk.f32.vlgmr.msra.gmra.mxu0 %vm2176_vm3, %v2158_v57 }
 0x2d3   : > { %v3666_v63 = vadd.f32 %v3665_v52, %v3664_v56  ;;  %v3857_v0 = vpop.f32.mrf.mxu0  ;;  %3875 = vmatprep.mubr.msk.f32.mxu0 %vm2176_vm3, %v2159_v32 }
 0x2d4   : > { %v3667_v1 = vpop.f32.mrf.mxu1  ;;  %v2161_v4 = vmax.f32 %v2111_v62, 0.0 }
 0x2d5   : > { %v2022_v5 = vadd.f32 %v3666_v63, %v1754_v60  ;;  %v2113_v7 = vpop.f32.mrf.mxu0  ;;  %v1789_v60 = vpop.permute.xlu1 %1788 }
 0x2d6   : > { %v3668_v8 = vpop.f32.mrf.mxu1  ;;  %v2114_v13 = vadd.f32 %v2113_v7, %v2017_v6  ;;  %3876 = vmatmul.mubr.msk.f32.gmra.mxu0 %vm2176_vm3, %v2160_v2  ;;  %v1794_v6 = vpop.permute.xlu0 %1793 }
 0x2d7   : > { %v2119_v10 = vadd.f32 %v3856_v55, %v2022_v5  ;;  %v3669_v14 = vadd.f32 %v3668_v8, %v3667_v1  ;;  %3878 = vmatprep.mubr.msk.f32.mxu0 %vm2176_vm3, %v2161_v4  ;;  %v3860_v3 = vpop.f32.mrf.mxu0 }
 0x2d8   : > { %v3670_v17 = vpop.f32.mrf.mxu1  ;;  %v2162_v19 = vmax.f32 %v2114_v13, 0.0 }
 0x2d9   : > { %v2163_v18 = vmax.f32 %v2119_v10, 0.0  ;;  %v2025_v20 = vadd.f32 %v3669_v14, %v1759_v9  ;;  %v2126_v24 = vpop.f32.mrf.mxu0 }
 0x2da   : > { %v3671_v23 = vpop.f32.mrf.mxu1  ;;  %3879 = vmatmul.mubr.msk.f32.gmra.mxu0 %vm2176_vm3, %v2162_v19 }
 0x2db   : > { %v2122_v25 = vadd.f32 %v3857_v0, %v2025_v20  ;;  %v3672_v15 = vadd.f32 %v3671_v23, %v3670_v17  ;;  %3881 = vmatprep.mubr.msk.f32.mxu0 %vm2176_vm3, %v2163_v18  ;;  %v3861_v26 = vpop.f32.mrf.mxu0  ;;  %v1799_v17 = vpop.permute.xlu1 %1798  ;;  %v2721_v23 = vld [vmem:[%s5351_s10] sm:$0x3] }
 0x2dc   : > { %v3673_v22 = vpop.f32.mrf.mxu1  ;;  %3957 = vmatprep.subr.msk.mxu0 %vm2770_vm4, %v2721_v23 }
 0x2dd   : > { %v2164_v27 = vmax.f32 %v2122_v25, 0.0  ;;  %v2030_v29 = vadd.f32 %v3672_v15, %v1764_v61  ;;  %v2129_v12 = vpop.f32.mrf.mxu0  ;;  %3958 = vmatpush3.msk.msra.mxu0 %vm2770_vm4, %v2721_v23 }
 0x2de   : > { %v3674_v30 = vpop.f32.mrf.mxu1 }
 0x2df   : > { %v2127_v31 = vadd.f32 %v2126_v24, %v2030_v29  ;;  %v3675_v59 = vadd.f32 %v3674_v30, %v3673_v22  ;;  %3882 = vmatmul.mubr.msk.f32.gmra.mxu0 %vm2176_vm3, %v2164_v27  ;;  %v3864_v45 = vpop.f32.mrf.mxu0  ;;  %v4173_v24 = vmov 0.0  }
 0x2e0   : > { %v3676_v34 = vpop.f32.mrf.mxu1  ;;  %3896 = vmatprep.subr.mxu1 %v4173_v24  ;;  %3928 = vmatprep.mubr.msk.f32.mxu1 %vm4174_vm6, %v4173_v24 }
 0x2e1   : > { %v2165_v16 = vmax.f32 %v2127_v31, 0.0  ;;  %v2033_v35 = vadd.f32 %v3675_v59, %v1769_v21  ;;  %v2142_v48 = vpop.f32.mrf.mxu0 }
 0x2e2   : > { %v3677_v36 = vpop.f32.mrf.mxu1 }
 0x2e3   : > { %v2130_v11 = vadd.f32 %v2129_v12, %v2033_v35  ;;  %v3678_v37 = vadd.f32 %v3677_v36, %v3676_v34  ;;  %3884 = vmatprep.mubr.msk.f32.mxu0 %vm2176_vm3, %v2165_v16  ;;  %v3865_v58 = vpop.f32.mrf.mxu0 }
 0x2e4   : > { %v3679_v40 = vpop.f32.mrf.mxu1 }
 0x2e5   : > { %v2166_v42 = vmax.f32 %v2130_v11, 0.0  ;;  %v2038_v44 = vadd.f32 %v3678_v37, %v1774_v38  ;;  %v2145_v1 = vpop.f32.mrf.mxu0 }
 0x2e6   : > { %v3680_v46 = vpop.f32.mrf.mxu1 }
 0x2e7   : > { %v2135_v49 = vadd.f32 %v3860_v3, %v2038_v44  ;;  %v3681_v50 = vadd.f32 %v3680_v46, %v3679_v40  ;;  %3885 = vmatmul.mubr.msk.f32.gmra.mxu0 %vm2176_vm3, %v2166_v42 }
 0x2e8   : > { %v3682_v39 = vpop.f32.mrf.mxu1 }
 0x2e9   : > { %v2167_v41 = vmax.f32 %v2135_v49, 0.0  ;;  %v2041_v51 = vadd.f32 %v3681_v50, %v1779_v53 }
 0x2ea   : > { %v3683_v54 = vpop.f32.mrf.mxu1 }
 0x2eb   : > { %v2138_v55 = vadd.f32 %v3861_v26, %v2041_v51  ;;  %v3684_v56 = vadd.f32 %v3683_v54, %v3682_v39  ;;  %3887 = vmatprep.mubr.msk.f32.mxu0 %vm2176_vm3, %v2167_v41 }
 0x2ec   : > { %v3685_v47 = vpop.f32.mrf.mxu1 }
 0x2ed   : > { %v2168_v57 = vmax.f32 %v2138_v55, 0.0  ;;  %v2046_v28 = vadd.f32 %v3684_v56, %v1784_v43 }
 0x2ee   : > { %v3686_v32 = vpop.f32.mrf.mxu1 }
 0x2ef   : > { %v2143_v33 = vadd.f32 %v2142_v48, %v2046_v28  ;;  %v3687_v52 = vadd.f32 %v3686_v32, %v3685_v47  ;;  %3888 = vmatmul.mubr.msk.f32.gmra.mxu0 %vm2176_vm3, %v2168_v57 }
 0x2f0   : > { %v3688_v62 = vpop.f32.mrf.mxu1 }
 0x2f1   : > { %v2169_v63 = vmax.f32 %v2143_v33, 0.0  ;;  %v2049_v0 = vadd.f32 %v3687_v52, %v1789_v60 }
 0x2f2   : > { %v3689_v2 = vpop.f32.mrf.mxu1 }
 0x2f3   : > { %v2146_v4 = vadd.f32 %v2145_v1, %v2049_v0  ;;  %v3690_v5 = vadd.f32 %v3689_v2, %v3688_v62  ;;  %3890 = vmatprep.mubr.msk.f32.mxu0 %vm2176_vm3, %v2169_v63 }
 0x2f4   : > { %v3691_v7 = vpop.f32.mrf.mxu1 }
 0x2f5   : > { %v2170_v8 = vmax.f32 %v2146_v4, 0.0  ;;  %v2054_v9 = vadd.f32 %v3690_v5, %v1794_v6 }
 0x2f6   : > { %v3692_v10 = vpop.f32.mrf.mxu1 }
 0x2f7   : > { %v2151_v13 = vadd.f32 %v3864_v45, %v2054_v9  ;;  %v3693_v14 = vadd.f32 %v3692_v10, %v3691_v7  ;;  %3891 = vmatmul.mubr.msk.f32.gmra.mxu0 %vm2176_vm3, %v2170_v8 }
 0x2f9   : > { %v2171_v3 = vmax.f32 %v2151_v13, 0.0  ;;  %v2057_v18 = vadd.f32 %v3693_v14, %v1799_v17 }
 0x2fb   : > { %v2154_v19 = vadd.f32 %v3865_v58, %v2057_v18  ;;  %3893 = vmatprep.mubr.msk.f32.mxu0 %vm2176_vm3, %v2171_v3 }
 0x2fd   : > { %v2172_v20 = vmax.f32 %v2154_v19, 0.0 }
 0x2ff   : > { %3894 = vmatmul.mubr.msk.f32.gmra.mxu0 %vm2176_vm3, %v2172_v20 }
 0x392   : > { %v4922_v61 = vpop.f32.mrf.mxu0 }
 0x393   : > { %3108 = vst.msk [vmem:[%s4920_s24 + $0x8] sm:$0xff] %vm2389_vm5, %v4922_v61  ;;  %v2374_v52 = vmul.f32 %v4922_v61, %v4922_v61 }
 0x394   : > { %v4927_v25 = vpop.f32.mrf.mxu0 }
 0x395   : > { %3107 = vst.msk [vmem:[%s4920_s24] sm:$0xff] %vm2389_vm5, %v4927_v25  ;;  %3959 = vmatprep.mubr.msk.f32.mxu0 %vm2389_vm5, %v4927_v25  ;;  %v2393_v63 = vsel %vm2389_vm5, %v2374_v52, 0.0  ;;  %v2373_v1 = vmul.f32 %v4927_v25, %v4927_v25  ;;  %v2933_v52 = vld [vmem:[%s5352_s11 + $0x70] sm:$0xff] }
 0x396   : > { %v4934_v15 = vpop.f32.mrf.mxu0  ;;  %3960 = vmatmul.mubr.msk.f32.vlgmr.msra.gmra.mxu0 %vm2389_vm5, %v4922_v61 }
 0x397   : > { %3110 = vst.msk [vmem:[%s4920_s24 + $0x18] sm:$0xff] %vm2389_vm5, %v4934_v15  ;;  %v2376_v28 = vmul.f32 %v4934_v15, %v4934_v15  ;;  %v2390_v2 = vsel %vm2389_vm5, %v2373_v1, 0.0  ;;  %v2514_v1 = vld [vmem:[%s5350_s9 + $0x18] sm:$0xff] }
 0x398   : > { %v4941_v22 = vpop.f32.mrf.mxu0 }
 0x399   : > { %3109 = vst.msk [vmem:[%s4920_s24 + $0x10] sm:$0xff] %vm2389_vm5, %v4941_v22  ;;  %3962 = vmatprep.mubr.msk.f32.mxu0 %vm2389_vm5, %v4941_v22  ;;  %v2399_v33 = vsel %vm2389_vm5, %v2376_v28, 0.0  ;;  %v2375_v62 = vmul.f32 %v4941_v22, %v4941_v22  ;;  %v2934_v28 = vld [vmem:[%s5352_s11 + $0x78] sm:$0xff] }
 0x39a   : > { %v4948_v26 = vpop.f32.mrf.mxu0  ;;  %3963 = vmatmul.mubr.msk.f32.gmra.mxu0 %vm2389_vm5, %v4934_v15 }
 0x39b   : > { %3112 = vst.msk [vmem:[%s4920_s24 + $0x28] sm:$0xff] %vm2389_vm5, %v4948_v26  ;;  %v2378_v56 = vmul.f32 %v4948_v26, %v4948_v26  ;;  %v2396_v0 = vsel %vm2389_vm5, %v2375_v62, 0.0 }
 0x39c   : > { %v4955_v27 = vpop.f32.mrf.mxu0 }
 0x39d   : > { %3111 = vst.msk [vmem:[%s4920_s24 + $0x20] sm:$0xff] %vm2389_vm5, %v4955_v27  ;;  %3965 = vmatprep.mubr.msk.f32.mxu0 %vm2389_vm5, %v4955_v27  ;;  %v2405_v57 = vsel %vm2389_vm5, %v2378_v56, 0.0  ;;  %v2377_v32 = vmul.f32 %v4955_v27, %v4955_v27 }
 0x39e   : > { %3966 = vmatmul.mubr.msk.f32.gmra.mxu0 %vm2389_vm5, %v4948_v26 }
 0x39f   : > { %v4964_v29 = vpop.f32.mrf.mxu0  ;;  %v2402_v60 = vsel %vm2389_vm5, %v2377_v32, 0.0  ;;  %v2512_v32 = vld [vmem:[%s5350_s9 + $0x8] sm:$0xff] }
 0x3a0   : > { %3114 = vst.msk [vmem:[%s4920_s24 + $0x38] sm:$0xff] %vm2389_vm5, %v4964_v29  ;;  %v2380_v51 = vmul.f32 %v4964_v29, %v4964_v29 }
 0x3a1   : > { %v4969_v30 = vpop.f32.mrf.mxu0 }
 0x3a2   : > { %3113 = vst.msk [vmem:[%s4920_s24 + $0x30] sm:$0xff] %vm2389_vm5, %v4969_v30  ;;  %3968 = vmatprep.mubr.msk.f32.mxu0 %vm2389_vm5, %v4969_v30  ;;  %v2411_v55 = vsel %vm2389_vm5, %v2380_v51, 0.0  ;;  %v2379_v47 = vmul.f32 %v4969_v30, %v4969_v30 }
 0x3a3   : > { %3969 = vmatmul.mubr.msk.f32.gmra.mxu0 %vm2389_vm5, %v4964_v29 }
 0x3a4   : > { %v2408_v58 = vsel %vm2389_vm5, %v2379_v47, 0.0 }
 0x3a7   : > { %v4978_v21 = vpop.f32.mrf.mxu0 }
 0x3a8   : > { %3116 = vst.msk [vmem:[%s4920_s24 + $0x48] sm:$0xff] %vm2389_vm5, %v4978_v21  ;;  %v2382_v50 = vmul.f32 %v4978_v21, %v4978_v21 }
 0x3a9   : > { %v4983_v31 = vpop.f32.mrf.mxu0 }
 0x3aa   : > { %3115 = vst.msk [vmem:[%s4920_s24 + $0x40] sm:$0xff] %vm2389_vm5, %v4983_v31  ;;  %3971 = vmatprep.mubr.msk.f32.mxu0 %vm2389_vm5, %v4983_v31  ;;  %v2417_v41 = vsel %vm2389_vm5, %v2382_v50, 0.0  ;;  %v2381_v54 = vmul.f32 %v4983_v31, %v4983_v31 }
 0x3ab   : > { %3972 = vmatmul.mubr.msk.f32.gmra.mxu0 %vm2389_vm5, %v4978_v21 }
 0x3ac   : > { %v2414_v43 = vsel %vm2389_vm5, %v2381_v54, 0.0 }
 0x3af   : > { %v4992_v59 = vpop.f32.mrf.mxu0 }
 0x3b0   : > { %3118 = vst.msk [vmem:[%s4920_s24 + $0x58] sm:$0xff] %vm2389_vm5, %v4992_v59  ;;  %v2384_v44 = vmul.f32 %v4992_v59, %v4992_v59 }
 0x3b1   : > { %v4997_v34 = vpop.f32.mrf.mxu0 }
 0x3b2   : > { %3117 = vst.msk [vmem:[%s4920_s24 + $0x50] sm:$0xff] %vm2389_vm5, %v4997_v34  ;;  %3974 = vmatprep.mubr.msk.f32.mxu0 %vm2389_vm5, %v4997_v34  ;;  %v2423_v49 = vsel %vm2389_vm5, %v2384_v44, 0.0  ;;  %v2383_v39 = vmul.f32 %v4997_v34, %v4997_v34 }
 0x3b3   : > { %3975 = vmatmul.mubr.msk.f32.gmra.mxu0 %vm2389_vm5, %v4992_v59 }
 0x3b4   : > { %v2420_v48 = vsel %vm2389_vm5, %v2383_v39, 0.0 }
 0x3b7   : > { %v5006_v12 = vpop.f32.mrf.mxu0 }
 0x3b8   : > { %3120 = vst.msk [vmem:[%s4920_s24 + $0x68] sm:$0xff] %vm2389_vm5, %v5006_v12  ;;  %v2386_v40 = vmul.f32 %v5006_v12, %v5006_v12 }
 0x3b9   : > { %v5011_v16 = vpop.f32.mrf.mxu0 }
 0x3ba   : > { %3119 = vst.msk [vmem:[%s4920_s24 + $0x60] sm:$0xff] %vm2389_vm5, %v5011_v16  ;;  %3977 = vmatprep.mubr.msk.f32.mxu0 %vm2389_vm5, %v5011_v16  ;;  %v2429_v45 = vsel %vm2389_vm5, %v2386_v40, 0.0  ;;  %v2385_v46 = vmul.f32 %v5011_v16, %v5011_v16 }
 0x3bb   : > { %3978 = vmatmul.mubr.msk.f32.gmra.mxu0 %vm2389_vm5, %v5006_v12 }
 0x3bc   : > { %v2426_v53 = vsel %vm2389_vm5, %v2385_v46, 0.0 }
 0x3bf   : > { %v5020_v35 = vpop.f32.mrf.mxu0 }
 0x3c0   : > { %3122 = vst.msk [vmem:[%s4920_s24 + $0x78] sm:$0xff] %vm2389_vm5, %v5020_v35  ;;  %v2388_v36 = vmul.f32 %v5020_v35, %v5020_v35 }
 0x3c1   : > { %v5027_v11 = vpop.f32.mrf.mxu0 }
 0x3c2   : > { %3121 = vst.msk [vmem:[%s4920_s24 + $0x70] sm:$0xff] %vm2389_vm5, %v5027_v11  ;;  %3980 = vmatprep.mubr.msk.f32.mxu0 %vm2389_vm5, %v5027_v11  ;;  %v2435_v37 = vsel %vm2389_vm5, %v2388_v36, 0.0  ;;  %v2387_v38 = vmul.f32 %v5027_v11, %v5027_v11  ;;  %v5101_v36 = vld [vmem:[%s5349_s8] sm:$0xff] }
 0x3c3   : > { %2436 = vadd.xlane.f32.xlu0 %v2435_v37  ;;  %3981 = vmatmul.mubr.msk.f32.gmra.mxu0 %vm2389_vm5, %v5020_v35 }
 0x3c4   : > { %v2432_v42 = vsel %vm2389_vm5, %v2387_v38, 0.0  ;;  %v2511_v38 = vld [vmem:[%s5350_s9] sm:$0xff] }
 0x3c5   : > { %2433 = vadd.xlane.f32.xlu1 %v2432_v42 }
 0x3c7   : > { %2430 = vadd.xlane.f32.xlu0 %v2429_v45 }
 0x3c9   : > { %2424 = vadd.xlane.f32.xlu1 %v2423_v49 }
 0x3cb   : > { %2427 = vadd.xlane.f32.xlu0 %v2426_v53 }
 0x3cd   : > { %2418 = vadd.xlane.f32.xlu1 %v2417_v41 }
 0x3cf   : > { %2421 = vadd.xlane.f32.xlu0 %v2420_v48 }
 0x3d1   : > { %2412 = vadd.xlane.f32.xlu1 %v2411_v55 }
 0x3d3   : > { %2415 = vadd.xlane.f32.xlu0 %v2414_v43 }
 0x3d5   : > { %2406 = vadd.xlane.f32.xlu1 %v2405_v57 }
 0x3d7   : > { %2409 = vadd.xlane.f32.xlu0 %v2408_v58 }
 0x3d9   : > { %2400 = vadd.xlane.f32.xlu1 %v2399_v33 }
 0x3db   : > { %2403 = vadd.xlane.f32.xlu0 %v2402_v60  ;;  %v2513_v60 = vld [vmem:[%s5350_s9 + $0x10] sm:$0xff] }
 0x3dd   : > { %2394 = vadd.xlane.f32.xlu1 %v2393_v63  ;;  %v2932_v63 = vld [vmem:[%s5352_s11 + $0x68] sm:$0xff] }
 0x3df   : > { %2397 = vadd.xlane.f32.xlu0 %v2396_v0 }
 0x3e3   : > { %2391 = vadd.xlane.f32.xlu0 %v2390_v2  ;;  %v2931_v2 = vld [vmem:[%s5352_s11 + $0x60] sm:$0xff] }
 0x44c   : > { %v2437_v4 = vpop.xlane.xlu0 %2436 }
 0x44d   : > { %3897 = vmatpush3.msra.mxu1 %v2437_v4  ;;  %v2515_v4 = vld [vmem:[%s5350_s9 + $0x20] sm:$0xff] }
 0x44e   : > { %3898 = vmatprep.subr.mxu1 %v4173_v24  ;;  %v2434_v5 = vpop.xlane.xlu1 %2433 }
 0x44f   : > { %3899 = vmatpush3.msra.mxu1 %v2434_v5 }
 0x450   : > { %v2431_v6 = vpop.xlane.xlu0 %2430  ;;  %3900 = vmatprep.subr.mxu1 %v4173_v24 }
 0x451   : > { %3901 = vmatpush3.msra.mxu1 %v2431_v6  ;;  %v2930_v6 = vld [vmem:[%s5352_s11 + $0x58] sm:$0xff] }
 0x452   : > { %v2425_v7 = vpop.xlane.xlu1 %2424  ;;  %3902 = vmatprep.subr.mxu1 %v4173_v24 }
 0x454   : > { %v2428_v8 = vpop.xlane.xlu0 %2427 }
 0x455   : > { %3903 = vmatpush3.msra.mxu1 %v2428_v8  ;;  %v2516_v8 = vld [vmem:[%s5350_s9 + $0x28] sm:$0xff] }
 0x456   : > { %3904 = vmatprep.subr.mxu1 %v4173_v24  ;;  %v2419_v9 = vpop.xlane.xlu1 %2418  ;;  %v5109_v40 = vpop.f32.mrf.mxu0 }
 0x457   : > { %3905 = vmatpush3.msra.mxu1 %v2425_v7 }
 0x458   : > { %v2422_v10 = vpop.xlane.xlu0 %2421  ;;  %3906 = vmatprep.subr.mxu1 %v4173_v24  ;;  %v5111_v42 = vpop.f32.mrf.mxu0 }
 0x459   : > { %3907 = vmatpush3.msra.mxu1 %v2422_v10  ;;  %v2517_v10 = vld [vmem:[%s5350_s9 + $0x30] sm:$0xff] }
 0x45a   : > { %3908 = vmatprep.subr.mxu1 %v4173_v24  ;;  %v2413_v13 = vpop.xlane.xlu1 %2412  ;;  %v5113_v44 = vpop.f32.mrf.mxu0 }
 0x45b   : > { %3909 = vmatpush3.msra.mxu1 %v2419_v9  ;;  %v2929_v9 = vld [vmem:[%s5352_s11 + $0x50] sm:$0xff] }
 0x45c   : > { %v2416_v14 = vpop.xlane.xlu0 %2415  ;;  %3910 = vmatprep.subr.mxu1 %v4173_v24  ;;  %v5115_v45 = vpop.f32.mrf.mxu0 }
 0x45d   : > { %3911 = vmatpush3.msra.mxu1 %v2416_v14  ;;  %v2928_v14 = vld [vmem:[%s5352_s11 + $0x48] sm:$0xff] }
 0x45e   : > { %3912 = vmatprep.subr.mxu1 %v4173_v24  ;;  %v2407_v17 = vpop.xlane.xlu1 %2406  ;;  %v5117_v46 = vpop.f32.mrf.mxu0 }
 0x45f   : > { %3913 = vmatpush3.msra.mxu1 %v2413_v13 }
 0x460   : > { %v2410_v3 = vpop.xlane.xlu0 %2409  ;;  %3914 = vmatprep.subr.mxu1 %v4173_v24  ;;  %v5119_v49 = vpop.f32.mrf.mxu0 }
 0x461   : > { %3915 = vmatpush3.msra.mxu1 %v2410_v3  ;;  %v2518_v3 = vld [vmem:[%s5350_s9 + $0x38] sm:$0xff] }
 0x462   : > { %3916 = vmatprep.subr.mxu1 %v4173_v24  ;;  %v2401_v18 = vpop.xlane.xlu1 %2400 }
 0x463   : > { %3917 = vmatpush3.msra.mxu1 %v2407_v17  ;;  %v5121_v50 = vpop.f32.mrf.mxu0 }
 0x464   : > { %v2404_v19 = vpop.xlane.xlu0 %2403  ;;  %3918 = vmatprep.subr.mxu1 %v4173_v24 }
 0x465   : > { %3919 = vmatpush3.msra.mxu1 %v2404_v19  ;;  %v5123_v53 = vpop.f32.mrf.mxu0  ;;  %v2519_v19 = vld [vmem:[%s5350_s9 + $0x40] sm:$0xff] }
 0x466   : > { %3920 = vmatprep.subr.mxu1 %v4173_v24  ;;  %v2395_v23 = vpop.xlane.xlu1 %2394 }
 0x467   : > { %3921 = vmatpush3.msra.mxu1 %v2401_v18  ;;  %v2927_v18 = vld [vmem:[%s5352_s11 + $0x40] sm:$0xff] }
 0x468   : > { %v2398_v20 = vpop.xlane.xlu0 %2397  ;;  %3922 = vmatprep.subr.mxu1 %v4173_v24 }
 0x469   : > { %3923 = vmatpush3.msra.mxu1 %v2398_v20 }
 0x46a   : > { %3924 = vmatprep.subr.mxu1 %v4173_v24 }
 0x46b   : > { %3925 = vmatpush3.msra.mxu1 %v2395_v23  ;;  %v3973_v39 = vpop.f32.mrf.mxu0  ;;  %v2926_v23 = vld [vmem:[%s5352_s11 + $0x38] sm:$0xff] }
 0x46c   : > { %v2392_v37 = vpop.xlane.xlu0 %2391  ;;  %3926 = vmatprep.subr.mxu1 %v4173_v24  ;;  %v2944_v20 = vmul.f32 %v3973_v39, %v2928_v14  ;;  %v2925_v39 = vld [vmem:[%s5352_s11 + $0x30] sm:$0xff] }
 0x46d   : > { %3927 = vmatpush3.msra.mxu1 %v2392_v37  ;;  %v2880_v41 = vpop.f32.mrf.mxu0 }
 0x46e   : > { %3929 = vmatmul.mubr.f32.vlgmr.msra.gmra.mxu1 %v5101_v36  ;;  %v2943_v37 = vmul.f32 %v2927_v18, %v2880_v41  ;;  %v2924_v41 = vld [vmem:[%s5352_s11 + $0x28] sm:$0xff] }
 0x46f   : > { %3933 = vmatprep.mubr.msk.f32.mxu1 %vm2527_vm7, %v2511_v38  ;;  %v2520_v38 = vld [vmem:[%s5350_s9 + $0x48] sm:$0xff] }
 0x473   : > { %v3976_v48 = vpop.f32.mrf.mxu0 }
 0x474   : > { %v2946_v13 = vmul.f32 %v3976_v48, %v2930_v6  ;;  %v2942_v48 = vmul.f32 %v5121_v50, %v2926_v23  ;;  %v2923_v50 = vld [vmem:[%s5352_s11 + $0x20] sm:$0xff] }
 0x475   : > { %v2890_v56 = vpop.f32.mrf.mxu0 }
 0x476   : > { %v2945_v17 = vmul.f32 %v2929_v9, %v2890_v56  ;;  %v2523_v56 = vld [vmem:[%s5350_s9 + $0x60] sm:$0xff] }
 0x47b   : > { %v3979_v43 = vpop.f32.mrf.mxu0 }
 0x47c   : > { %v2948_v5 = vmul.f32 %v3979_v43, %v2932_v63  ;;  %v2940_v43 = vmul.f32 %v5117_v46, %v2924_v41  ;;  %v2921_v46 = vld [vmem:[%s5352_s11 + $0x10] sm:$0xff] }
 0x47d   : > { %v2900_v47 = vpop.f32.mrf.mxu0 }
 0x47e   : > { %v2947_v7 = vmul.f32 %v2931_v2, %v2900_v47  ;;  %v2939_v47 = vmul.f32 %v2923_v50, %v5119_v49  ;;  %v2920_v49 = vld [vmem:[%s5352_s11 + $0x8] sm:$0xff] }
 0x483   : > { %v3982_v57 = vpop.f32.mrf.mxu0 }
 0x484   : > { %v2950_v62 = vmul.f32 %v3982_v57, %v2934_v28  ;;  %v2524_v57 = vld [vmem:[%s5350_s9 + $0x68] sm:$0xff]  ;;  %v2525_v28 = vld [vmem:[%s5350_s9 + $0x70] sm:$0xff] }
 0x485   : > { %v2910_v33 = vpop.f32.mrf.mxu0 }
 0x486   : > { %v2949_v0 = vmul.f32 %v2933_v52, %v2910_v33  ;;  %v2526_v33 = vld [vmem:[%s5350_s9 + $0x78] sm:$0xff]  ;;  %v2936_v52 = vmul.f32 %v5109_v40, %v2920_v49  ;;  %v3021_v40 = vld [vmem:[%s5353_s12] sm:$0x3f] }
 0x52e   : > { %v2505_v51 = vpop.f32.mrf.mxu1 }
 0x52f   : > { %v2509_v54 = vmax.f32 %v2505_v51, 1e-24  ;;  %v2521_v51 = vld [vmem:[%s5350_s9 + $0x50] sm:$0xff] }
 0x530   : > { %v3930_v55 = vpop.f32.mrf.mxu1 }
 0x531   : > { %4162 = vrsqrt.f32 %v2509_v54  ;;  %v2941_v54 = vmul.f32 %v2925_v39, %v5123_v53  ;;  %v2522_v55 = vld [vmem:[%s5350_s9 + $0x58] sm:$0xff] }
 0x532   : > { %v2922_v53 = vld [vmem:[%s5352_s11 + $0x18] sm:$0xff] }
 0x53e   : > { %v4163_v58 = vpop.eup %4162 }
 0x53f   : > { %3931 = vmatprep.subr.mxu1 %v4163_v58 }
 0x540   : > { %3932 = vmatpush3.msra.mxu1 %v4163_v58  ;;  %v2938_v58 = vmul.f32 %v5113_v44, %v2922_v53  ;;  %v2919_v44 = vld [vmem:[%s5352_s11] sm:$0xff] }
 0x541   : > { %3934 = vmatmul.mubr.msk.f32.vlgmr.msra.gmra.mxu1 %vm2527_vm7, %v2512_v32  ;;  %3983 = vmatprep.subr.mxu1 %v4173_v24  ;;  %v2937_v32 = vmul.f32 %v2921_v46, %v5115_v45  ;;  %v2935_v45 = vmul.f32 %v2919_v44, %v5111_v42 }
 0x542   : > { %3984 = vmatpush3.msra.mxu1 %v2950_v62  ;;  %3936 = vmatprep.mubr.msk.f32.mxu1 %vm2527_vm7, %v2513_v60 }
 0x543   : > { %3985 = vmatprep.subr.mxu1 %v4173_v24 }
 0x544   : > { %3986 = vmatpush3.msra.mxu1 %v2949_v0 }
 0x545   : > { %3937 = vmatmul.mubr.msk.f32.gmra.mxu1 %vm2527_vm7, %v2514_v1  ;;  %3987 = vmatprep.subr.mxu1 %v4173_v24 }
 0x546   : > { %3988 = vmatpush3.msra.mxu1 %v2948_v5  ;;  %3939 = vmatprep.mubr.msk.f32.mxu1 %vm2527_vm7, %v2515_v4 }
 0x547   : > { %3989 = vmatprep.subr.mxu1 %v4173_v24 }
 0x548   : > { %3990 = vmatpush3.msra.mxu1 %v2947_v7 }
 0x549   : > { %3940 = vmatmul.mubr.msk.f32.gmra.mxu1 %vm2527_vm7, %v2516_v8  ;;  %3991 = vmatprep.subr.mxu1 %v4173_v24 }
 0x54a   : > { %3992 = vmatpush3.msra.mxu1 %v2946_v13  ;;  %3942 = vmatprep.mubr.msk.f32.mxu1 %vm2527_vm7, %v2517_v10 }
 0x54b   : > { %3993 = vmatprep.subr.mxu1 %v4173_v24 }
 0x54c   : > { %3994 = vmatpush3.msra.mxu1 %v2945_v17 }
 0x54d   : > { %3943 = vmatmul.mubr.msk.f32.gmra.mxu1 %vm2527_vm7, %v2518_v3  ;;  %3995 = vmatprep.subr.mxu1 %v4173_v24 }
 0x54e   : > { %3996 = vmatpush3.msra.mxu1 %v2944_v20  ;;  %3945 = vmatprep.mubr.msk.f32.mxu1 %vm2527_vm7, %v2519_v19 }
 0x54f   : > { %3997 = vmatprep.subr.mxu1 %v4173_v24 }
 0x550   : > { %3998 = vmatpush3.msra.mxu1 %v2943_v37 }
 0x551   : > { %3946 = vmatmul.mubr.msk.f32.gmra.mxu1 %vm2527_vm7, %v2520_v38  ;;  %3999 = vmatprep.subr.mxu1 %v4173_v24 }
 0x552   : > { %4000 = vmatpush3.msra.mxu1 %v2942_v48  ;;  %3948 = vmatprep.mubr.msk.f32.mxu1 %vm2527_vm7, %v2521_v51 }
 0x553   : > { %4001 = vmatprep.subr.mxu1 %v4173_v24 }
 0x554   : > { %4002 = vmatpush3.msra.mxu1 %v2941_v54 }
 0x555   : > { %3949 = vmatmul.mubr.msk.f32.gmra.mxu1 %vm2527_vm7, %v2522_v55  ;;  %4003 = vmatprep.subr.mxu1 %v4173_v24 }
 0x556   : > { %4004 = vmatpush3.msra.mxu1 %v2940_v43  ;;  %3951 = vmatprep.mubr.msk.f32.mxu1 %vm2527_vm7, %v2523_v56 }
 0x557   : > { %4005 = vmatprep.subr.mxu1 %v4173_v24 }
 0x558   : > { %4006 = vmatpush3.msra.mxu1 %v2939_v47 }
 0x559   : > { %3952 = vmatmul.mubr.msk.f32.gmra.mxu1 %vm2527_vm7, %v2524_v57  ;;  %4007 = vmatprep.subr.mxu1 %v4173_v24 }
 0x55a   : > { %4008 = vmatpush3.msra.mxu1 %v2938_v58  ;;  %3954 = vmatprep.mubr.msk.f32.mxu1 %vm2527_vm7, %v2525_v28 }
 0x55b   : > { %4009 = vmatprep.subr.mxu1 %v4173_v24 }
 0x55c   : > { %4010 = vmatpush3.msra.mxu1 %v2937_v32 }
 0x55d   : > { %3955 = vmatmul.mubr.msk.f32.gmra.mxu1 %vm2527_vm7, %v2526_v33  ;;  %4011 = vmatprep.subr.mxu1 %v4173_v24 }
 0x55e   : > { %4012 = vmatpush3.msra.mxu1 %v2936_v52  ;;  %4015 = vmatprep.mubr.msk.f32.mxu1 %vm4174_vm6, %v4173_v24 }
 0x55f   : > { %4013 = vmatprep.subr.mxu1 %v4173_v24 }
 0x560   : > { %4014 = vmatpush3.msra.mxu1 %v2935_v45 }
 0x561   : > { %4016 = vmatmul.mubr.f32.vlgmr.msra.gmra.mxu1 %v5101_v36  ;;  %4018 = vmatprep.subr.mxu1 %v4173_v24 }
 0x562   : > { %4020 = vmatprep.mubr.msk.f32.mxu1 %vm4174_vm6, %v4173_v24  ;;  %4019 = vmatpush3.msk.msra.mxu1 %vm3033_vm8, %v3021_v40 }
 0x601   : > { %v3935_v42 = vpop.f32.mrf.mxu1 }
 0x602   : > { %3130 = vperm.xlu0 %4038, %v3935_v42  }
 0x603   : > { %v2642_v60 = vpop.f32.mrf.mxu1 }
 0x604   : > { %3125 = vperm.xlu1 %4039, %v2642_v60  }
 0x605   : > { %v3938_v62 = vpop.f32.mrf.mxu1 }
 0x607   : > { %v2652_v63 = vpop.f32.mrf.mxu1 }
 0x608   : > { %3140 = vperm.xlu1 %4039, %v3938_v62  }
 0x609   : > { %v3941_v0 = vpop.f32.mrf.mxu1 }
 0x60b   : > { %v2662_v36 = vpop.f32.mrf.mxu1 }
 0x60c   : > { %3135 = vperm.xlu1 %4039, %v2652_v63   ;;  %3145 = vperm.xlu0 %4038, %v2662_v36  }
 0x60d   : > { %v3944_v1 = vpop.f32.mrf.mxu1 }
 0x60f   : > { %v2672_v2 = vpop.f32.mrf.mxu1 }
 0x610   : > { %3150 = vperm.xlu1 %4039, %v3941_v0   ;;  %3155 = vperm.xlu0 %4038, %v2672_v2  }
 0x611   : > { %v3947_v24 = vpop.f32.mrf.mxu1 }
 0x613   : > { %v2682_v4 = vpop.f32.mrf.mxu1 }
 0x614   : > { %3160 = vperm.xlu1 %4039, %v3944_v1   ;;  %3165 = vperm.xlu0 %4038, %v2682_v4  }
 0x615   : > { %v3950_v5 = vpop.f32.mrf.mxu1 }
 0x617   : > { %v2692_v6 = vpop.f32.mrf.mxu1 }
 0x618   : > { %3170 = vperm.xlu1 %4039, %v3947_v24   ;;  %3175 = vperm.xlu0 %4038, %v2692_v6  }
 0x619   : > { %v3953_v7 = vpop.f32.mrf.mxu1 }
 0x61b   : > { %v2702_v8 = vpop.f32.mrf.mxu1 }
 0x61c   : > { %3180 = vperm.xlu1 %4039, %v3950_v5   ;;  %3185 = vperm.xlu0 %4038, %v2702_v8  }
 0x61d   : > { %v3956_v9 = vpop.f32.mrf.mxu1 }
 0x61f   : > { %v2712_v10 = vpop.f32.mrf.mxu1 }
 0x620   : > { %3190 = vperm.xlu1 %4039, %v3953_v7   ;;  %3195 = vperm.xlu0 %4038, %v2712_v10  }
 0x621   : > { %v3017_v13 = vpop.f32.mrf.mxu1 }
 0x622   : > { %4021 = vmatmul.mubr.msk.f32.vlgmr.msra.gmra.mxu1 %vm3029_vm9, %v3017_v13 }
 0x623   : > { %v4017_v14 = vpop.f32.mrf.mxu1 }
 0x624   : > { %3200 = vperm.xlu1 %4039, %v3956_v9  }
 0x67d   : > { %v3131_v17 = vpop.permute.xlu0 %3130 }
 0x67e   : > { %v3204_v3 = vmul.f32 %v4922_v61, %v3131_v17 }
 0x67f   : > { %v3126_v18 = vpop.permute.xlu1 %3125 }
 0x680   : > { %v3203_v19 = vmul.f32 %v3126_v18, %v4927_v25  ;;  %3237 = vrot.lane.b32.xlu1 %v3204_v3, %s4175_s23 }
 0x682   : > { %3235 = vrot.lane.b32.xlu0 %v3203_v19, %s4175_s23 }
 0x683   : > { %v3141_v20 = vpop.permute.xlu1 %3140 }
 0x684   : > { %v3206_v23 = vmul.f32 %v4934_v15, %v3141_v20 }
 0x686   : > { %3241 = vrot.lane.b32.xlu1 %v3206_v23, %s4175_s23 }
 0x687   : > { %v3136_v37 = vpop.permute.xlu1 %3135  ;;  %v3146_v38 = vpop.permute.xlu0 %3145 }
 0x688   : > { %v3205_v39 = vmul.f32 %v3136_v37, %v4941_v22  ;;  %v3207_v25 = vmul.f32 %v3146_v38, %v4955_v27 }
 0x68a   : > { %3239 = vrot.lane.b32.xlu0 %v3205_v39, %s4175_s23 }
 0x68b   : > { %v3151_v61 = vpop.permute.xlu1 %3150  ;;  %v3156_v51 = vpop.permute.xlu0 %3155 }
 0x68c   : > { %v3208_v48 = vmul.f32 %v4948_v26, %v3151_v61  ;;  %v3209_v54 = vmul.f32 %v3156_v51, %v4969_v30 }
 0x68e   : > { %3245 = vrot.lane.b32.xlu1 %v3208_v48, %s4175_s23  ;;  %3243 = vrot.lane.b32.xlu0 %v3207_v25, %s4175_s23 }
 0x68f   : > { %v3161_v41 = vpop.permute.xlu1 %3160  ;;  %v3166_v15 = vpop.permute.xlu0 %3165 }
 0x690   : > { %v3210_v55 = vmul.f32 %v4964_v29, %v3161_v41  ;;  %v3211_v27 = vmul.f32 %v3166_v15, %v4983_v31 }
 0x692   : > { %3249 = vrot.lane.b32.xlu1 %v3210_v55, %s4175_s23  ;;  %3247 = vrot.lane.b32.xlu0 %v3209_v54, %s4175_s23 }
 0x693   : > { %v3171_v22 = vpop.permute.xlu1 %3170  ;;  %v3176_v50 = vpop.permute.xlu0 %3175 }
 0x694   : > { %v3212_v26 = vmul.f32 %v4978_v21, %v3171_v22  ;;  %v3213_v30 = vmul.f32 %v3176_v50, %v4997_v34 }
 0x696   : > { %3253 = vrot.lane.b32.xlu1 %v3212_v26, %s4175_s23  ;;  %3251 = vrot.lane.b32.xlu0 %v3211_v27, %s4175_s23 }
 0x697   : > { %v3181_v56 = vpop.permute.xlu1 %3180  ;;  %v3186_v43 = vpop.permute.xlu0 %3185 }
 0x698   : > { %v3214_v29 = vmul.f32 %v4992_v59, %v3181_v56  ;;  %v3215_v31 = vmul.f32 %v3186_v43, %v5011_v16 }
 0x69a   : > { %3257 = vrot.lane.b32.xlu1 %v3214_v29, %s4175_s23  ;;  %3255 = vrot.lane.b32.xlu0 %v3213_v30, %s4175_s23 }
 0x69b   : > { %v3191_v53 = vpop.permute.xlu1 %3190  ;;  %v3196_v47 = vpop.permute.xlu0 %3195 }
 0x69c   : > { %v3216_v21 = vmul.f32 %v5006_v12, %v3191_v53  ;;  %v3217_v34 = vmul.f32 %v3196_v47, %v5027_v11  ;;  %v3578_v12 = vld [vmem:[%s5354_s13] ss:$0 sm:$0xff] }
 0x69e   : > { %3261 = vrot.lane.b32.xlu1 %v3216_v21, %s4175_s23  ;;  %3259 = vrot.lane.b32.xlu0 %v3215_v31, %s4175_s23 }
 0x69f   : > { %v3201_v57 = vpop.permute.xlu1 %3200 }
 0x6a0   : > { %v3218_v59 = vmul.f32 %v5020_v35, %v3201_v57 }
 0x6a2   : > { %3265 = vrot.lane.b32.xlu1 %v3218_v59, %s4175_s23  ;;  %3263 = vrot.lane.b32.xlu0 %v3217_v34, %s4175_s23 }
 0x6e2   : > { %v3103_v16 = vpop.f32.mrf.mxu1 }
 0x6e3   : > { %v3104_v35 = vadd.f32 %v3578_v12, %v3103_v16 }
 0x6e4   : > { %v4022_v11 = vpop.f32.mrf.mxu1 }
 0x6e5   : > { %3301 = vst.msk [vmem:[%s511_s26] sm:$0xff] %vm3300_vm10, %v3104_v35 }
 0x6f2   : > { %v3238_v46 = vpop.permute.xlu1 %3237 }
 0x6f3   : > { %3285 = vst.msk [vmem:[%s4920_s24 + $0x8] sm:$0xff] %vm3283_vm11, %v3238_v46 }
 0x6f4   : > { %v3236_v28 = vpop.permute.xlu0 %3235 }
 0x6f5   : > { %3284 = vst.msk [vmem:[%s4920_s24] sm:$0xff] %vm3283_vm11, %v3236_v28 }
 0x6f8   : > { %v3242_v58 = vpop.permute.xlu1 %3241 }
 0x6f9   : > { %3287 = vst.msk [vmem:[%s4920_s24 + $0x18] sm:$0xff] %vm3283_vm11, %v3242_v58 }
 0x6fc   : > { %v3240_v49 = vpop.permute.xlu0 %3239 }
 0x6fd   : > { %3286 = vst.msk [vmem:[%s4920_s24 + $0x10] sm:$0xff] %vm3283_vm11, %v3240_v49 }
 0x700   : > { %v3246_v32 = vpop.permute.xlu1 %3245  ;;  %v3244_v33 = vpop.permute.xlu0 %3243 }
 0x701   : > { %3289 = vst.msk [vmem:[%s4920_s24 + $0x28] sm:$0xff] %vm3283_vm11, %v3246_v32  ;;  %3288 = vst.msk [vmem:[%s4920_s24 + $0x20] sm:$0xff] %vm3283_vm11, %v3244_v33 }
 0x704   : > { %v3250_v44 = vpop.permute.xlu1 %3249  ;;  %v3248_v52 = vpop.permute.xlu0 %3247 }
 0x705   : > { %3291 = vst.msk [vmem:[%s4920_s24 + $0x38] sm:$0xff] %vm3283_vm11, %v3250_v44  ;;  %3290 = vst.msk [vmem:[%s4920_s24 + $0x30] sm:$0xff] %vm3283_vm11, %v3248_v52 }
 0x708   : > { %v3254_v45 = vpop.permute.xlu1 %3253  ;;  %v3252_v40 = vpop.permute.xlu0 %3251 }
 0x709   : > { %3293 = vst.msk [vmem:[%s4920_s24 + $0x48] sm:$0xff] %vm3283_vm11, %v3254_v45  ;;  %3292 = vst.msk [vmem:[%s4920_s24 + $0x40] sm:$0xff] %vm3283_vm11, %v3252_v40 }
 0x70c   : > { %v3258_v42 = vpop.permute.xlu1 %3257  ;;  %v3256_v60 = vpop.permute.xlu0 %3255 }
 0x70d   : > { %3295 = vst.msk [vmem:[%s4920_s24 + $0x58] sm:$0xff] %vm3283_vm11, %v3258_v42  ;;  %3294 = vst.msk [vmem:[%s4920_s24 + $0x50] sm:$0xff] %vm3283_vm11, %v3256_v60 }
 0x710   : > { %v3262_v62 = vpop.permute.xlu1 %3261  ;;  %v3260_v63 = vpop.permute.xlu0 %3259 }
 0x711   : > { %3297 = vst.msk [vmem:[%s4920_s24 + $0x68] sm:$0xff] %vm3283_vm11, %v3262_v62  ;;  %3296 = vst.msk [vmem:[%s4920_s24 + $0x60] sm:$0xff] %vm3283_vm11, %v3260_v63 }
 0x714   : > { %v3266_v0 = vpop.permute.xlu1 %3265  ;;  %v3264_v36 = vpop.permute.xlu0 %3263 }
 0x715   : > { %3299 = vst.msk [vmem:[%s4920_s24 + $0x78] sm:$0xff] %vm3283_vm11, %v3266_v0  ;;  %3298 = vst.msk [vmem:[%s4920_s24 + $0x70] sm:$0xff] %vm3283_vm11, %v3264_v36 }
 0x716 PF: > { %s26_s18 = sadd.s32 1, %s4170_s18  }
 0x717   : > { %p23_p6 = scmp.ge.s32.totalorder %s26_s18, 4  }
 0x719   :  { %25 = sbr.rel (!%p23_p6) target bundleno = 1 (0x1), region = 118 }

</bundles_post_ra>
